<compile_context>
chip_gen: v5e
topology: v5e:2x2
jax: 0.10.0
libtpu: 0.0.40
codegen_flags: <defaults>
</compile_context>

<pallas_src>
import functools

import jax
import jax.numpy as jnp
from jax import lax
from jax.experimental import pallas as pl
from jax.experimental.pallas import tpu as pltpu

HIDDEN_SIZE = 100
INPUT_SIZE = 306
NUM_LAYERS = 1

LANE = 128
SUBLANE = 8


def _round_up(n, m):
    return ((n + m - 1) // m) * m


def _lstm1_kernel(x_ref, wx_ref, wh_ref, b_ref, wfc_ref, bfc_ref, out_ref,
                  xproj_sc, *, seq_len, batch_pad):
    Hp = wh_ref.shape[0]                     # padded hidden size (128)

    # One-shot input projection for ALL timesteps (off the serial critical path):
    #   (T*Bp, Fp) @ (Fp, 4*Hp) + b  ->  (T*Bp, 4*Hp)
    xproj_sc[...] = (jnp.dot(x_ref[...], wx_ref[...],
                             preferred_element_type=jnp.float32)
                     + b_ref[...])

    wh = wh_ref[...]                         # (Hp, 4*Hp), hoisted out of the loop

    def step(t, carry):
        h, c = carry
        start = pl.multiple_of(t * batch_pad, batch_pad)
        x_proj_t = xproj_sc[pl.ds(start, batch_pad), :]          # (Bp, 4*Hp)
        gates = x_proj_t + jnp.dot(h, wh, preferred_element_type=jnp.float32)
        # PyTorch gate order i, f, g, o; each gate occupies its own 128-lane block.
        i_g = jax.nn.sigmoid(gates[:, 0 * Hp:1 * Hp])
        f_g = jax.nn.sigmoid(gates[:, 1 * Hp:2 * Hp])
        g_g = jnp.tanh(gates[:, 2 * Hp:3 * Hp])
        o_g = jax.nn.sigmoid(gates[:, 3 * Hp:4 * Hp])
        c_new = f_g * c + i_g * g_g
        h_new = o_g * jnp.tanh(c_new)
        return h_new, c_new

    h0 = jnp.zeros((batch_pad, Hp), jnp.float32)
    c0 = jnp.zeros((batch_pad, Hp), jnp.float32)
    h_n, _ = lax.fori_loop(0, seq_len, step, (h0, c0), unroll=True)

    # hn -> relu -> fc_1 -> sigmoid.  fc weight is padded to 128 output lanes so
    # the final store is a full-tile (Bp, 128) unmasked write.
    hn_relu = jnp.maximum(h_n, 0.0)
    logit = jnp.dot(hn_relu, wfc_ref[...],
                    preferred_element_type=jnp.float32) + bfc_ref[...]
    out_ref[...] = jax.nn.sigmoid(logit)


def lstm1_forward(x, params):
    """x: (B, T, F) float32 (batch_first, like the PyTorch module). Returns (B,)."""
    B, T, F = x.shape
    H = params["w_hh"].shape[1]

    Bp = _round_up(B, SUBLANE)               # 2  -> 8
    Fp = _round_up(F, LANE)                  # 306 -> 384
    Hp = _round_up(H, LANE)                  # 100 -> 128
    G = 4 * Hp                               # 512

    # Time-major, zero-padded, flattened input: (T*Bp, Fp).
    x_tbf = jnp.transpose(x, (1, 0, 2)).astype(jnp.float32)      # (T, B, F)
    x_pad = jnp.zeros((T, Bp, Fp), jnp.float32).at[:, :B, :F].set(x_tbf)
    x_flat = x_pad.reshape(T * Bp, Fp)

    # Per-gate padded weights (PyTorch gate order i, f, g, o); each gate lands in
    # its own 128-lane block. Padded rows/cols are zero -> exact results, padded
    # hidden units stay identically zero through the recurrence.
    w_ih = params["w_ih"].reshape(4, H, F)
    w_hh = params["w_hh"].reshape(4, H, H)
    bias = (params["b_ih"] + params["b_hh"]).reshape(4, H)

    wx = jnp.zeros((Fp, G), jnp.float32)
    wh = jnp.zeros((Hp, G), jnp.float32)
    b = jnp.zeros((1, G), jnp.float32)
    for k in range(4):
        wx = wx.at[:F, k * Hp:k * Hp + H].set(w_ih[k].T)
        wh = wh.at[:H, k * Hp:k * Hp + H].set(w_hh[k].T)
        b = b.at[0, k * Hp:k * Hp + H].set(bias[k])

    wfc = jnp.zeros((Hp, LANE), jnp.float32).at[:H, 0].set(params["w_fc"][0])
    bfc = jnp.zeros((1, LANE), jnp.float32).at[0, 0].set(params["b_fc"][0])

    kernel = functools.partial(_lstm1_kernel, seq_len=T, batch_pad=Bp)

    out = pl.pallas_call(
        kernel,
        out_shape=jax.ShapeDtypeStruct((Bp, LANE), jnp.float32),
        grid_spec=pltpu.PrefetchScalarGridSpec(
            num_scalar_prefetch=0,
            grid=(1,),
            in_specs=[
                pl.BlockSpec((T * Bp, Fp), lambda i: (0, 0)),     # x (all steps)
                pl.BlockSpec((Fp, G), lambda i: (0, 0)),          # Wx padded
                pl.BlockSpec((Hp, G), lambda i: (0, 0)),          # Wh padded
                pl.BlockSpec((1, G), lambda i: (0, 0)),           # fused bias
                pl.BlockSpec((Hp, LANE), lambda i: (0, 0)),       # fc weight padded
                pl.BlockSpec((1, LANE), lambda i: (0, 0)),        # fc bias padded
            ],
            out_specs=pl.BlockSpec((Bp, LANE), lambda i: (0, 0)),
            scratch_shapes=[
                pltpu.VMEM((T * Bp, G), jnp.float32),             # x @ Wx + b
            ],
        ),
        compiler_params=pltpu.CompilerParams(
            dimension_semantics=("arbitrary",)),
    )(x_flat, wx, wh, b, wfc, bfc)
    return out[:B, 0]                        # .flatten() in the PyTorch module


def ref_forward(x, params):
    """Pure-JAX reference of the same forward pass."""
    B = x.shape[0]
    H = params["w_hh"].shape[1]

    def step(carry, x_t):
        h, c = carry
        gates = (x_t @ params["w_ih"].T + h @ params["w_hh"].T
                 + params["b_ih"] + params["b_hh"])
        i_g, f_g, g_g, o_g = jnp.split(gates, 4, axis=-1)
        i_g = jax.nn.sigmoid(i_g)
        f_g = jax.nn.sigmoid(f_g)
        g_g = jnp.tanh(g_g)
        o_g = jax.nn.sigmoid(o_g)
        c = f_g * c + i_g * g_g
        h = o_g * jnp.tanh(c)
        return (h, c), None

    h0 = jnp.zeros((B, H), jnp.float32)
    c0 = jnp.zeros((B, H), jnp.float32)
    (hn, _), _ = jax.lax.scan(step, (h0, c0), jnp.transpose(x, (1, 0, 2)))
    out = jnp.maximum(hn, 0.0)
    return jax.nn.sigmoid(out @ params["w_fc"].T + params["b_fc"]).reshape(-1)


def init_params(key, input_size, hidden_size):
    """Deterministic init matching PyTorch's U(-1/sqrt(H), 1/sqrt(H)) convention."""
    k = 1.0 / jnp.sqrt(jnp.float32(hidden_size))
    keys = jax.random.split(key, 6)
    u = lambda kk, shape: jax.random.uniform(kk, shape, jnp.float32, -k, k)
    return {
        "w_ih": u(keys[0], (4 * hidden_size, input_size)),
        "w_hh": u(keys[1], (4 * hidden_size, hidden_size)),
        "b_ih": u(keys[2], (4 * hidden_size,)),
        "b_hh": u(keys[3], (4 * hidden_size,)),
        "w_fc": u(keys[4], (1, hidden_size)),
        "b_fc": u(keys[5], (1,)),
    }


if __name__ == "__main__":
    B, T = 2, 8
    key = jax.random.PRNGKey(0)
    k_param, k_x = jax.random.split(key)
    params = init_params(k_param, INPUT_SIZE, HIDDEN_SIZE)
    x = jax.random.normal(k_x, (B, T, INPUT_SIZE), jnp.float32)

    out = lstm1_forward(x, params)
    out = jax.block_until_ready(out)

    ref = ref_forward(x, params)
    assert out.shape == (B,), out.shape
    assert jnp.allclose(out, ref, atol=2e-5, rtol=2e-5), (out, ref)
    print("KERNEL_OK")
</pallas_src>

<mosaic_0001>
module attributes {stable_mosaic.version = 11 : i64} {
  func.func @_lstm1_kernel(%arg0: i32, %arg1: memref<64x384xf32, #tpu.memory_space<vmem>>, %arg2: memref<384x512xf32, #tpu.memory_space<vmem>>, %arg3: memref<128x512xf32, #tpu.memory_space<vmem>>, %arg4: memref<1x512xf32, #tpu.memory_space<vmem>>, %arg5: memref<128x128xf32, #tpu.memory_space<vmem>>, %arg6: memref<1x128xf32, #tpu.memory_space<vmem>>, %arg7: memref<8x128xf32, #tpu.memory_space<vmem>>, %arg8: memref<64x512xf32, #tpu.memory_space<vmem>>) attributes {dimension_semantics = [#tpu.dimension_semantics<arbitrary>], iteration_bounds = array<i64: 1>, scalar_prefetch = 0 : i64, scratch_operands = 1 : i64, tpu.core_type = #tpu.core_type<tc>, window_params = [{pipeline_mode = #tpu.pipeline_mode<synchronous>, transform_indices = @transform_0, window_bounds = array<i64: 64, 384>}, {pipeline_mode = #tpu.pipeline_mode<synchronous>, transform_indices = @transform_1, window_bounds = array<i64: 384, 512>}, {pipeline_mode = #tpu.pipeline_mode<synchronous>, transform_indices = @transform_2, window_bounds = array<i64: 128, 512>}, {pipeline_mode = #tpu.pipeline_mode<synchronous>, transform_indices = @transform_3, window_bounds = array<i64: 1, 512>}, {pipeline_mode = #tpu.pipeline_mode<synchronous>, transform_indices = @transform_4, window_bounds = array<i64: 128, 128>}, {pipeline_mode = #tpu.pipeline_mode<synchronous>, transform_indices = @transform_5, window_bounds = array<i64: 1, 128>}, {pipeline_mode = #tpu.pipeline_mode<synchronous>, transform_indices = @transform_6, window_bounds = array<i64: 8, 128>}]} {
    %c0 = arith.constant 0 : index
    %c0_0 = arith.constant 0 : index
    %0 = vector.load %arg1[%c0, %c0_0] : memref<64x384xf32, #tpu.memory_space<vmem>>, vector<64x384xf32>
    %c0_1 = arith.constant 0 : index
    %c0_2 = arith.constant 0 : index
    %1 = vector.load %arg2[%c0_1, %c0_2] : memref<384x512xf32, #tpu.memory_space<vmem>>, vector<384x512xf32>
    %cst = arith.constant dense<0.000000e+00> : vector<64x512xf32>
    %2 = tpu.matmul %0, %1, %cst {dimension_numbers = #tpu.dot_dimension_numbers<[1], [0], [0], [1], [0, 0, 1, 1], [], []>} : vector<64x384xf32>, vector<384x512xf32>, vector<64x512xf32> -> vector<64x512xf32>
    %c0_3 = arith.constant 0 : index
    %c0_4 = arith.constant 0 : index
    %3 = vector.load %arg4[%c0_3, %c0_4] : memref<1x512xf32, #tpu.memory_space<vmem>>, vector<1x512xf32>
    %4 = vector.broadcast %3 : vector<1x512xf32> to vector<64x512xf32>
    %5 = arith.addf %2, %4 : vector<64x512xf32>
    %c0_5 = arith.constant 0 : index
    %c0_6 = arith.constant 0 : index
    %6 = vector.load %arg8[%c0_5, %c0_6] : memref<64x512xf32, #tpu.memory_space<vmem>>, vector<64x512xf32>
    tpu.vector_store %arg8[%c0_5, %c0_6], %5 {strides = array<i32>} : memref<64x512xf32, #tpu.memory_space<vmem>>, vector<64x512xf32>,
    %c0_7 = arith.constant 0 : index
    %c0_8 = arith.constant 0 : index
    %7 = vector.load %arg3[%c0_7, %c0_8] : memref<128x512xf32, #tpu.memory_space<vmem>>, vector<128x512xf32>
    %cst_9 = arith.constant 0.000000e+00 : f32
    %8 = vector.broadcast %cst_9 : f32 to vector<8x128xf32>
    %cst_10 = arith.constant 0.000000e+00 : f32
    %9 = vector.broadcast %cst_10 : f32 to vector<8x128xf32>
    %c0_i32 = arith.constant 0 : i32
    %c8_i32 = arith.constant 8 : i32
    %10 = arith.muli %c0_i32, %c8_i32 : i32
    %11 = tpu.assume_multiple %10, 8 : i32
    %12 = arith.index_cast %11 : i32 to index
    %c0_11 = arith.constant 0 : index
    %13 = vector.load %arg8[%12, %c0_11] : memref<64x512xf32, #tpu.memory_space<vmem>>, vector<8x512xf32>
    %cst_12 = arith.constant dense<0.000000e+00> : vector<8x512xf32>
    %14 = tpu.matmul %8, %7, %cst_12 {dimension_numbers = #tpu.dot_dimension_numbers<[1], [0], [0], [1], [0, 0, 1, 1], [], []>} : vector<8x128xf32>, vector<128x512xf32>, vector<8x512xf32> -> vector<8x512xf32>
    %15 = arith.addf %13, %14 : vector<8x512xf32>
    %16 = vector.extract_strided_slice %15 {offsets = [0, 0], sizes = [8, 128], strides = [1, 1]} : vector<8x512xf32> to vector<8x128xf32>
    %17 = arith.negf %16 : vector<8x128xf32>
    %18 = math.exp %17 : vector<8x128xf32>
    %cst_13 = arith.constant 1.000000e+00 : f32
    %19 = vector.broadcast %cst_13 : f32 to vector<8x128xf32>
    %20 = arith.addf %19, %18 : vector<8x128xf32>
    %21 = arith.divf %19, %20 : vector<8x128xf32>
    %22 = vector.extract_strided_slice %15 {offsets = [0, 128], sizes = [8, 128], strides = [1, 1]} : vector<8x512xf32> to vector<8x128xf32>
    %23 = arith.negf %22 : vector<8x128xf32>
    %24 = math.exp %23 : vector<8x128xf32>
    %cst_14 = arith.constant 1.000000e+00 : f32
    %25 = vector.broadcast %cst_14 : f32 to vector<8x128xf32>
    %26 = arith.addf %25, %24 : vector<8x128xf32>
    %27 = arith.divf %25, %26 : vector<8x128xf32>
    %28 = vector.extract_strided_slice %15 {offsets = [0, 256], sizes = [8, 128], strides = [1, 1]} : vector<8x512xf32> to vector<8x128xf32>
    %29 = math.tanh %28 : vector<8x128xf32>
    %30 = vector.extract_strided_slice %15 {offsets = [0, 384], sizes = [8, 128], strides = [1, 1]} : vector<8x512xf32> to vector<8x128xf32>
    %31 = arith.negf %30 : vector<8x128xf32>
    %32 = math.exp %31 : vector<8x128xf32>
    %cst_15 = arith.constant 1.000000e+00 : f32
    %33 = vector.broadcast %cst_15 : f32 to vector<8x128xf32>
    %34 = arith.addf %33, %32 : vector<8x128xf32>
    %35 = arith.divf %33, %34 : vector<8x128xf32>
    %36 = arith.mulf %27, %9 : vector<8x128xf32>
    %37 = arith.mulf %21, %29 : vector<8x128xf32>
    %38 = arith.addf %36, %37 : vector<8x128xf32>
    %39 = math.tanh %38 : vector<8x128xf32>
    %40 = arith.mulf %35, %39 : vector<8x128xf32>
    %c1_i32 = arith.constant 1 : i32
    %c8_i32_16 = arith.constant 8 : i32
    %41 = arith.muli %c1_i32, %c8_i32_16 : i32
    %42 = tpu.assume_multiple %41, 8 : i32
    %43 = arith.index_cast %42 : i32 to index
    %c0_17 = arith.constant 0 : index
    %44 = vector.load %arg8[%43, %c0_17] : memref<64x512xf32, #tpu.memory_space<vmem>>, vector<8x512xf32>
    %cst_18 = arith.constant dense<0.000000e+00> : vector<8x512xf32>
    %45 = tpu.matmul %40, %7, %cst_18 {dimension_numbers = #tpu.dot_dimension_numbers<[1], [0], [0], [1], [0, 0, 1, 1], [], []>} : vector<8x128xf32>, vector<128x512xf32>, vector<8x512xf32> -> vector<8x512xf32>
    %46 = arith.addf %44, %45 : vector<8x512xf32>
    %47 = vector.extract_strided_slice %46 {offsets = [0, 0], sizes = [8, 128], strides = [1, 1]} : vector<8x512xf32> to vector<8x128xf32>
    %48 = arith.negf %47 : vector<8x128xf32>
    %49 = math.exp %48 : vector<8x128xf32>
    %cst_19 = arith.constant 1.000000e+00 : f32
    %50 = vector.broadcast %cst_19 : f32 to vector<8x128xf32>
    %51 = arith.addf %50, %49 : vector<8x128xf32>
    %52 = arith.divf %50, %51 : vector<8x128xf32>
    %53 = vector.extract_strided_slice %46 {offsets = [0, 128], sizes = [8, 128], strides = [1, 1]} : vector<8x512xf32> to vector<8x128xf32>
    %54 = arith.negf %53 : vector<8x128xf32>
    %55 = math.exp %54 : vector<8x128xf32>
    %cst_20 = arith.constant 1.000000e+00 : f32
    %56 = vector.broadcast %cst_20 : f32 to vector<8x128xf32>
    %57 = arith.addf %56, %55 : vector<8x128xf32>
    %58 = arith.divf %56, %57 : vector<8x128xf32>
    %59 = vector.extract_strided_slice %46 {offsets = [0, 256], sizes = [8, 128], strides = [1, 1]} : vector<8x512xf32> to vector<8x128xf32>
    %60 = math.tanh %59 : vector<8x128xf32>
    %61 = vector.extract_strided_slice %46 {offsets = [0, 384], sizes = [8, 128], strides = [1, 1]} : vector<8x512xf32> to vector<8x128xf32>
    %62 = arith.negf %61 : vector<8x128xf32>
    %63 = math.exp %62 : vector<8x128xf32>
    %cst_21 = arith.constant 1.000000e+00 : f32
    %64 = vector.broadcast %cst_21 : f32 to vector<8x128xf32>
    %65 = arith.addf %64, %63 : vector<8x128xf32>
    %66 = arith.divf %64, %65 : vector<8x128xf32>
    %67 = arith.mulf %58, %38 : vector<8x128xf32>
    %68 = arith.mulf %52, %60 : vector<8x128xf32>
    %69 = arith.addf %67, %68 : vector<8x128xf32>
    %70 = math.tanh %69 : vector<8x128xf32>
    %71 = arith.mulf %66, %70 : vector<8x128xf32>
    %c2_i32 = arith.constant 2 : i32
    %c8_i32_22 = arith.constant 8 : i32
    %72 = arith.muli %c2_i32, %c8_i32_22 : i32
    %73 = tpu.assume_multiple %72, 8 : i32
    %74 = arith.index_cast %73 : i32 to index
    %c0_23 = arith.constant 0 : index
    %75 = vector.load %arg8[%74, %c0_23] : memref<64x512xf32, #tpu.memory_space<vmem>>, vector<8x512xf32>
    %cst_24 = arith.constant dense<0.000000e+00> : vector<8x512xf32>
    %76 = tpu.matmul %71, %7, %cst_24 {dimension_numbers = #tpu.dot_dimension_numbers<[1], [0], [0], [1], [0, 0, 1, 1], [], []>} : vector<8x128xf32>, vector<128x512xf32>, vector<8x512xf32> -> vector<8x512xf32>
    %77 = arith.addf %75, %76 : vector<8x512xf32>
    %78 = vector.extract_strided_slice %77 {offsets = [0, 0], sizes = [8, 128], strides = [1, 1]} : vector<8x512xf32> to vector<8x128xf32>
    %79 = arith.negf %78 : vector<8x128xf32>
    %80 = math.exp %79 : vector<8x128xf32>
    %cst_25 = arith.constant 1.000000e+00 : f32
    %81 = vector.broadcast %cst_25 : f32 to vector<8x128xf32>
    %82 = arith.addf %81, %80 : vector<8x128xf32>
    %83 = arith.divf %81, %82 : vector<8x128xf32>
    %84 = vector.extract_strided_slice %77 {offsets = [0, 128], sizes = [8, 128], strides = [1, 1]} : vector<8x512xf32> to vector<8x128xf32>
    %85 = arith.negf %84 : vector<8x128xf32>
    %86 = math.exp %85 : vector<8x128xf32>
    %cst_26 = arith.constant 1.000000e+00 : f32
    %87 = vector.broadcast %cst_26 : f32 to vector<8x128xf32>
    %88 = arith.addf %87, %86 : vector<8x128xf32>
    %89 = arith.divf %87, %88 : vector<8x128xf32>
    %90 = vector.extract_strided_slice %77 {offsets = [0, 256], sizes = [8, 128], strides = [1, 1]} : vector<8x512xf32> to vector<8x128xf32>
    %91 = math.tanh %90 : vector<8x128xf32>
    %92 = vector.extract_strided_slice %77 {offsets = [0, 384], sizes = [8, 128], strides = [1, 1]} : vector<8x512xf32> to vector<8x128xf32>
    %93 = arith.negf %92 : vector<8x128xf32>
    %94 = math.exp %93 : vector<8x128xf32>
    %cst_27 = arith.constant 1.000000e+00 : f32
    %95 = vector.broadcast %cst_27 : f32 to vector<8x128xf32>
    %96 = arith.addf %95, %94 : vector<8x128xf32>
    %97 = arith.divf %95, %96 : vector<8x128xf32>
    %98 = arith.mulf %89, %69 : vector<8x128xf32>
    %99 = arith.mulf %83, %91 : vector<8x128xf32>
    %100 = arith.addf %98, %99 : vector<8x128xf32>
    %101 = math.tanh %100 : vector<8x128xf32>
    %102 = arith.mulf %97, %101 : vector<8x128xf32>
    %c3_i32 = arith.constant 3 : i32
    %c8_i32_28 = arith.constant 8 : i32
    %103 = arith.muli %c3_i32, %c8_i32_28 : i32
    %104 = tpu.assume_multiple %103, 8 : i32
    %105 = arith.index_cast %104 : i32 to index
    %c0_29 = arith.constant 0 : index
    %106 = vector.load %arg8[%105, %c0_29] : memref<64x512xf32, #tpu.memory_space<vmem>>, vector<8x512xf32>
    %cst_30 = arith.constant dense<0.000000e+00> : vector<8x512xf32>
    %107 = tpu.matmul %102, %7, %cst_30 {dimension_numbers = #tpu.dot_dimension_numbers<[1], [0], [0], [1], [0, 0, 1, 1], [], []>} : vector<8x128xf32>, vector<128x512xf32>, vector<8x512xf32> -> vector<8x512xf32>
    %108 = arith.addf %106, %107 : vector<8x512xf32>
    %109 = vector.extract_strided_slice %108 {offsets = [0, 0], sizes = [8, 128], strides = [1, 1]} : vector<8x512xf32> to vector<8x128xf32>
    %110 = arith.negf %109 : vector<8x128xf32>
    %111 = math.exp %110 : vector<8x128xf32>
    %cst_31 = arith.constant 1.000000e+00 : f32
    %112 = vector.broadcast %cst_31 : f32 to vector<8x128xf32>
    %113 = arith.addf %112, %111 : vector<8x128xf32>
    %114 = arith.divf %112, %113 : vector<8x128xf32>
    %115 = vector.extract_strided_slice %108 {offsets = [0, 128], sizes = [8, 128], strides = [1, 1]} : vector<8x512xf32> to vector<8x128xf32>
    %116 = arith.negf %115 : vector<8x128xf32>
    %117 = math.exp %116 : vector<8x128xf32>
    %cst_32 = arith.constant 1.000000e+00 : f32
    %118 = vector.broadcast %cst_32 : f32 to vector<8x128xf32>
    %119 = arith.addf %118, %117 : vector<8x128xf32>
    %120 = arith.divf %118, %119 : vector<8x128xf32>
    %121 = vector.extract_strided_slice %108 {offsets = [0, 256], sizes = [8, 128], strides = [1, 1]} : vector<8x512xf32> to vector<8x128xf32>
    %122 = math.tanh %121 : vector<8x128xf32>
    %123 = vector.extract_strided_slice %108 {offsets = [0, 384], sizes = [8, 128], strides = [1, 1]} : vector<8x512xf32> to vector<8x128xf32>
    %124 = arith.negf %123 : vector<8x128xf32>
    %125 = math.exp %124 : vector<8x128xf32>
    %cst_33 = arith.constant 1.000000e+00 : f32
    %126 = vector.broadcast %cst_33 : f32 to vector<8x128xf32>
    %127 = arith.addf %126, %125 : vector<8x128xf32>
    %128 = arith.divf %126, %127 : vector<8x128xf32>
    %129 = arith.mulf %120, %100 : vector<8x128xf32>
    %130 = arith.mulf %114, %122 : vector<8x128xf32>
    %131 = arith.addf %129, %130 : vector<8x128xf32>
    %132 = math.tanh %131 : vector<8x128xf32>
    %133 = arith.mulf %128, %132 : vector<8x128xf32>
    %c4_i32 = arith.constant 4 : i32
    %c8_i32_34 = arith.constant 8 : i32
    %134 = arith.muli %c4_i32, %c8_i32_34 : i32
    %135 = tpu.assume_multiple %134, 8 : i32
    %136 = arith.index_cast %135 : i32 to index
    %c0_35 = arith.constant 0 : index
    %137 = vector.load %arg8[%136, %c0_35] : memref<64x512xf32, #tpu.memory_space<vmem>>, vector<8x512xf32>
    %cst_36 = arith.constant dense<0.000000e+00> : vector<8x512xf32>
    %138 = tpu.matmul %133, %7, %cst_36 {dimension_numbers = #tpu.dot_dimension_numbers<[1], [0], [0], [1], [0, 0, 1, 1], [], []>} : vector<8x128xf32>, vector<128x512xf32>, vector<8x512xf32> -> vector<8x512xf32>
    %139 = arith.addf %137, %138 : vector<8x512xf32>
    %140 = vector.extract_strided_slice %139 {offsets = [0, 0], sizes = [8, 128], strides = [1, 1]} : vector<8x512xf32> to vector<8x128xf32>
    %141 = arith.negf %140 : vector<8x128xf32>
    %142 = math.exp %141 : vector<8x128xf32>
    %cst_37 = arith.constant 1.000000e+00 : f32
    %143 = vector.broadcast %cst_37 : f32 to vector<8x128xf32>
    %144 = arith.addf %143, %142 : vector<8x128xf32>
    %145 = arith.divf %143, %144 : vector<8x128xf32>
    %146 = vector.extract_strided_slice %139 {offsets = [0, 128], sizes = [8, 128], strides = [1, 1]} : vector<8x512xf32> to vector<8x128xf32>
    %147 = arith.negf %146 : vector<8x128xf32>
    %148 = math.exp %147 : vector<8x128xf32>
    %cst_38 = arith.constant 1.000000e+00 : f32
    %149 = vector.broadcast %cst_38 : f32 to vector<8x128xf32>
    %150 = arith.addf %149, %148 : vector<8x128xf32>
    %151 = arith.divf %149, %150 : vector<8x128xf32>
    %152 = vector.extract_strided_slice %139 {offsets = [0, 256], sizes = [8, 128], strides = [1, 1]} : vector<8x512xf32> to vector<8x128xf32>
    %153 = math.tanh %152 : vector<8x128xf32>
    %154 = vector.extract_strided_slice %139 {offsets = [0, 384], sizes = [8, 128], strides = [1, 1]} : vector<8x512xf32> to vector<8x128xf32>
    %155 = arith.negf %154 : vector<8x128xf32>
    %156 = math.exp %155 : vector<8x128xf32>
    %cst_39 = arith.constant 1.000000e+00 : f32
    %157 = vector.broadcast %cst_39 : f32 to vector<8x128xf32>
    %158 = arith.addf %157, %156 : vector<8x128xf32>
    %159 = arith.divf %157, %158 : vector<8x128xf32>
    %160 = arith.mulf %151, %131 : vector<8x128xf32>
    %161 = arith.mulf %145, %153 : vector<8x128xf32>
    %162 = arith.addf %160, %161 : vector<8x128xf32>
    %163 = math.tanh %162 : vector<8x128xf32>
    %164 = arith.mulf %159, %163 : vector<8x128xf32>
    %c5_i32 = arith.constant 5 : i32
    %c8_i32_40 = arith.constant 8 : i32
    %165 = arith.muli %c5_i32, %c8_i32_40 : i32
    %166 = tpu.assume_multiple %165, 8 : i32
    %167 = arith.index_cast %166 : i32 to index
    %c0_41 = arith.constant 0 : index
    %168 = vector.load %arg8[%167, %c0_41] : memref<64x512xf32, #tpu.memory_space<vmem>>, vector<8x512xf32>
    %cst_42 = arith.constant dense<0.000000e+00> : vector<8x512xf32>
    %169 = tpu.matmul %164, %7, %cst_42 {dimension_numbers = #tpu.dot_dimension_numbers<[1], [0], [0], [1], [0, 0, 1, 1], [], []>} : vector<8x128xf32>, vector<128x512xf32>, vector<8x512xf32> -> vector<8x512xf32>
    %170 = arith.addf %168, %169 : vector<8x512xf32>
    %171 = vector.extract_strided_slice %170 {offsets = [0, 0], sizes = [8, 128], strides = [1, 1]} : vector<8x512xf32> to vector<8x128xf32>
    %172 = arith.negf %171 : vector<8x128xf32>
    %173 = math.exp %172 : vector<8x128xf32>
    %cst_43 = arith.constant 1.000000e+00 : f32
    %174 = vector.broadcast %cst_43 : f32 to vector<8x128xf32>
    %175 = arith.addf %174, %173 : vector<8x128xf32>
    %176 = arith.divf %174, %175 : vector<8x128xf32>
    %177 = vector.extract_strided_slice %170 {offsets = [0, 128], sizes = [8, 128], strides = [1, 1]} : vector<8x512xf32> to vector<8x128xf32>
    %178 = arith.negf %177 : vector<8x128xf32>
    %179 = math.exp %178 : vector<8x128xf32>
    %cst_44 = arith.constant 1.000000e+00 : f32
    %180 = vector.broadcast %cst_44 : f32 to vector<8x128xf32>
    %181 = arith.addf %180, %179 : vector<8x128xf32>
    %182 = arith.divf %180, %181 : vector<8x128xf32>
    %183 = vector.extract_strided_slice %170 {offsets = [0, 256], sizes = [8, 128], strides = [1, 1]} : vector<8x512xf32> to vector<8x128xf32>
    %184 = math.tanh %183 : vector<8x128xf32>
    %185 = vector.extract_strided_slice %170 {offsets = [0, 384], sizes = [8, 128], strides = [1, 1]} : vector<8x512xf32> to vector<8x128xf32>
    %186 = arith.negf %185 : vector<8x128xf32>
    %187 = math.exp %186 : vector<8x128xf32>
    %cst_45 = arith.constant 1.000000e+00 : f32
    %188 = vector.broadcast %cst_45 : f32 to vector<8x128xf32>
    %189 = arith.addf %188, %187 : vector<8x128xf32>
    %190 = arith.divf %188, %189 : vector<8x128xf32>
    %191 = arith.mulf %182, %162 : vector<8x128xf32>
    %192 = arith.mulf %176, %184 : vector<8x128xf32>
    %193 = arith.addf %191, %192 : vector<8x128xf32>
    %194 = math.tanh %193 : vector<8x128xf32>
    %195 = arith.mulf %190, %194 : vector<8x128xf32>
    %c6_i32 = arith.constant 6 : i32
    %c8_i32_46 = arith.constant 8 : i32
    %196 = arith.muli %c6_i32, %c8_i32_46 : i32
    %197 = tpu.assume_multiple %196, 8 : i32
    %198 = arith.index_cast %197 : i32 to index
    %c0_47 = arith.constant 0 : index
    %199 = vector.load %arg8[%198, %c0_47] : memref<64x512xf32, #tpu.memory_space<vmem>>, vector<8x512xf32>
    %cst_48 = arith.constant dense<0.000000e+00> : vector<8x512xf32>
    %200 = tpu.matmul %195, %7, %cst_48 {dimension_numbers = #tpu.dot_dimension_numbers<[1], [0], [0], [1], [0, 0, 1, 1], [], []>} : vector<8x128xf32>, vector<128x512xf32>, vector<8x512xf32> -> vector<8x512xf32>
    %201 = arith.addf %199, %200 : vector<8x512xf32>
    %202 = vector.extract_strided_slice %201 {offsets = [0, 0], sizes = [8, 128], strides = [1, 1]} : vector<8x512xf32> to vector<8x128xf32>
    %203 = arith.negf %202 : vector<8x128xf32>
    %204 = math.exp %203 : vector<8x128xf32>
    %cst_49 = arith.constant 1.000000e+00 : f32
    %205 = vector.broadcast %cst_49 : f32 to vector<8x128xf32>
    %206 = arith.addf %205, %204 : vector<8x128xf32>
    %207 = arith.divf %205, %206 : vector<8x128xf32>
    %208 = vector.extract_strided_slice %201 {offsets = [0, 128], sizes = [8, 128], strides = [1, 1]} : vector<8x512xf32> to vector<8x128xf32>
    %209 = arith.negf %208 : vector<8x128xf32>
    %210 = math.exp %209 : vector<8x128xf32>
    %cst_50 = arith.constant 1.000000e+00 : f32
    %211 = vector.broadcast %cst_50 : f32 to vector<8x128xf32>
    %212 = arith.addf %211, %210 : vector<8x128xf32>
    %213 = arith.divf %211, %212 : vector<8x128xf32>
    %214 = vector.extract_strided_slice %201 {offsets = [0, 256], sizes = [8, 128], strides = [1, 1]} : vector<8x512xf32> to vector<8x128xf32>
    %215 = math.tanh %214 : vector<8x128xf32>
    %216 = vector.extract_strided_slice %201 {offsets = [0, 384], sizes = [8, 128], strides = [1, 1]} : vector<8x512xf32> to vector<8x128xf32>
    %217 = arith.negf %216 : vector<8x128xf32>
    %218 = math.exp %217 : vector<8x128xf32>
    %cst_51 = arith.constant 1.000000e+00 : f32
    %219 = vector.broadcast %cst_51 : f32 to vector<8x128xf32>
    %220 = arith.addf %219, %218 : vector<8x128xf32>
    %221 = arith.divf %219, %220 : vector<8x128xf32>
    %222 = arith.mulf %213, %193 : vector<8x128xf32>
    %223 = arith.mulf %207, %215 : vector<8x128xf32>
    %224 = arith.addf %222, %223 : vector<8x128xf32>
    %225 = math.tanh %224 : vector<8x128xf32>
    %226 = arith.mulf %221, %225 : vector<8x128xf32>
    %c7_i32 = arith.constant 7 : i32
    %c8_i32_52 = arith.constant 8 : i32
    %227 = arith.muli %c7_i32, %c8_i32_52 : i32
    %228 = tpu.assume_multiple %227, 8 : i32
    %229 = arith.index_cast %228 : i32 to index
    %c0_53 = arith.constant 0 : index
    %230 = vector.load %arg8[%229, %c0_53] : memref<64x512xf32, #tpu.memory_space<vmem>>, vector<8x512xf32>
    %cst_54 = arith.constant dense<0.000000e+00> : vector<8x512xf32>
    %231 = tpu.matmul %226, %7, %cst_54 {dimension_numbers = #tpu.dot_dimension_numbers<[1], [0], [0], [1], [0, 0, 1, 1], [], []>} : vector<8x128xf32>, vector<128x512xf32>, vector<8x512xf32> -> vector<8x512xf32>
    %232 = arith.addf %230, %231 : vector<8x512xf32>
    %233 = vector.extract_strided_slice %232 {offsets = [0, 0], sizes = [8, 128], strides = [1, 1]} : vector<8x512xf32> to vector<8x128xf32>
    %234 = arith.negf %233 : vector<8x128xf32>
    %235 = math.exp %234 : vector<8x128xf32>
    %cst_55 = arith.constant 1.000000e+00 : f32
    %236 = vector.broadcast %cst_55 : f32 to vector<8x128xf32>
    %237 = arith.addf %236, %235 : vector<8x128xf32>
    %238 = arith.divf %236, %237 : vector<8x128xf32>
    %239 = vector.extract_strided_slice %232 {offsets = [0, 128], sizes = [8, 128], strides = [1, 1]} : vector<8x512xf32> to vector<8x128xf32>
    %240 = arith.negf %239 : vector<8x128xf32>
    %241 = math.exp %240 : vector<8x128xf32>
    %cst_56 = arith.constant 1.000000e+00 : f32
    %242 = vector.broadcast %cst_56 : f32 to vector<8x128xf32>
    %243 = arith.addf %242, %241 : vector<8x128xf32>
    %244 = arith.divf %242, %243 : vector<8x128xf32>
    %245 = vector.extract_strided_slice %232 {offsets = [0, 256], sizes = [8, 128], strides = [1, 1]} : vector<8x512xf32> to vector<8x128xf32>
    %246 = math.tanh %245 : vector<8x128xf32>
    %247 = vector.extract_strided_slice %232 {offsets = [0, 384], sizes = [8, 128], strides = [1, 1]} : vector<8x512xf32> to vector<8x128xf32>
    %248 = arith.negf %247 : vector<8x128xf32>
    %249 = math.exp %248 : vector<8x128xf32>
    %cst_57 = arith.constant 1.000000e+00 : f32
    %250 = vector.broadcast %cst_57 : f32 to vector<8x128xf32>
    %251 = arith.addf %250, %249 : vector<8x128xf32>
    %252 = arith.divf %250, %251 : vector<8x128xf32>
    %253 = arith.mulf %244, %224 : vector<8x128xf32>
    %254 = arith.mulf %238, %246 : vector<8x128xf32>
    %255 = arith.addf %253, %254 : vector<8x128xf32>
    %256 = math.tanh %255 : vector<8x128xf32>
    %257 = arith.mulf %252, %256 : vector<8x128xf32>
    %c8_i32_58 = arith.constant 8 : i32
    %cst_59 = arith.constant 0.000000e+00 : f32
    %258 = vector.broadcast %cst_59 : f32 to vector<8x128xf32>
    %259 = arith.maximumf %257, %258 : vector<8x128xf32>
    %c0_60 = arith.constant 0 : index
    %c0_61 = arith.constant 0 : index
    %260 = vector.load %arg5[%c0_60, %c0_61] : memref<128x128xf32, #tpu.memory_space<vmem>>, vector<128x128xf32>
    %cst_62 = arith.constant dense<0.000000e+00> : vector<8x128xf32>
    %261 = tpu.matmul %259, %260, %cst_62 {dimension_numbers = #tpu.dot_dimension_numbers<[1], [0], [0], [1], [0, 0, 1, 1], [], []>} : vector<8x128xf32>, vector<128x128xf32>, vector<8x128xf32> -> vector<8x128xf32>
    %c0_63 = arith.constant 0 : index
    %c0_64 = arith.constant 0 : index
    %262 = vector.load %arg6[%c0_63, %c0_64] : memref<1x128xf32, #tpu.memory_space<vmem>>, vector<1x128xf32>
    %263 = vector.broadcast %262 : vector<1x128xf32> to vector<8x128xf32>
    %264 = arith.addf %261, %263 : vector<8x128xf32>
    %265 = arith.negf %264 : vector<8x128xf32>
    %266 = math.exp %265 : vector<8x128xf32>
    %cst_65 = arith.constant 1.000000e+00 : f32
    %267 = vector.broadcast %cst_65 : f32 to vector<8x128xf32>
    %268 = arith.addf %267, %266 : vector<8x128xf32>
    %269 = arith.divf %267, %268 : vector<8x128xf32>
    %c0_66 = arith.constant 0 : index
    %c0_67 = arith.constant 0 : index
    %270 = vector.load %arg7[%c0_66, %c0_67] : memref<8x128xf32, #tpu.memory_space<vmem>>, vector<8x128xf32>
    tpu.vector_store %arg7[%c0_66, %c0_67], %269 {strides = array<i32>} : memref<8x128xf32, #tpu.memory_space<vmem>>, vector<8x128xf32>,
    return
  }
  func.func @transform_0(%arg0: i32) -> (i32, i32) {
    %c0_i32 = arith.constant 0 : i32
    %c0_i32_0 = arith.constant 0 : i32
    %c0_i32_1 = arith.constant 0 : i32
    return %c0_i32, %c0_i32_0 : i32, i32
  }
  func.func @transform_1(%arg0: i32) -> (i32, i32) {
    %c0_i32 = arith.constant 0 : i32
    %c0_i32_0 = arith.constant 0 : i32
    %c0_i32_1 = arith.constant 0 : i32
    return %c0_i32, %c0_i32_0 : i32, i32
  }
  func.func @transform_2(%arg0: i32) -> (i32, i32) {
    %c0_i32 = arith.constant 0 : i32
    %c0_i32_0 = arith.constant 0 : i32
    %c0_i32_1 = arith.constant 0 : i32
    return %c0_i32, %c0_i32_0 : i32, i32
  }
  func.func @transform_3(%arg0: i32) -> (i32, i32) {
    %c0_i32 = arith.constant 0 : i32
    %c0_i32_0 = arith.constant 0 : i32
    %c0_i32_1 = arith.constant 0 : i32
    return %c0_i32, %c0_i32_0 : i32, i32
  }
  func.func @transform_4(%arg0: i32) -> (i32, i32) {
    %c0_i32 = arith.constant 0 : i32
    %c0_i32_0 = arith.constant 0 : i32
    %c0_i32_1 = arith.constant 0 : i32
    return %c0_i32, %c0_i32_0 : i32, i32
  }
  func.func @transform_5(%arg0: i32) -> (i32, i32) {
    %c0_i32 = arith.constant 0 : i32
    %c0_i32_0 = arith.constant 0 : i32
    %c0_i32_1 = arith.constant 0 : i32
    return %c0_i32, %c0_i32_0 : i32, i32
  }
  func.func @transform_6(%arg0: i32) -> (i32, i32) {
    %c0_i32 = arith.constant 0 : i32
    %c0_i32_0 = arith.constant 0 : i32
    %c0_i32_1 = arith.constant 0 : i32
    return %c0_i32, %c0_i32_0 : i32, i32
  }
}

</mosaic_0001>

<bundles_post_ra>
// kernel: tpu_custom_call.1
= control target key start
LH: loop header
LB: loop body
LE: loop exit
PB: predicated region body
PF: predicated region fallthrough
CT: control target
= control target key end

     0   :  { %11 = vsyncpa [#allocation4], 0  ;;  %s3842_s0 = inlined_call_operand.hbm [shape: f32[64,384], index: 0, kind: input, shape index: {}]   ;;  %s3843_s1 = inlined_call_operand.hbm [shape: f32[384,512], index: 1, kind: input, shape index: {}]   ;;  %s3844_s2 = inlined_call_operand.hbm [shape: f32[128,512], index: 2, kind: input, shape index: {}]   ;;  %s3845_s3 = inlined_call_operand.hbm [shape: f32[1,512], index: 3, kind: input, shape index: {}]   ;;  %s3846_s4 = inlined_call_operand.hbm [shape: f32[128,128], index: 4, kind: input, shape index: {}]   ;;  %s3847_s5 = inlined_call_operand.vmem [shape: f32[1,128], index: 5, kind: input, shape index: {}]   ;;  %s3848_s6 = inlined_call_operand.hbm [shape: f32[8,128], index: 6, kind: output, shape index: {}]  }
   0x1   :  { %12 = vsyncpa [#allocation7], 0 }
   0x2   :  { %13 = vsyncpa [#allocation10], 0  ;;  %s32_s23 = sshll.u32 %s3843_s1, 4  ;;  %s33_s23 = int_to_ptr.hbm [resolvable:$true] %s32_s23 }
   0x3   :  { %14 = vsyncpa [#allocation5], 0  ;;  %s2649_s24 = smov [#allocation6]   ;;  %s59_s28 = sshll.u32 %s3845_s3, 4  ;;  %s60_s28 = int_to_ptr.hbm [resolvable:$true] %s59_s28 }
   0x4   :  { %s34_s25 = sshll.u32 %s2649_s24, 4  ;;  %s2650_s29 = smov 512   ;;  %s35_s25 = int_to_ptr.vmem [resolvable:$true] %s34_s25 }
   0x5   :  { %s2651_s30 = smov 32   ;;  %s2652_s7 = smov [#allocation9]  }
   0x6   :  { %40 = dma.hbm_to_vmem [thread:$0]  %s33_s23, 24576, %s35_s25, [#allocation7], %s2650_s29, %s2650_s29, %s2651_s30  }
   0x7   :  { %s61_s8 = sshll.u32 %s2652_s7, 4  ;;  %s19_s11 = sshll.u32 %s3842_s0, 4  ;;  %s62_s8 = int_to_ptr.vmem [resolvable:$true] %s61_s8  ;;  %s20_s11 = int_to_ptr.hbm [resolvable:$true] %s19_s11 }
   0x8   :  { %64 = dma.hbm_to_vmem [thread:$0]  %s60_s28, 64, %s62_s8, [#allocation10]  }
   0x9   :  { %s2653_s1 = smov [#allocation3]   ;;  %s45_s3 = sshll.u32 %s3844_s2, 4  ;;  %s46_s3 = int_to_ptr.hbm [resolvable:$true] %s45_s3 }
   0xa   :  { %s21_s12 = sshll.u32 %s2653_s1, 4  ;;  %s2654_s15 = smov 384   ;;  %s22_s12 = int_to_ptr.vmem [resolvable:$true] %s21_s12 }
   0xb   :  { %s2655_s16 = smov 24   ;;  %s2656_s17 = smov [#allocation8]  }
   0xc   :  { %27 = dma.hbm_to_vmem [thread:$0]  %s20_s11, 3072, %s22_s12, [#allocation4], %s2654_s15, %s2654_s15, %s2655_s16  }
   0xd   :  { %s47_s18 = sshll.u32 %s2656_s17, 4  ;;  %s69_s0 = sshll.u32 %s3846_s4, 4  ;;  %s48_s18 = int_to_ptr.vmem [resolvable:$true] %s47_s18  ;;  %s70_s0 = int_to_ptr.hbm [resolvable:$true] %s69_s0 }
   0xe   :  { %53 = dma.hbm_to_vmem [thread:$0]  %s46_s3, 8192, %s48_s18, [#allocation7], %s2650_s29, %s2650_s29, %s2651_s30  }
   0xf   :  { %s2657_s21 = smov [#allocation11]   ;;  %s2658_s23 = smov 128  }
  0x10   :  { %s71_s22 = sshll.u32 %s2657_s21, 4  ;;  %s2659_s24 = smov 8   ;;  %s72_s22 = int_to_ptr.vmem [resolvable:$true] %s71_s22 }
  0x11   :  { %77 = dma.hbm_to_vmem [thread:$0]  %s70_s0, 2048, %s72_s22, [#allocation10], %s2658_s23, %s2658_s23, %s2659_s24  }
  0x12   :  { %2641 = dma.done.wait [#allocation4], 3072  }
  0x13   :  { %2642 = vsyncadd [#allocation4], 4294964224 }
  0x14   :  { %2643 = dma.done.wait [#allocation7], 32768  }
  0x15   :  { %2644 = vsyncadd [#allocation7], 4294934528 }
  0x16   :  { %2645 = dma.done.wait [#allocation10], 2112  }
  0x17   :  { %2646 = vsyncadd [#allocation10], 4294965184  ;;  %v184_v0 = vld [vmem:[#allocation6 + $0x1e0] sm:$0xff]  ;;  %v185_v3 = vld [vmem:[#allocation6 + $0x1e8] sm:$0xff]  ;;  %s2661_s25 = smov [#allocation12]  }
  0x18   :  { %v248_v1 = vld [vmem:[#allocation6 + $0x3e0] sm:$0xff]  ;;  %326 = vmatpush.msra.mxu0 %v184_v0  ;;  %449 = vmatpush.msra.mxu3 %v185_v3  ;;  %v181_v7 = vld [vmem:[#allocation6 + $0x1c8] sm:$0xff]  ;;  %s2212_s26 = sshll.u32 %s2661_s25, 4  ;;  %s2213_s26 = int_to_ptr.vmem [resolvable:$true] %s2212_s26 }
  0x19   :  { %v312_v2 = vld [vmem:[#allocation6 + $0x5e0] sm:$0xff]  ;;  %367 = vmatpush.msra.mxu1 %v248_v1  ;;  %v177_v11 = vld [vmem:[#allocation6 + $0x1a8] sm:$0xff] }
  0x1a   :  { %v180_v4 = vld [vmem:[#allocation6 + $0x1c0] sm:$0xff]  ;;  %408 = vmatpush.msra.mxu2 %v312_v2  ;;  %450 = vmatpush.msra.mxu3 %v181_v7  ;;  %v173_v15 = vld [vmem:[#allocation6 + $0x188] sm:$0xff]  ;;  %v2716_v2 = vld [vmem:[#allocation3 + $0x10] sm:$0xff] }
  0x1b   :  { %v244_v5 = vld [vmem:[#allocation6 + $0x3c0] sm:$0xff]  ;;  %327 = vmatpush.msra.mxu0 %v180_v4  ;;  %v169_v19 = vld [vmem:[#allocation6 + $0x168] sm:$0xff] }
  0x1c   :  { %v308_v6 = vld [vmem:[#allocation6 + $0x5c0] sm:$0xff]  ;;  %368 = vmatpush.msra.mxu1 %v244_v5  ;;  %451 = vmatpush.msra.mxu3 %v177_v11  ;;  %v165_v23 = vld [vmem:[#allocation6 + $0x148] sm:$0xff]  ;;  %v250_v5 = vld [vmem:[#allocation6 + $0x3f0] sm:$0xff] }
  0x1d   :  { %v176_v8 = vld [vmem:[#allocation6 + $0x1a0] sm:$0xff]  ;;  %409 = vmatpush.msra.mxu2 %v308_v6  ;;  %v161_v27 = vld [vmem:[#allocation6 + $0x128] sm:$0xff]  ;;  %v186_v6 = vld [vmem:[#allocation6 + $0x1f0] sm:$0xff] }
  0x1e   :  { %v240_v9 = vld [vmem:[#allocation6 + $0x3a0] sm:$0xff]  ;;  %328 = vmatpush.msra.mxu0 %v176_v8  ;;  %452 = vmatpush.msra.mxu3 %v173_v15  ;;  %v157_v31 = vld [vmem:[#allocation6 + $0x108] sm:$0xff]  ;;  %v2722_v15 = vld [vmem:[#allocation3 + $0x18] sm:$0xff] }
  0x1f   :  { %v304_v10 = vld [vmem:[#allocation6 + $0x5a0] sm:$0xff]  ;;  %369 = vmatpush.msra.mxu1 %v240_v9  ;;  %v153_v35 = vld [vmem:[#allocation6 + $0xe8] sm:$0xff]  ;;  %v246_v9 = vld [vmem:[#allocation6 + $0x3d0] sm:$0xff] }
  0x20   :  { %v172_v12 = vld [vmem:[#allocation6 + $0x180] sm:$0xff]  ;;  %410 = vmatpush.msra.mxu2 %v304_v10  ;;  %453 = vmatpush.msra.mxu3 %v169_v19  ;;  %v149_v39 = vld [vmem:[#allocation6 + $0xc8] sm:$0xff]  ;;  %v182_v10 = vld [vmem:[#allocation6 + $0x1d0] sm:$0xff] }
  0x21   :  { %v236_v13 = vld [vmem:[#allocation6 + $0x380] sm:$0xff]  ;;  %329 = vmatpush.msra.mxu0 %v172_v12  ;;  %v145_v43 = vld [vmem:[#allocation6 + $0xa8] sm:$0xff] }
  0x22   :  { %v300_v14 = vld [vmem:[#allocation6 + $0x580] sm:$0xff]  ;;  %370 = vmatpush.msra.mxu1 %v236_v13  ;;  %454 = vmatpush.msra.mxu3 %v165_v23  ;;  %v141_v47 = vld [vmem:[#allocation6 + $0x88] sm:$0xff]  ;;  %v242_v13 = vld [vmem:[#allocation6 + $0x3b0] sm:$0xff] }
  0x23   :  { %v168_v16 = vld [vmem:[#allocation6 + $0x160] sm:$0xff]  ;;  %411 = vmatpush.msra.mxu2 %v300_v14  ;;  %v137_v51 = vld [vmem:[#allocation6 + $0x68] sm:$0xff]  ;;  %v178_v14 = vld [vmem:[#allocation6 + $0x1b0] sm:$0xff] }
  0x24   :  { %v232_v17 = vld [vmem:[#allocation6 + $0x360] sm:$0xff]  ;;  %330 = vmatpush.msra.mxu0 %v168_v16  ;;  %455 = vmatpush.msra.mxu3 %v161_v27  ;;  %v133_v55 = vld [vmem:[#allocation6 + $0x48] sm:$0xff] }
  0x25   :  { %v296_v18 = vld [vmem:[#allocation6 + $0x560] sm:$0xff]  ;;  %371 = vmatpush.msra.mxu1 %v232_v17  ;;  %v129_v59 = vld [vmem:[#allocation6 + $0x28] sm:$0xff] }
  0x26   :  { %v164_v20 = vld [vmem:[#allocation6 + $0x140] sm:$0xff]  ;;  %412 = vmatpush.msra.mxu2 %v296_v18  ;;  %456 = vmatpush.msra.mxu3 %v157_v31  ;;  %v125_v63 = vld [vmem:[#allocation6 + $0x8] sm:$0xff]  ;;  %v2734_v31 = vld [vmem:[#allocation3 + $0x38] sm:$0xff] }
  0x27   :  { %v228_v21 = vld [vmem:[#allocation6 + $0x340] sm:$0xff]  ;;  %331 = vmatpush.msra.mxu0 %v164_v20  ;;  %v2714_v1 = vld [vmem:[#allocation3 + $0x8] sm:$0xff]  ;;  %v238_v20 = vld [vmem:[#allocation6 + $0x390] sm:$0xff] }
  0x28   :  { %v292_v22 = vld [vmem:[#allocation6 + $0x540] sm:$0xff]  ;;  %372 = vmatpush.msra.mxu1 %v228_v21  ;;  %457 = vmatpush.msra.mxu3 %v153_v35  ;;  %v249_v3 = vld [vmem:[#allocation6 + $0x3e8] sm:$0xff]  ;;  %v174_v21 = vld [vmem:[#allocation6 + $0x190] sm:$0xff] }
  0x29   :  { %v160_v24 = vld [vmem:[#allocation6 + $0x120] sm:$0xff]  ;;  %413 = vmatpush.msra.mxu2 %v292_v22  ;;  %v313_v4 = vld [vmem:[#allocation6 + $0x5e8] sm:$0xff]  ;;  %v226_v35 = vld [vmem:[#allocation6 + $0x330] sm:$0xff] }
  0x2a   :  { %v224_v25 = vld [vmem:[#allocation6 + $0x320] sm:$0xff]  ;;  %332 = vmatpush.msra.mxu0 %v160_v24  ;;  %458 = vmatpush.msra.mxu3 %v149_v39  ;;  %v245_v7 = vld [vmem:[#allocation6 + $0x3c8] sm:$0xff]  ;;  %v234_v24 = vld [vmem:[#allocation6 + $0x370] sm:$0xff] }
  0x2b   :  { %v288_v26 = vld [vmem:[#allocation6 + $0x520] sm:$0xff]  ;;  %373 = vmatpush.msra.mxu1 %v224_v25  ;;  %v309_v8 = vld [vmem:[#allocation6 + $0x5c8] sm:$0xff]  ;;  %v170_v25 = vld [vmem:[#allocation6 + $0x170] sm:$0xff] }
  0x2c   :  { %v156_v28 = vld [vmem:[#allocation6 + $0x100] sm:$0xff]  ;;  %414 = vmatpush.msra.mxu2 %v288_v26  ;;  %459 = vmatpush.msra.mxu3 %v145_v43  ;;  %v241_v11 = vld [vmem:[#allocation6 + $0x3a8] sm:$0xff]  ;;  %v222_v39 = vld [vmem:[#allocation6 + $0x310] sm:$0xff] }
  0x2d   :  { %v220_v29 = vld [vmem:[#allocation6 + $0x300] sm:$0xff]  ;;  %333 = vmatpush.msra.mxu0 %v156_v28  ;;  %v305_v12 = vld [vmem:[#allocation6 + $0x5a8] sm:$0xff]  ;;  %v230_v28 = vld [vmem:[#allocation6 + $0x350] sm:$0xff] }
  0x2e   :  { %v284_v30 = vld [vmem:[#allocation6 + $0x500] sm:$0xff]  ;;  %374 = vmatpush.msra.mxu1 %v220_v29  ;;  %460 = vmatpush.msra.mxu3 %v141_v47  ;;  %v2726_v17 = vld [vmem:[#allocation3 + $0x28] sm:$0xff]  ;;  %v166_v29 = vld [vmem:[#allocation6 + $0x150] sm:$0xff] }
  0x2f   :  { %v152_v32 = vld [vmem:[#allocation6 + $0xe0] sm:$0xff]  ;;  %415 = vmatpush.msra.mxu2 %v284_v30  ;;  %v237_v18 = vld [vmem:[#allocation6 + $0x388] sm:$0xff]  ;;  %v2732_v30 = vld [vmem:[#allocation3 + $0x30] sm:$0xff] }
  0x30   :  { %v216_v33 = vld [vmem:[#allocation6 + $0x2e0] sm:$0xff]  ;;  %334 = vmatpush.msra.mxu0 %v152_v32  ;;  %461 = vmatpush.msra.mxu3 %v137_v51  ;;  %v301_v19 = vld [vmem:[#allocation6 + $0x588] sm:$0xff]  ;;  %v218_v43 = vld [vmem:[#allocation6 + $0x2f0] sm:$0xff] }
  0x31   :  { %v280_v34 = vld [vmem:[#allocation6 + $0x4e0] sm:$0xff]  ;;  %375 = vmatpush.msra.mxu1 %v216_v33  ;;  %v233_v22 = vld [vmem:[#allocation6 + $0x368] sm:$0xff]  ;;  %v2746_v47 = vld [vmem:[#allocation3 + $0x58] sm:$0xff] }
  0x32   :  { %v148_v36 = vld [vmem:[#allocation6 + $0xc0] sm:$0xff]  ;;  %416 = vmatpush.msra.mxu2 %v280_v34  ;;  %462 = vmatpush.msra.mxu3 %v133_v55  ;;  %v297_v23 = vld [vmem:[#allocation6 + $0x568] sm:$0xff]  ;;  %v150_v51 = vld [vmem:[#allocation6 + $0xd0] sm:$0xff] }
  0x33   :  { %v212_v37 = vld [vmem:[#allocation6 + $0x2c0] sm:$0xff]  ;;  %335 = vmatpush.msra.mxu0 %v148_v36  ;;  %v229_v26 = vld [vmem:[#allocation6 + $0x348] sm:$0xff]  ;;  %v162_v36 = vld [vmem:[#allocation6 + $0x130] sm:$0xff] }
  0x34   :  { %v276_v38 = vld [vmem:[#allocation6 + $0x4c0] sm:$0xff]  ;;  %376 = vmatpush.msra.mxu1 %v212_v37  ;;  %463 = vmatpush.msra.mxu3 %v129_v59  ;;  %v293_v27 = vld [vmem:[#allocation6 + $0x548] sm:$0xff]  ;;  %v146_v55 = vld [vmem:[#allocation6 + $0xb0] sm:$0xff] }
  0x35   :  { %v144_v40 = vld [vmem:[#allocation6 + $0xa0] sm:$0xff]  ;;  %417 = vmatpush.msra.mxu2 %v276_v38  ;;  %v225_v33 = vld [vmem:[#allocation6 + $0x328] sm:$0xff]  ;;  %v142_v59 = vld [vmem:[#allocation6 + $0x90] sm:$0xff] }
  0x36   :  { %v208_v41 = vld [vmem:[#allocation6 + $0x2a0] sm:$0xff]  ;;  %336 = vmatpush.msra.mxu0 %v144_v40  ;;  %464 = vmatpush.msra.mxu3 %v125_v63  ;;  %v289_v34 = vld [vmem:[#allocation6 + $0x528] sm:$0xff]  ;;  %v158_v40 = vld [vmem:[#allocation6 + $0x110] sm:$0xff] }
  0x37   :  { %v272_v42 = vld [vmem:[#allocation6 + $0x4a0] sm:$0xff]  ;;  %377 = vmatpush.msra.mxu1 %v208_v41  ;;  %v221_v37 = vld [vmem:[#allocation6 + $0x308] sm:$0xff] }
  0x38   :  { %v140_v44 = vld [vmem:[#allocation6 + $0x80] sm:$0xff]  ;;  %418 = vmatpush.msra.mxu2 %v272_v42  ;;  %613 = vmatpush.msrb.mxu3 %v250_v5  ;;  %v285_v38 = vld [vmem:[#allocation6 + $0x508] sm:$0xff]  ;;  %v138_v5 = vld [vmem:[#allocation6 + $0x70] sm:$0xff] }
  0x39   :  { %v204_v45 = vld [vmem:[#allocation6 + $0x280] sm:$0xff]  ;;  %337 = vmatpush.msra.mxu0 %v140_v44  ;;  %v217_v41 = vld [vmem:[#allocation6 + $0x2e8] sm:$0xff]  ;;  %v154_v44 = vld [vmem:[#allocation6 + $0xf0] sm:$0xff] }
  0x3a   :  { %v268_v46 = vld [vmem:[#allocation6 + $0x480] sm:$0xff]  ;;  %378 = vmatpush.msra.mxu1 %v204_v45  ;;  %614 = vmatpush.msrb.mxu3 %v246_v9  ;;  %v281_v42 = vld [vmem:[#allocation6 + $0x4e8] sm:$0xff]  ;;  %v134_v9 = vld [vmem:[#allocation6 + $0x50] sm:$0xff] }
  0x3b   :  { %v136_v48 = vld [vmem:[#allocation6 + $0x60] sm:$0xff]  ;;  %419 = vmatpush.msra.mxu2 %v268_v46  ;;  %v2742_v45 = vld [vmem:[#allocation3 + $0x48] sm:$0xff]  ;;  %v2744_v46 = vld [vmem:[#allocation3 + $0x50] sm:$0xff] }
  0x3c   :  { %v200_v49 = vld [vmem:[#allocation6 + $0x260] sm:$0xff]  ;;  %338 = vmatpush.msra.mxu0 %v136_v48  ;;  %615 = vmatpush.msrb.mxu3 %v242_v13  ;;  %v213_v48 = vld [vmem:[#allocation6 + $0x2c8] sm:$0xff]  ;;  %v194_v13 = vld [vmem:[#allocation6 + $0x230] sm:$0xff] }
  0x3d   :  { %v264_v50 = vld [vmem:[#allocation6 + $0x460] sm:$0xff]  ;;  %379 = vmatpush.msra.mxu1 %v200_v49  ;;  %v277_v49 = vld [vmem:[#allocation6 + $0x4c8] sm:$0xff] }
  0x3e   :  { %v132_v52 = vld [vmem:[#allocation6 + $0x40] sm:$0xff]  ;;  %420 = vmatpush.msra.mxu2 %v264_v50  ;;  %616 = vmatpush.msrb.mxu3 %v238_v20  ;;  %v214_v50 = vld [vmem:[#allocation6 + $0x2d0] sm:$0xff]  ;;  %v201_v63 = vld [vmem:[#allocation6 + $0x268] sm:$0xff] }
  0x3f   :  { %v196_v53 = vld [vmem:[#allocation6 + $0x240] sm:$0xff]  ;;  %339 = vmatpush.msra.mxu0 %v132_v52  ;;  %v209_v52 = vld [vmem:[#allocation6 + $0x2a8] sm:$0xff] }
  0x40   :  { %v260_v54 = vld [vmem:[#allocation6 + $0x440] sm:$0xff]  ;;  %380 = vmatpush.msra.mxu1 %v196_v53  ;;  %617 = vmatpush.msrb.mxu3 %v234_v24  ;;  %v273_v53 = vld [vmem:[#allocation6 + $0x4a8] sm:$0xff]  ;;  %v314_v24 = vld [vmem:[#allocation6 + $0x5f0] sm:$0xff] }
  0x41   :  { %v128_v56 = vld [vmem:[#allocation6 + $0x20] sm:$0xff]  ;;  %421 = vmatpush.msra.mxu2 %v260_v54  ;;  %v210_v54 = vld [vmem:[#allocation6 + $0x2b0] sm:$0xff]  ;;  %v189_v20 = vld [vmem:[#allocation6 + $0x208] sm:$0xff] }
  0x42   :  { %v192_v57 = vld [vmem:[#allocation6 + $0x220] sm:$0xff]  ;;  %340 = vmatpush.msra.mxu0 %v128_v56  ;;  %618 = vmatpush.msrb.mxu3 %v230_v28  ;;  %v205_v56 = vld [vmem:[#allocation6 + $0x288] sm:$0xff]  ;;  %v183_v28 = vld [vmem:[#allocation6 + $0x1d8] sm:$0xff] }
  0x43   :  { %v256_v58 = vld [vmem:[#allocation6 + $0x420] sm:$0xff]  ;;  %381 = vmatpush.msra.mxu1 %v192_v57  ;;  %v269_v57 = vld [vmem:[#allocation6 + $0x488] sm:$0xff] }
  0x44   :  { %v124_v60 = vld [vmem:[#allocation6] sm:$0xff]  ;;  %422 = vmatpush.msra.mxu2 %v256_v58  ;;  %619 = vmatpush.msrb.mxu3 %v226_v35  ;;  %v206_v58 = vld [vmem:[#allocation6 + $0x290] sm:$0xff]  ;;  %v2774_v35 = vld [vmem:[#allocation3 + $0x98] sm:$0xff] }
  0x45   :  { %v188_v61 = vld [vmem:[#allocation6 + $0x200] sm:$0xff]  ;;  %341 = vmatpush.msra.mxu0 %v124_v60 }
  0x46   :  { %v252_v62 = vld [vmem:[#allocation6 + $0x400] sm:$0xff]  ;;  %382 = vmatpush.msra.mxu1 %v188_v61  ;;  %620 = vmatpush.msrb.mxu3 %v222_v39  ;;  %v2754_v61 = vld [vmem:[#allocation3 + $0x68] sm:$0xff]  ;;  %v307_v39 = vld [vmem:[#allocation6 + $0x5b8] sm:$0xff] }
  0x47   :  { %v2712_v0 = vld [vmem:[#allocation3] sm:$0xff]  ;;  %423 = vmatpush.msra.mxu2 %v252_v62  ;;  %383 = vmatmul.f32.vlgmr.msra.gmra.mxu1 %v2714_v1  ;;  %v2756_v62 = vld [vmem:[#allocation3 + $0x70] sm:$0xff] }
  0x48   :  { %342 = vmatmul.f32.vlgmr.msra.gmra.mxu0 %v2712_v0  ;;  %424 = vmatmul.f32.vlgmr.msra.gmra.mxu2 %v2716_v2  ;;  %v2724_v16 = vld [vmem:[#allocation3 + $0x20] sm:$0xff] }
  0x49   :  { %465 = vmatmul.f32.vlgmr.msra.gmra.mxu3 %v2712_v0  ;;  %490 = vmatpush.msrb.mxu0 %v249_v3  ;;  %v2736_v32 = vld [vmem:[#allocation3 + $0x40] sm:$0xff]  ;;  %v265_v3 = vld [vmem:[#allocation6 + $0x468] sm:$0xff] }
  0x4a   :  { %531 = vmatpush.msrb.mxu1 %v313_v4  ;;  %572 = vmatpush.msrb.mxu2 %v186_v6  ;;  %v2752_v60 = vld [vmem:[#allocation3 + $0x60] sm:$0xff]  ;;  %v202_v4 = vld [vmem:[#allocation6 + $0x270] sm:$0xff]  ;;  %v197_v6 = vld [vmem:[#allocation6 + $0x248] sm:$0xff] }
  0x4b   :  { %491 = vmatpush.msrb.mxu0 %v245_v7  ;;  %621 = vmatpush.msrb.mxu3 %v218_v43  ;;  %v261_v7 = vld [vmem:[#allocation6 + $0x448] sm:$0xff]  ;;  %v247_v43 = vld [vmem:[#allocation6 + $0x3d8] sm:$0xff] }
  0x4c   :  { %532 = vmatpush.msrb.mxu1 %v309_v8  ;;  %573 = vmatpush.msrb.mxu2 %v182_v10  ;;  %v198_v8 = vld [vmem:[#allocation6 + $0x250] sm:$0xff]  ;;  %v193_v10 = vld [vmem:[#allocation6 + $0x228] sm:$0xff] }
  0x4d   :  { %492 = vmatpush.msrb.mxu0 %v241_v11  ;;  %622 = vmatpush.msrb.mxu3 %v214_v50  ;;  %v257_v11 = vld [vmem:[#allocation6 + $0x428] sm:$0xff]  ;;  %v299_v50 = vld [vmem:[#allocation6 + $0x578] sm:$0xff] }
  0x4e   :  { %533 = vmatpush.msrb.mxu1 %v305_v12  ;;  %574 = vmatpush.msrb.mxu2 %v178_v14  ;;  %v130_v12 = vld [vmem:[#allocation6 + $0x30] sm:$0xff]  ;;  %v2762_v14 = vld [vmem:[#allocation3 + $0x78] sm:$0xff] }
  0x4f   :  { %386 = vmatmul.f32.gmra.mxu1 %v2724_v16  ;;  %493 = vmatpush.msrb.mxu0 %v237_v18  ;;  %v2764_v18 = vld [vmem:[#allocation3 + $0x80] sm:$0xff] }
  0x50   :  { %345 = vmatmul.f32.gmra.mxu0 %v2722_v15  ;;  %427 = vmatmul.f32.gmra.mxu2 %v2726_v17 }
  0x51   :  { %468 = vmatmul.f32.gmra.mxu3 %v2722_v15  ;;  %534 = vmatpush.msrb.mxu1 %v301_v19  ;;  %v2766_v19 = vld [vmem:[#allocation3 + $0x88] sm:$0xff] }
  0x52   :  { %575 = vmatpush.msrb.mxu2 %v174_v21  ;;  %494 = vmatpush.msrb.mxu0 %v233_v22  ;;  %v253_v21 = vld [vmem:[#allocation6 + $0x408] sm:$0xff]  ;;  %v126_v22 = vld [vmem:[#allocation6 + $0x10] sm:$0xff] }
  0x53   :  { %535 = vmatpush.msrb.mxu1 %v297_v23  ;;  %623 = vmatpush.msrb.mxu3 %v210_v54  ;;  %v190_v23 = vld [vmem:[#allocation6 + $0x210] sm:$0xff] }
  0x54   :  { %576 = vmatpush.msrb.mxu2 %v170_v25  ;;  %495 = vmatpush.msrb.mxu0 %v229_v26  ;;  %v187_v25 = vld [vmem:[#allocation6 + $0x1f8] sm:$0xff]  ;;  %v294_v54 = vld [vmem:[#allocation6 + $0x550] sm:$0xff] }
  0x55   :  { %536 = vmatpush.msrb.mxu1 %v293_v27  ;;  %624 = vmatpush.msrb.mxu3 %v206_v58  ;;  %v315_v26 = vld [vmem:[#allocation6 + $0x5f8] sm:$0xff]  ;;  %v310_v27 = vld [vmem:[#allocation6 + $0x5d0] sm:$0xff] }
  0x56   :  { %577 = vmatpush.msrb.mxu2 %v166_v29  ;;  %496 = vmatpush.msrb.mxu0 %v225_v33  ;;  %v251_v29 = vld [vmem:[#allocation6 + $0x3f8] sm:$0xff] }
  0x57   :  { %389 = vmatmul.f32.gmra.mxu1 %v2734_v31  ;;  %625 = vmatpush.msrb.mxu3 %v202_v4  ;;  %v311_v33 = vld [vmem:[#allocation6 + $0x5d8] sm:$0xff] }
  0x58   :  { %348 = vmatmul.f32.gmra.mxu0 %v2732_v30  ;;  %430 = vmatmul.f32.gmra.mxu2 %v2736_v32  ;;  %v295_v58 = vld [vmem:[#allocation6 + $0x558] sm:$0xff] }
  0x59   :  { %471 = vmatmul.f32.gmra.mxu3 %v2732_v30  ;;  %537 = vmatpush.msrb.mxu1 %v289_v34  ;;  %v2772_v34 = vld [vmem:[#allocation3 + $0x90] sm:$0xff]  ;;  %v291_v4 = vld [vmem:[#allocation6 + $0x538] sm:$0xff] }
  0x5a   :  { %578 = vmatpush.msrb.mxu2 %v162_v36  ;;  %497 = vmatpush.msrb.mxu0 %v221_v37  ;;  %v2776_v36 = vld [vmem:[#allocation3 + $0xa0] sm:$0xff]  ;;  %v306_v37 = vld [vmem:[#allocation6 + $0x5b0] sm:$0xff] }
  0x5b   :  { %538 = vmatpush.msrb.mxu1 %v285_v38  ;;  %626 = vmatpush.msrb.mxu3 %v198_v8  ;;  %v179_v38 = vld [vmem:[#allocation6 + $0x1b8] sm:$0xff] }
  0x5c   :  { %579 = vmatpush.msrb.mxu2 %v158_v40  ;;  %498 = vmatpush.msrb.mxu0 %v217_v41  ;;  %v302_v40 = vld [vmem:[#allocation6 + $0x590] sm:$0xff]  ;;  %v175_v41 = vld [vmem:[#allocation6 + $0x198] sm:$0xff] }
  0x5d   :  { %539 = vmatpush.msrb.mxu1 %v281_v42  ;;  %627 = vmatpush.msrb.mxu3 %v194_v13  ;;  %v303_v42 = vld [vmem:[#allocation6 + $0x598] sm:$0xff] }
  0x5e   :  { %580 = vmatpush.msrb.mxu2 %v154_v44  ;;  %499 = vmatpush.msrb.mxu0 %v213_v48  ;;  %v298_v44 = vld [vmem:[#allocation6 + $0x570] sm:$0xff]  ;;  %v171_v48 = vld [vmem:[#allocation6 + $0x178] sm:$0xff] }
  0x5f   :  { %392 = vmatmul.f32.gmra.mxu1 %v2744_v46  ;;  %628 = vmatpush.msrb.mxu3 %v190_v23  ;;  %v287_v8 = vld [vmem:[#allocation6 + $0x518] sm:$0xff] }
  0x60   :  { %351 = vmatmul.f32.gmra.mxu0 %v2742_v45  ;;  %433 = vmatmul.f32.gmra.mxu2 %v2746_v47  ;;  %v227_v13 = vld [vmem:[#allocation6 + $0x338] sm:$0xff] }
  0x61   :  { %474 = vmatmul.f32.gmra.mxu3 %v2742_v45  ;;  %540 = vmatpush.msrb.mxu1 %v277_v49  ;;  %v243_v49 = vld [vmem:[#allocation6 + $0x3b8] sm:$0xff] }
  0x62   :  { %581 = vmatpush.msrb.mxu2 %v150_v51  ;;  %500 = vmatpush.msrb.mxu0 %v209_v52  ;;  %v2782_v51 = vld [vmem:[#allocation3 + $0xa8] sm:$0xff]  ;;  %v2784_v52 = vld [vmem:[#allocation3 + $0xb0] sm:$0xff]  ;;  %v223_v23 = vld [vmem:[#allocation6 + $0x318] sm:$0xff] }
  0x63   :  { %541 = vmatpush.msrb.mxu1 %v273_v53  ;;  %777 = vmatpush.msra.mxu3 %v315_v26  ;;  %v2786_v53 = vld [vmem:[#allocation3 + $0xb8] sm:$0xff] }
  0x64   :  { %582 = vmatpush.msrb.mxu2 %v146_v55  ;;  %501 = vmatpush.msrb.mxu0 %v205_v56  ;;  %v167_v55 = vld [vmem:[#allocation6 + $0x158] sm:$0xff]  ;;  %v290_v56 = vld [vmem:[#allocation6 + $0x530] sm:$0xff] }
  0x65   :  { %542 = vmatpush.msrb.mxu1 %v269_v57  ;;  %778 = vmatpush.msra.mxu3 %v311_v33  ;;  %v163_v57 = vld [vmem:[#allocation6 + $0x138] sm:$0xff] }
  0x66   :  { %583 = vmatpush.msrb.mxu2 %v142_v59  ;;  %502 = vmatpush.msrb.mxu0 %v201_v63  ;;  %v239_v59 = vld [vmem:[#allocation6 + $0x398] sm:$0xff]  ;;  %v286_v63 = vld [vmem:[#allocation6 + $0x510] sm:$0xff] }
  0x67   :  { %395 = vmatmul.f32.gmra.mxu1 %v2754_v61  ;;  %779 = vmatpush.msra.mxu3 %v307_v39  ;;  %v275_v26 = vld [vmem:[#allocation6 + $0x4b8] sm:$0xff] }
  0x68   :  { %354 = vmatmul.f32.gmra.mxu0 %v2752_v60  ;;  %436 = vmatmul.f32.gmra.mxu2 %v2756_v62  ;;  %v271_v33 = vld [vmem:[#allocation6 + $0x498] sm:$0xff] }
  0x69   :  { %477 = vmatmul.f32.gmra.mxu3 %v2752_v60  ;;  %543 = vmatpush.msrb.mxu1 %v265_v3  ;;  %v159_v3 = vld [vmem:[#allocation6 + $0x118] sm:$0xff] }
  0x6a   :  { %584 = vmatpush.msrb.mxu2 %v138_v5  ;;  %503 = vmatpush.msrb.mxu0 %v197_v6  ;;  %v235_v5 = vld [vmem:[#allocation6 + $0x378] sm:$0xff]  ;;  %v282_v6 = vld [vmem:[#allocation6 + $0x4f0] sm:$0xff] }
  0x6b   :  { %544 = vmatpush.msrb.mxu1 %v261_v7  ;;  %780 = vmatpush.msra.mxu3 %v303_v42  ;;  %v155_v7 = vld [vmem:[#allocation6 + $0xf8] sm:$0xff] }
  0x6c   :  { %585 = vmatpush.msrb.mxu2 %v134_v9  ;;  %504 = vmatpush.msrb.mxu0 %v193_v10  ;;  %v231_v9 = vld [vmem:[#allocation6 + $0x358] sm:$0xff]  ;;  %v278_v10 = vld [vmem:[#allocation6 + $0x4d0] sm:$0xff] }
  0x6d   :  { %545 = vmatpush.msrb.mxu1 %v257_v11  ;;  %781 = vmatpush.msra.mxu3 %v299_v50  ;;  %v151_v11 = vld [vmem:[#allocation6 + $0xd8] sm:$0xff] }
  0x6e   :  { %586 = vmatpush.msrb.mxu2 %v130_v12  ;;  %505 = vmatpush.msrb.mxu0 %v189_v20  ;;  %v283_v12 = vld [vmem:[#allocation6 + $0x4f8] sm:$0xff]  ;;  %v274_v20 = vld [vmem:[#allocation6 + $0x4b0] sm:$0xff] }
  0x6f   :  { %398 = vmatmul.f32.gmra.mxu1 %v2764_v18  ;;  %782 = vmatpush.msra.mxu3 %v295_v58  ;;  %v135_v39 = vld [vmem:[#allocation6 + $0x58] sm:$0xff] }
  0x70   :  { %357 = vmatmul.f32.gmra.mxu0 %v2762_v14  ;;  %439 = vmatmul.f32.gmra.mxu2 %v2766_v19  ;;  %v207_v42 = vld [vmem:[#allocation6 + $0x298] sm:$0xff] }
  0x71   :  { %480 = vmatmul.f32.gmra.mxu3 %v2762_v14  ;;  %546 = vmatpush.msrb.mxu1 %v253_v21  ;;  %v147_v21 = vld [vmem:[#allocation6 + $0xb8] sm:$0xff] }
  0x72   :  { %587 = vmatpush.msrb.mxu2 %v126_v22  ;;  %654 = vmatpush.msra.mxu0 %v314_v24  ;;  %v279_v22 = vld [vmem:[#allocation6 + $0x4d8] sm:$0xff]  ;;  %v270_v24 = vld [vmem:[#allocation6 + $0x490] sm:$0xff] }
  0x73   :  { %695 = vmatpush.msra.mxu1 %v187_v25  ;;  %783 = vmatpush.msra.mxu3 %v291_v4  ;;  %v143_v25 = vld [vmem:[#allocation6 + $0x98] sm:$0xff]  ;;  %v2818_v4 = vld [vmem:[#allocation8 + $0x1c0] sm:$0xff] }
  0x74   :  { %736 = vmatpush.msra.mxu2 %v251_v29  ;;  %655 = vmatpush.msra.mxu0 %v310_v27  ;;  %v219_v27 = vld [vmem:[#allocation6 + $0x2f8] sm:$0xff] }
  0x75   :  { %696 = vmatpush.msra.mxu1 %v183_v28  ;;  %784 = vmatpush.msra.mxu3 %v287_v8  ;;  %v266_v28 = vld [vmem:[#allocation6 + $0x470] sm:$0xff]  ;;  %v139_v29 = vld [vmem:[#allocation6 + $0x78] sm:$0xff]  ;;  %v2832_v8 = vld [vmem:[#allocation8 + $0x1a8] sm:$0xff] }
  0x76   :  { %656 = vmatpush.msra.mxu0 %v306_v37  ;;  %737 = vmatpush.msra.mxu2 %v247_v43  ;;  %v215_v37 = vld [vmem:[#allocation6 + $0x2d8] sm:$0xff]  ;;  %v258_v43 = vld [vmem:[#allocation6 + $0x430] sm:$0xff] }
  0x77   :  { %401 = vmatmul.f32.gmra.mxu1 %v2774_v35  ;;  %785 = vmatpush.msra.mxu3 %v283_v12  ;;  %v199_v50 = vld [vmem:[#allocation6 + $0x258] sm:$0xff] }
  0x78   :  { %360 = vmatmul.f32.gmra.mxu0 %v2772_v34  ;;  %442 = vmatmul.f32.gmra.mxu2 %v2776_v36  ;;  %v191_v58 = vld [vmem:[#allocation6 + $0x218] sm:$0xff] }
  0x79   :  { %483 = vmatmul.f32.gmra.mxu3 %v2772_v34  ;;  %697 = vmatpush.msra.mxu1 %v179_v38  ;;  %v262_v38 = vld [vmem:[#allocation6 + $0x450] sm:$0xff]  ;;  %v2848_v12 = vld [vmem:[#allocation8 + $0x1b8] sm:$0xff] }
  0x7a   :  { %657 = vmatpush.msra.mxu0 %v302_v40  ;;  %738 = vmatpush.msra.mxu2 %v243_v49  ;;  %v211_v40 = vld [vmem:[#allocation6 + $0x2b8] sm:$0xff] }
  0x7b   :  { %698 = vmatpush.msra.mxu1 %v175_v41  ;;  %786 = vmatpush.msra.mxu3 %v279_v22  ;;  %v267_v41 = vld [vmem:[#allocation6 + $0x478] sm:$0xff] }
  0x7c   :  { %658 = vmatpush.msra.mxu0 %v298_v44  ;;  %739 = vmatpush.msra.mxu2 %v239_v59  ;;  %v131_v44 = vld [vmem:[#allocation6 + $0x38] sm:$0xff] }
  0x7d   :  { %699 = vmatpush.msra.mxu1 %v171_v48  ;;  %787 = vmatpush.msra.mxu3 %v275_v26  ;;  %v203_v48 = vld [vmem:[#allocation6 + $0x278] sm:$0xff]  ;;  %v2876_v26 = vld [vmem:[#allocation9] sm:$0xf] }
  0x7e   :  { %659 = vmatpush.msra.mxu0 %v294_v54  ;;  %740 = vmatpush.msra.mxu2 %v235_v5  ;;  %v263_v49 = vld [vmem:[#allocation6 + $0x458] sm:$0xff]  ;;  %v254_v54 = vld [vmem:[#allocation6 + $0x410] sm:$0xff]  ;;  %v2820_v5 = vld [vmem:[#allocation8 + $0x1c8] sm:$0xff]  ;;  %3943 = vst [vmem:[#allocation17_spill] sm:$0xff] %v2876_v26 }
  0x7f   :  { %404 = vmatmul.f32.gmra.mxu1 %v2784_v52  ;;  %788 = vmatpush.msra.mxu3 %v271_v33  ;;  %v255_v59 = vld [vmem:[#allocation6 + $0x418] sm:$0xff]  ;;  %v2886_v33 = vld [vmem:[#allocation8 + $0x128] sm:$0xff] }
  0x80   :  { %363 = vmatmul.f32.gmra.mxu0 %v2782_v51  ;;  %445 = vmatmul.f32.gmra.mxu2 %v2786_v53  ;;  %v2858_v22 = vld [vmem:[#allocation8 + $0x198] sm:$0xff] }
  0x81   :  { %486 = vmatmul.f32.gmra.mxu3 %v2782_v51  ;;  %700 = vmatpush.msra.mxu1 %v167_v55  ;;  %v127_v55 = vld [vmem:[#allocation6 + $0x18] sm:$0xff] }
  0x82   :  { %660 = vmatpush.msra.mxu0 %v290_v56  ;;  %741 = vmatpush.msra.mxu2 %v231_v9  ;;  %v195_v56 = vld [vmem:[#allocation6 + $0x238] sm:$0xff] }
  0x83   :  { %701 = vmatpush.msra.mxu1 %v163_v57  ;;  %789 = vmatpush.msra.mxu3 %v267_v41  ;;  %v259_v57 = vld [vmem:[#allocation6 + $0x438] sm:$0xff]  ;;  %v2898_v41 = vld [vmem:[#allocation8 + $0x190] sm:$0xff] }
  0x84   :  { %661 = vmatpush.msra.mxu0 %v286_v63  ;;  %742 = vmatpush.msra.mxu2 %v227_v13  ;;  %v2812_v63 = vld [vmem:[#allocation8 + $0x1e0] sm:$0xff]  ;;  %v2834_v9 = vld [vmem:[#allocation8 + $0x1d8] sm:$0xff]  ;;  %v2850_v13 = vld [vmem:[#allocation8 + $0x1f0] sm:$0xff] }
  0x85   :  { %702 = vmatpush.msra.mxu1 %v159_v3  ;;  %790 = vmatpush.msra.mxu3 %v263_v49  ;;  %v2814_v3 = vld [vmem:[#allocation8 + $0x1e8] sm:$0xff]  ;;  %v2912_v49 = vld [vmem:[#allocation8 + $0x170] sm:$0xff] }
  0x86   :  { %662 = vmatpush.msra.mxu0 %v282_v6  ;;  %743 = vmatpush.msra.mxu2 %v223_v23  ;;  %v2826_v6 = vld [vmem:[#allocation8 + $0x1f8] sm:$0xff]  ;;  %v2865_v23 = vld [vmem:[#allocation8 + $0x1d0] sm:$0xff] }
  0x87   :  { %547 = vmatmul.f32.vlgmr.msrb.gmra.mxu1 %v2716_v2  ;;  %791 = vmatpush.msra.mxu3 %v259_v57 }
  0x88   :  { %506 = vmatmul.f32.vlgmr.msrb.gmra.mxu0 %v2714_v1  ;;  %588 = vmatmul.f32.vlgmr.msrb.gmra.mxu2 %v2712_v0 }
  0x89   :  { %629 = vmatmul.f32.vlgmr.msrb.gmra.mxu3 %v2714_v1  ;;  %703 = vmatpush.msra.mxu1 %v155_v7  ;;  %v2830_v7 = vld [vmem:[#allocation8 + $0x1a0] sm:$0xff] }
  0x8a   :  { %663 = vmatpush.msra.mxu0 %v278_v10  ;;  %744 = vmatpush.msra.mxu2 %v219_v27  ;;  %v2840_v10 = vld [vmem:[#allocation8 + $0x180] sm:$0xff]  ;;  %v2878_v27 = vld [vmem:[#allocation8 + $0x178] sm:$0xff] }
  0x8b   :  { %704 = vmatpush.msra.mxu1 %v151_v11  ;;  %792 = vmatpush.msra.mxu3 %v255_v59  ;;  %v2842_v11 = vld [vmem:[#allocation8 + $0x188] sm:$0xff]  ;;  %v2935_v59 = vld [vmem:[#allocation8 + $0x150] sm:$0xff] }
  0x8c   :  { %664 = vmatpush.msra.mxu0 %v274_v20  ;;  %745 = vmatpush.msra.mxu2 %v215_v37  ;;  %v2854_v20 = vld [vmem:[#allocation8 + $0x160] sm:$0xff]  ;;  %v2888_v37 = vld [vmem:[#allocation8 + $0x158] sm:$0xff] }
  0x8d   :  { %705 = vmatpush.msra.mxu1 %v147_v21  ;;  %981 = vmatpush.msrb.mxu3 %v2826_v6  ;;  %v2856_v21 = vld [vmem:[#allocation8 + $0x168] sm:$0xff] }
  0x8e   :  { %665 = vmatpush.msra.mxu0 %v270_v24  ;;  %746 = vmatpush.msra.mxu2 %v211_v40  ;;  %v2867_v24 = vld [vmem:[#allocation8 + $0x140] sm:$0xff] }
  0x8f   :  { %550 = vmatmul.f32.gmra.mxu1 %v2726_v17  ;;  %982 = vmatpush.msrb.mxu3 %v2834_v9 }
  0x90   :  { %509 = vmatmul.f32.gmra.mxu0 %v2724_v16  ;;  %591 = vmatmul.f32.gmra.mxu2 %v2722_v15 }
  0x91   :  { %632 = vmatmul.f32.gmra.mxu3 %v2724_v16  ;;  %706 = vmatpush.msra.mxu1 %v143_v25  ;;  %v2869_v25 = vld [vmem:[#allocation8 + $0x148] sm:$0xff] }
  0x92   :  { %666 = vmatpush.msra.mxu0 %v266_v28  ;;  %747 = vmatpush.msra.mxu2 %v207_v42  ;;  %v2880_v28 = vld [vmem:[#allocation8 + $0x1b0] sm:$0xff]  ;;  %v2900_v42 = vld [vmem:[#allocation8 + $0x100] sm:$0xff] }
  0x93   :  { %707 = vmatpush.msra.mxu1 %v139_v29  ;;  %983 = vmatpush.msrb.mxu3 %v2848_v12  ;;  %v2884_v29 = vld [vmem:[#allocation8 + $0x120] sm:$0xff] }
  0x94   :  { %667 = vmatpush.msra.mxu0 %v262_v38  ;;  %748 = vmatpush.msra.mxu2 %v203_v48  ;;  %v2893_v38 = vperm.slane %v2876_v26, 0  ;;  %v2910_v48 = vld [vmem:[#allocation8 + $0x138] sm:$0xff] }
  0x95   :  { %708 = vmatpush.msra.mxu1 %v135_v39  ;;  %984 = vmatpush.msrb.mxu3 %v2858_v22 }
  0x96   :  { %668 = vmatpush.msra.mxu0 %v258_v43  ;;  %749 = vmatpush.msra.mxu2 %v199_v50  ;;  %3944 = vst [vmem:[#allocation18_spill] sm:$0xff] %v2893_v38  ;;  %v2902_v43 = vld [vmem:[#allocation8 + $0x108] sm:$0xff]  ;;  %v2916_v50 = vld [vmem:[#allocation8 + $0xe0] sm:$0xff] }
  0x97   :  { %553 = vmatmul.f32.gmra.mxu1 %v2736_v32  ;;  %985 = vmatpush.msrb.mxu3 %v2878_v27 }
  0x98   :  { %512 = vmatmul.f32.gmra.mxu0 %v2734_v31  ;;  %594 = vmatmul.f32.gmra.mxu2 %v2732_v30 }
  0x99   :  { %635 = vmatmul.f32.gmra.mxu3 %v2734_v31  ;;  %709 = vmatpush.msra.mxu1 %v131_v44 }
  0x9a   :  { %669 = vmatpush.msra.mxu0 %v254_v54  ;;  %750 = vmatpush.msra.mxu2 %v195_v56  ;;  %v2918_v54 = vld [vmem:[#allocation8 + $0xe8] sm:$0xff] }
  0x9b   :  { %710 = vmatpush.msra.mxu1 %v127_v55  ;;  %986 = vmatpush.msrb.mxu3 %v2888_v37  ;;  %v2920_v55 = vld [vmem:[#allocation8 + $0x118] sm:$0xff] }
  0x9c   :  { %751 = vmatpush.msra.mxu2 %v191_v58  ;;  %921 = vmatpush.msrb.mxu0 %v2812_v63 }
  0x9d   :  { %941 = vmatpush.msrb.mxu1 %v2814_v3  ;;  %987 = vmatpush.msrb.mxu3 %v2910_v48 }
  0x9e   :  { %922 = vmatpush.msrb.mxu0 %v2818_v4  ;;  %961 = vmatpush.msrb.mxu2 %v2850_v13 }
  0x9f   :  { %556 = vmatmul.f32.gmra.mxu1 %v2746_v47  ;;  %988 = vmatpush.msrb.mxu3 %v2920_v55 }
  0xa0   :  { %515 = vmatmul.f32.gmra.mxu0 %v2744_v46  ;;  %597 = vmatmul.f32.gmra.mxu2 %v2742_v45 }
  0xa1   :  { %638 = vmatmul.f32.gmra.mxu3 %v2744_v46  ;;  %942 = vmatpush.msrb.mxu1 %v2820_v5 }
  0xa2   :  { %923 = vmatpush.msrb.mxu0 %v2830_v7  ;;  %962 = vmatpush.msrb.mxu2 %v2865_v23 }
  0xa3   :  { %943 = vmatpush.msrb.mxu1 %v2832_v8 }
  0xa4   :  { %924 = vmatpush.msrb.mxu0 %v2840_v10  ;;  %963 = vmatpush.msrb.mxu2 %v2880_v28 }
  0xa5   :  { %944 = vmatpush.msrb.mxu1 %v2842_v11 }
  0xa6   :  { %925 = vmatpush.msrb.mxu0 %v2854_v20  ;;  %964 = vmatpush.msrb.mxu2 %v2898_v41 }
  0xa7   :  { %559 = vmatmul.f32.gmra.mxu1 %v2756_v62 }
  0xa8   :  { %518 = vmatmul.f32.gmra.mxu0 %v2754_v61  ;;  %600 = vmatmul.f32.gmra.mxu2 %v2752_v60 }
  0xa9   :  { %641 = vmatmul.f32.gmra.mxu3 %v2754_v61  ;;  %945 = vmatpush.msrb.mxu1 %v2856_v21 }
  0xaa   :  { %926 = vmatpush.msrb.mxu0 %v2867_v24  ;;  %965 = vmatpush.msrb.mxu2 %v2912_v49 }
  0xab   :  { %946 = vmatpush.msrb.mxu1 %v2869_v25 }
  0xac   :  { %927 = vmatpush.msrb.mxu0 %v2884_v29  ;;  %966 = vmatpush.msrb.mxu2 %v2935_v59 }
  0xad   :  { %947 = vmatpush.msrb.mxu1 %v2886_v33 }
  0xae   :  { %928 = vmatpush.msrb.mxu0 %v2900_v42 }
  0xaf   :  { %562 = vmatmul.f32.gmra.mxu1 %v2766_v19 }
  0xb0   :  { %521 = vmatmul.f32.gmra.mxu0 %v2764_v18  ;;  %603 = vmatmul.f32.gmra.mxu2 %v2762_v14 }
  0xb1   :  { %644 = vmatmul.f32.gmra.mxu3 %v2764_v18  ;;  %948 = vmatpush.msrb.mxu1 %v2902_v43 }
  0xb2   :  { %929 = vmatpush.msrb.mxu0 %v2916_v50 }
  0xb3   :  { %949 = vmatpush.msrb.mxu1 %v2918_v54 }
  0xb7   :  { %565 = vmatmul.f32.gmra.mxu1 %v2776_v36 }
  0xb8   :  { %524 = vmatmul.f32.gmra.mxu0 %v2774_v35  ;;  %606 = vmatmul.f32.gmra.mxu2 %v2772_v34 }
  0xb9   :  { %647 = vmatmul.f32.gmra.mxu3 %v2774_v35 }
  0xbf   :  { %568 = vmatmul.f32.gmra.mxu1 %v2786_v53 }
  0xc0   :  { %527 = vmatmul.f32.gmra.mxu0 %v2784_v52  ;;  %609 = vmatmul.f32.gmra.mxu2 %v2782_v51 }
  0xc1   :  { %650 = vmatmul.f32.gmra.mxu3 %v2784_v52 }
  0xc4   :  { %v384_v40 = vpop.f32.mrf.mxu1 }
  0xc5   :  { %v343_v39 = vpop.f32.mrf.mxu0 }
  0xc6   :  { %v344_v44 = vadd.f32 %v343_v39, %v2893_v38  ;;  %v2937_v39 = vld [vmem:[#allocation8 + $0xc0] sm:$0xff] }
  0xc7   :  { %711 = vmatmul.f32.vlgmr.msra.gmra.mxu1 %v2712_v0  ;;  %930 = vmatpush.msrb.mxu0 %v2937_v39 }
  0xc8   :  { %670 = vmatmul.f32.vlgmr.msra.gmra.mxu0 %v2716_v2  ;;  %752 = vmatmul.f32.vlgmr.msra.gmra.mxu2 %v2714_v1  ;;  %v385_v56 = vadd.f32 %v384_v40, %v344_v44  ;;  %v2939_v40 = vld [vmem:[#allocation8 + $0xc8] sm:$0xff]  ;;  %v2946_v44 = vld [vmem:[#allocation8 + $0xf8] sm:$0xff] }
  0xc9   :  { %793 = vmatmul.f32.vlgmr.msra.gmra.mxu3 %v2716_v2  ;;  %3949 = vst [vmem:[#allocation23_spill] sm:$0xff] %v2939_v40  ;;  %950 = vmatpush.msrb.mxu1 %v2939_v40  ;;  %v2973_v40 = vld [vmem:[#allocation8 + $0x80] sm:$0xff] }
  0xca   :  { %989 = vmatpush.msrb.mxu3 %v2946_v44  ;;  %3957 = vst [vmem:[#allocation31_spill] sm:$0xff] %v2973_v40 }
  0xcb   :  { %v425_v0 = vpop.f32.mrf.mxu2 }
  0xcc   :  { %v2926_v57 = vpop.f32.mrf.mxu3  ;;  %v2929_v1 = vadd.f32 %v425_v0, %v385_v56  ;;  %v2933_v58 = vpop.f32.mrf.mxu1  ;;  %v2948_v56 = vld [vmem:[#allocation8 + $0x130] sm:$0xff]  ;;  %v2952_v0 = vld [vmem:[#allocation8 + $0xa0] sm:$0xff] }
  0xcd   :  { %3945 = vst [vmem:[#allocation19_spill] sm:$0xff] %v2926_v57  ;;  %v2931_v2 = vpop.f32.mrf.mxu0  ;;  %967 = vmatpush.msrb.mxu2 %v2948_v56  ;;  %931 = vmatpush.msrb.mxu0 %v2952_v0  ;;  %v2975_v57 = vld [vmem:[#allocation8 + $0x88] sm:$0xff] }
  0xce   :  { %3946 = vst [vmem:[#allocation20_spill] sm:$0xff] %v2929_v1  ;;  %v2971_v1 = vld [vmem:[#allocation8 + $0x110] sm:$0xff] }
  0xcf   :  { %3947 = vst [vmem:[#allocation21_spill] sm:$0xff] %v2931_v2  ;;  %714 = vmatmul.f32.gmra.mxu1 %v2722_v15  ;;  %v2956_v2 = vld [vmem:[#allocation8 + $0xd8] sm:$0xff]  ;;  %968 = vmatpush.msrb.mxu2 %v2971_v1 }
  0xd0   :  { %3948 = vst [vmem:[#allocation22_spill] sm:$0xff] %v2933_v58  ;;  %673 = vmatmul.f32.gmra.mxu0 %v2726_v17  ;;  %755 = vmatmul.f32.gmra.mxu2 %v2724_v16  ;;  %v2954_v58 = vld [vmem:[#allocation8 + $0xa8] sm:$0xff] }
  0xd1   :  { %796 = vmatmul.f32.gmra.mxu3 %v2726_v17  ;;  %3950 = vst [vmem:[#allocation24_spill] sm:$0xff] %v2952_v0  ;;  %951 = vmatpush.msrb.mxu1 %v2954_v58  ;;  %v3012_v0 = vld [vmem:[#allocation8 + $0x48] sm:$0xff] }
  0xd2   :  { %3951 = vst [vmem:[#allocation25_spill] sm:$0xff] %v2954_v58  ;;  %990 = vmatpush.msrb.mxu3 %v2956_v2  ;;  %932 = vmatpush.msrb.mxu0 %v2973_v40  ;;  %v2992_v58 = vld [vmem:[#allocation8 + $0x98] sm:$0xff] }
  0xd3   :  { %3952 = vst [vmem:[#allocation26_spill] sm:$0xff] %v2956_v2  ;;  %v2962_v15 = vpop.f32.mrf.mxu2  ;;  %952 = vmatpush.msrb.mxu1 %v2975_v57 }
  0xd4   :  { %3953 = vst [vmem:[#allocation27_spill] sm:$0xff] %v2962_v15  ;;  %v2964_v38 = vpop.f32.mrf.mxu3  ;;  %v2969_v17 = vpop.f32.mrf.mxu1  ;;  %v2982_v15 = vld [vmem:[#allocation8 + $0xb8] sm:$0xff] }
  0xd5   :  { %3954 = vst [vmem:[#allocation28_spill] sm:$0xff] %v2964_v38  ;;  %v2967_v16 = vpop.f32.mrf.mxu0  ;;  %v2990_v38 = vld [vmem:[#allocation8 + $0x68] sm:$0xff]  ;;  %991 = vmatpush.msrb.mxu3 %v2982_v15 }
  0xd6   :  { %3955 = vst [vmem:[#allocation29_spill] sm:$0xff] %v2967_v16  ;;  %v2984_v16 = vld [vmem:[#allocation8 + $0xf0] sm:$0xff]  ;;  %953 = vmatpush.msrb.mxu1 %v2990_v38 }
  0xd7   :  { %3956 = vst [vmem:[#allocation30_spill] sm:$0xff] %v2969_v17  ;;  %717 = vmatmul.f32.gmra.mxu1 %v2732_v30  ;;  %v2988_v17 = vld [vmem:[#allocation8 + $0x60] sm:$0xff]  ;;  %969 = vmatpush.msrb.mxu2 %v2984_v16  ;;  %v2998_v30 = vld [vmem:[#allocation8 + $0xd0] sm:$0xff] }
  0xd8   :  { %3958 = vst [vmem:[#allocation32_spill] sm:$0xff] %v2975_v57  ;;  %676 = vmatmul.f32.gmra.mxu0 %v2736_v32  ;;  %758 = vmatmul.f32.gmra.mxu2 %v2734_v31 }
  0xd9   :  { %3959 = vst [vmem:[#allocation33_spill] sm:$0xff] %v2982_v15  ;;  %799 = vmatmul.f32.gmra.mxu3 %v2736_v32  ;;  %933 = vmatpush.msrb.mxu0 %v2988_v17  ;;  %v3010_v15 = vld [vmem:[#allocation8 + $0x40] sm:$0xff] }
  0xda   :  { %3960 = vst [vmem:[#allocation34_spill] sm:$0xff] %v2988_v17  ;;  %992 = vmatpush.msrb.mxu3 %v2992_v58  ;;  %970 = vmatpush.msrb.mxu2 %v2998_v30  ;;  %v3014_v17 = vld [vmem:[#allocation8 + $0xb0] sm:$0xff] }
  0xdb   :  { %3961 = vst [vmem:[#allocation35_spill] sm:$0xff] %v2990_v38  ;;  %v3000_v57 = vpop.f32.mrf.mxu2  ;;  %934 = vmatpush.msrb.mxu0 %v3010_v15  ;;  %954 = vmatpush.msrb.mxu1 %v3012_v0 }
  0xdc   :  { %3962 = vst [vmem:[#allocation36_spill] sm:$0xff] %v2992_v58  ;;  %v3002_v31 = vpop.f32.mrf.mxu3  ;;  %v3008_v40 = vpop.f32.mrf.mxu1  ;;  %971 = vmatpush.msrb.mxu2 %v3014_v17  ;;  %v3051_v58 = vld [vmem:[#allocation8] sm:$0xff] }
  0xdd   :  { %3963 = vst [vmem:[#allocation37_spill] sm:$0xff] %v3000_v57  ;;  %v3006_v32 = vpop.f32.mrf.mxu0  ;;  %v3019_v57 = vld [vmem:[#allocation8 + $0x90] sm:$0xff] }
  0xde   :  { %3964 = vst [vmem:[#allocation38_spill] sm:$0xff] %v3002_v31  ;;  %v3029_v31 = vld [vmem:[#allocation8 + $0x28] sm:$0xff]  ;;  %972 = vmatpush.msrb.mxu2 %v3019_v57 }
  0xdf   :  { %3965 = vst [vmem:[#allocation39_spill] sm:$0xff] %v3006_v32  ;;  %720 = vmatmul.f32.gmra.mxu1 %v2742_v45  ;;  %v3023_v32 = vld [vmem:[#allocation8 + $0x78] sm:$0xff]  ;;  %v3039_v45 = vld [vmem:[#allocation8 + $0x50] sm:$0xff] }
  0xe0   :  { %3966 = vst [vmem:[#allocation40_spill] sm:$0xff] %v3008_v40  ;;  %679 = vmatmul.f32.gmra.mxu0 %v2746_v47  ;;  %761 = vmatmul.f32.gmra.mxu2 %v2744_v46  ;;  %v3027_v40 = vld [vmem:[#allocation8 + $0x20] sm:$0xff] }
  0xe1   :  { %3967 = vst [vmem:[#allocation41_spill] sm:$0xff] %v3010_v15  ;;  %802 = vmatmul.f32.gmra.mxu3 %v2746_v47  ;;  %v3031_v15 = vld [vmem:[#allocation8 + $0x70] sm:$0xff]  ;;  %935 = vmatpush.msrb.mxu0 %v3027_v40 }
  0xe2   :  { %3968 = vst [vmem:[#allocation42_spill] sm:$0xff] %v3012_v0  ;;  %993 = vmatpush.msrb.mxu3 %v3023_v32  ;;  %v3035_v0 = vld [vmem:[#allocation8 + $0x58] sm:$0xff]  ;;  %955 = vmatpush.msrb.mxu1 %v3029_v31 }
  0xe3   :  { %3969 = vst [vmem:[#allocation43_spill] sm:$0xff] %v3014_v17  ;;  %v3041_v46 = vpop.f32.mrf.mxu2  ;;  %973 = vmatpush.msrb.mxu2 %v3031_v15  ;;  %936 = vmatpush.msrb.mxu0 %v3051_v58 }
  0xe4   :  { %3970 = vst [vmem:[#allocation44_spill] sm:$0xff] %v3019_v57  ;;  %v3043_v47 = vpop.f32.mrf.mxu3  ;;  %994 = vmatpush.msrb.mxu3 %v3035_v0  ;;  %v3053_v57 = vld [vmem:[#allocation8 + $0x8] sm:$0xff] }
  0xe5   :  { %3971 = vst [vmem:[#allocation45_spill] sm:$0xff] %v3023_v32  ;;  %v3047_v38 = vpop.f32.mrf.mxu0  ;;  %v3049_v32 = vpop.f32.mrf.mxu1  ;;  %974 = vmatpush.msrb.mxu2 %v3039_v45  ;;  %956 = vmatpush.msrb.mxu1 %v3053_v57 }
  0xe6   :  { %3972 = vst [vmem:[#allocation46_spill] sm:$0xff] %v3029_v31  ;;  %v3057_v31 = vld [vmem:[#allocation8 + $0x38] sm:$0xff]  ;;  %1075 = vmatpush.msra.mxu0 %v2812_v63 }
  0xe7   :  { %3973 = vst [vmem:[#allocation47_spill] sm:$0xff] %v3031_v15  ;;  %995 = vmatpush.msrb.mxu3 %v3057_v31  ;;  %723 = vmatmul.f32.gmra.mxu1 %v2752_v60 }
  0xe8   :  { %3974 = vst [vmem:[#allocation48_spill] sm:$0xff] %v3041_v46  ;;  %v3060_v46 = vld [vmem:[#allocation8 + $0x30] sm:$0xff]  ;;  %682 = vmatmul.f32.gmra.mxu0 %v2756_v62  ;;  %764 = vmatmul.f32.gmra.mxu2 %v2754_v61 }
  0xe9   :  { %3975 = vst [vmem:[#allocation49_spill] sm:$0xff] %v3043_v47  ;;  %v3063_v47 = vld [vmem:[#allocation8 + $0x18] sm:$0xff]  ;;  %805 = vmatmul.f32.gmra.mxu3 %v2756_v62  ;;  %975 = vmatpush.msrb.mxu2 %v3060_v46 }
  0xea   :  { %3976 = vst [vmem:[#allocation50_spill] sm:$0xff] %v3047_v38  ;;  %996 = vmatpush.msrb.mxu3 %v3063_v47  ;;  %1095 = vmatpush.msra.mxu1 %v2814_v3 }
  0xeb   :  { %3977 = vst [vmem:[#allocation51_spill] sm:$0xff] %v3049_v32  ;;  %v3069_v32 = vld [vmem:[#allocation8 + $0x10] sm:$0xff]  ;;  %v3075_v38 = vpop.f32.mrf.mxu2  ;;  %1076 = vmatpush.msra.mxu0 %v2818_v4 }
  0xec   :  { %3978 = vst [vmem:[#allocation52_spill] sm:$0xff] %v3053_v57  ;;  %v3077_v57 = vpop.f32.mrf.mxu3  ;;  %976 = vmatpush.msrb.mxu2 %v3069_v32  ;;  %1135 = vmatpush.msra.mxu3 %v2826_v6 }
  0xed   :  { %3979 = vst [vmem:[#allocation53_spill] sm:$0xff] %v3063_v47  ;;  %v3081_v60 = vpop.f32.mrf.mxu0  ;;  %v3083_v61 = vpop.f32.mrf.mxu1  ;;  %1096 = vmatpush.msra.mxu1 %v2820_v5  ;;  %1077 = vmatpush.msra.mxu0 %v2830_v7 }
  0xee   :  { %3980 = vst [vmem:[#allocation54_spill] sm:$0xff] %v3075_v38  ;;  %1115 = vmatpush.msra.mxu2 %v2850_v13  ;;  %1136 = vmatpush.msra.mxu3 %v2834_v9  ;;  %v3996_v38 = vld [vmem:[#allocation25_spill] sm:$0xff] }
  0xef   :  { %3981 = vst [vmem:[#allocation55_spill] sm:$0xff] %v3081_v60  ;;  %726 = vmatmul.f32.gmra.mxu1 %v2762_v14  ;;  %1078 = vmatpush.msra.mxu0 %v2840_v10 }
  0xf0   :  { %3982 = vst [vmem:[#allocation56_spill] sm:$0xff] %v3083_v61  ;;  %1116 = vmatpush.msra.mxu2 %v2865_v23  ;;  %685 = vmatmul.f32.gmra.mxu0 %v2766_v19 }
  0xf1   :  { %767 = vmatmul.f32.gmra.mxu2 %v2764_v18  ;;  %808 = vmatmul.f32.gmra.mxu3 %v2766_v19 }
  0xf2   :  { %1097 = vmatpush.msra.mxu1 %v2832_v8  ;;  %1117 = vmatpush.msra.mxu2 %v2880_v28 }
  0xf3   :  { %1137 = vmatpush.msra.mxu3 %v2848_v12  ;;  %v3099_v62 = vpop.f32.mrf.mxu2  ;;  %1079 = vmatpush.msra.mxu0 %v2854_v20 }
  0xf4   :  { %3983 = vst [vmem:[#allocation57_spill] sm:$0xff] %v3099_v62  ;;  %v3101_v61 = vpop.f32.mrf.mxu3  ;;  %1098 = vmatpush.msra.mxu1 %v2842_v11  ;;  %1118 = vmatpush.msra.mxu2 %v2898_v41  ;;  %v3995_v62 = vld [vmem:[#allocation24_spill] sm:$0xff] }
  0xf5   :  { %3984 = vst [vmem:[#allocation58_spill] sm:$0xff] %v3101_v61  ;;  %v3105_v14 = vpop.f32.mrf.mxu0  ;;  %v3107_v18 = vpop.f32.mrf.mxu1  ;;  %1138 = vmatpush.msra.mxu3 %v2858_v22  ;;  %1080 = vmatpush.msra.mxu0 %v2867_v24  ;;  %v3167_v61 = vperm.slane %v2876_v26, 2 }
  0xf6   :  { %3985 = vst [vmem:[#allocation59_spill] sm:$0xff] %v3105_v14  ;;  %1099 = vmatpush.msra.mxu1 %v2856_v21  ;;  %1119 = vmatpush.msra.mxu2 %v2912_v49 }
  0xf7   :  { %3986 = vst [vmem:[#allocation60_spill] sm:$0xff] %v3107_v18  ;;  %1139 = vmatpush.msra.mxu3 %v2878_v27  ;;  %729 = vmatmul.f32.gmra.mxu1 %v2772_v34 }
  0xf8   :  { %688 = vmatmul.f32.gmra.mxu0 %v2776_v36  ;;  %1100 = vmatpush.msra.mxu1 %v2869_v25 }
  0xf9   :  { %770 = vmatmul.f32.gmra.mxu2 %v2774_v35  ;;  %811 = vmatmul.f32.gmra.mxu3 %v2776_v36  ;;  %v3140_v36 = vperm.slane %v2876_v26, 1 }
  0xfa   :  { %1120 = vmatpush.msra.mxu2 %v2935_v59  ;;  %1140 = vmatpush.msra.mxu3 %v2888_v37 }
  0xfb   :  { %1081 = vmatpush.msra.mxu0 %v2884_v29  ;;  %v3123_v19 = vpop.f32.mrf.mxu2  ;;  %1101 = vmatpush.msra.mxu1 %v2886_v33 }
  0xfc   :  { %3987 = vst [vmem:[#allocation61_spill] sm:$0xff] %v3123_v19  ;;  %v3125_v18 = vpop.f32.mrf.mxu3  ;;  %1121 = vmatpush.msra.mxu2 %v2948_v56  ;;  %1141 = vmatpush.msra.mxu3 %v2910_v48 }
  0xfd   :  { %3988 = vst [vmem:[#allocation62_spill] sm:$0xff] %v3125_v18  ;;  %v3129_v34 = vpop.f32.mrf.mxu0  ;;  %v3131_v35 = vpop.f32.mrf.mxu1  ;;  %1082 = vmatpush.msra.mxu0 %v2900_v42  ;;  %1102 = vmatpush.msra.mxu1 %v2902_v43  ;;  %v2660_v18 = vmov 0.0  }
  0xfe   :  { %3989 = vst [vmem:[#allocation63_spill] sm:$0xff] %v3129_v34  ;;  %1122 = vmatpush.msra.mxu2 %v2971_v1  ;;  %1142 = vmatpush.msra.mxu3 %v2920_v55 }
  0xff   :  { %3990 = vst [vmem:[#allocation64_spill] sm:$0xff] %v3131_v35  ;;  %1083 = vmatpush.msra.mxu0 %v2916_v50  ;;  %732 = vmatmul.f32.gmra.mxu1 %v2782_v51  ;;  %v3991_v35 = vld [vmem:[#allocation19_spill] sm:$0xff] }
 0x100   :  { %691 = vmatmul.f32.gmra.mxu0 %v2786_v53  ;;  %1103 = vmatpush.msra.mxu1 %v2918_v54  ;;  %v467_v34 = vadd.f32 %v3991_v35, %v3140_v36  ;;  %v3994_v51 = vld [vmem:[#allocation23_spill] sm:$0xff]  ;;  %v3997_v35 = vld [vmem:[#allocation33_spill] sm:$0xff] }
 0x101   :  { %773 = vmatmul.f32.gmra.mxu2 %v2784_v52  ;;  %814 = vmatmul.f32.gmra.mxu3 %v2786_v53 }
 0x102   :  { %1123 = vmatpush.msra.mxu2 %v2984_v16  ;;  %1143 = vmatpush.msra.mxu3 %v2946_v44 }
 0x103   :  { %1084 = vmatpush.msra.mxu0 %v2937_v39  ;;  %v3152_v19 = vpop.f32.mrf.mxu2  ;;  %1104 = vmatpush.msra.mxu1 %v3994_v51 }
 0x104   :  { %3992 = vst [vmem:[#allocation19_spill] sm:$0xff] %v3152_v19  ;;  %v3154_v14 = vpop.f32.mrf.mxu3  ;;  %1124 = vmatpush.msra.mxu2 %v2998_v30  ;;  %1144 = vmatpush.msra.mxu3 %v2956_v2  ;;  %v3998_v19 = vld [vmem:[#allocation31_spill] sm:$0xff]  ;;  %v4008_v2 = vld [vmem:[#allocation42_spill] sm:$0xff] }
 0x105   :  { %3993 = vst [vmem:[#allocation65_spill] sm:$0xff] %v3154_v14  ;;  %v507_v52 = vpop.f32.mrf.mxu0  ;;  %v548_v53 = vpop.f32.mrf.mxu1  ;;  %1085 = vmatpush.msra.mxu0 %v3995_v62  ;;  %1105 = vmatpush.msra.mxu1 %v3996_v38  ;;  %v4000_v62 = vld [vmem:[#allocation32_spill] sm:$0xff] }
 0x106   :  { %v508_v60 = vadd.f32 %v507_v52, %v467_v34  ;;  %1125 = vmatpush.msra.mxu2 %v3014_v17  ;;  %1145 = vmatpush.msra.mxu3 %v3997_v35  ;;  %v4001_v34 = vld [vmem:[#allocation44_spill] sm:$0xff]  ;;  %v4003_v17 = vld [vmem:[#allocation34_spill] sm:$0xff]  ;;  %v4005_v35 = vld [vmem:[#allocation35_spill] sm:$0xff] }
 0x107   :  { %1086 = vmatpush.msra.mxu0 %v3998_v19  ;;  %957 = vmatmul.f32.vlgmr.msrb.gmra.mxu1 %v2660_v18  ;;  %v4002_v52 = vld [vmem:[#allocation36_spill] sm:$0xff] }
 0x108   :  { %v3164_v14 = vadd.f32 %v548_v53, %v508_v60  ;;  %937 = vmatmul.f32.vlgmr.msrb.gmra.mxu0 %v2660_v18  ;;  %1106 = vmatpush.msra.mxu1 %v4000_v62  ;;  %v4004_v19 = vld [vmem:[#allocation28_spill] sm:$0xff]  ;;  %v4006_v62 = vld [vmem:[#allocation45_spill] sm:$0xff] }
 0x109   :  { %977 = vmatmul.f32.vlgmr.msrb.gmra.mxu2 %v2660_v18  ;;  %997 = vmatmul.f32.vlgmr.msrb.gmra.mxu3 %v2660_v18  ;;  %v470_v60 = vadd.f32 %v4004_v19, %v3140_v36 }
 0x10a   :  { %3999 = vst [vmem:[#allocation23_spill] sm:$0xff] %v3164_v14  ;;  %1126 = vmatpush.msra.mxu2 %v4001_v34  ;;  %1146 = vmatpush.msra.mxu3 %v4002_v52  ;;  %v4007_v34 = vld [vmem:[#allocation41_spill] sm:$0xff] }
 0x10b   :  { %1087 = vmatpush.msra.mxu0 %v4003_v17  ;;  %v589_v53 = vpop.f32.mrf.mxu2  ;;  %1107 = vmatpush.msra.mxu1 %v4005_v35 }
 0x10c   :  { %v630_v14 = vpop.f32.mrf.mxu3  ;;  %1127 = vmatpush.msra.mxu2 %v3031_v15  ;;  %v590_v18 = vadd.f32 %v589_v53, %v3167_v61  ;;  %1147 = vmatpush.msra.mxu3 %v4006_v62  ;;  %v4011_v53 = vld [vmem:[#allocation46_spill] sm:$0xff] }
 0x10d   :  { %v510_v26 = vpop.f32.mrf.mxu0  ;;  %v551_v38 = vpop.f32.mrf.mxu1  ;;  %1088 = vmatpush.msra.mxu0 %v4007_v34  ;;  %1108 = vmatpush.msra.mxu1 %v4008_v2 }
 0x10e   :  { %v511_v52 = vadd.f32 %v510_v26, %v470_v60  ;;  %1128 = vmatpush.msra.mxu2 %v3039_v45  ;;  %v3182_v19 = vadd.f32 %v630_v14, %v590_v18  ;;  %1148 = vmatpush.msra.mxu3 %v3035_v0  ;;  %v4012_v26 = vld [vmem:[#allocation52_spill] sm:$0xff]  ;;  %v4013_v14 = vld [vmem:[#allocation38_spill] sm:$0xff] }
 0x10f   :  { %1089 = vmatpush.msra.mxu0 %v3027_v40  ;;  %1109 = vmatpush.msra.mxu1 %v4011_v53 }
 0x110   :  { %4009 = vst [vmem:[#allocation34_spill] sm:$0xff] %v3182_v19  ;;  %v3186_v15 = vadd.f32 %v551_v38, %v511_v52  ;;  %1129 = vmatpush.msra.mxu2 %v3060_v46  ;;  %1149 = vmatpush.msra.mxu3 %v3057_v31  ;;  %v473_v38 = vadd.f32 %v4013_v14, %v3140_v36 }
 0x111   :  { %1090 = vmatpush.msra.mxu0 %v3051_v58  ;;  %1110 = vmatpush.msra.mxu1 %v4012_v26 }
 0x112   :  { %4010 = vst [vmem:[#allocation28_spill] sm:$0xff] %v3186_v15  ;;  %1130 = vmatpush.msra.mxu2 %v3069_v32  ;;  %1150 = vmatpush.msra.mxu3 %v3063_v47 }
 0x113   :  { %1229 = vmatpush.msrb.mxu0 %v2812_v63  ;;  %v592_v52 = vpop.f32.mrf.mxu2  ;;  %1249 = vmatpush.msrb.mxu1 %v2814_v3 }
 0x114   :  { %v633_v60 = vpop.f32.mrf.mxu3  ;;  %1269 = vmatpush.msrb.mxu2 %v2850_v13  ;;  %v593_v18 = vadd.f32 %v592_v52, %v3167_v61  ;;  %1289 = vmatpush.msrb.mxu3 %v2826_v6 }
 0x115   :  { %v513_v15 = vpop.f32.mrf.mxu0  ;;  %v554_v19 = vpop.f32.mrf.mxu1  ;;  %1230 = vmatpush.msrb.mxu0 %v2818_v4  ;;  %1250 = vmatpush.msrb.mxu1 %v2820_v5  ;;  %v4015_v4 = vld [vmem:[#allocation49_spill] sm:$0xff] }
 0x116   :  { %v514_v47 = vadd.f32 %v513_v15, %v473_v38  ;;  %1270 = vmatpush.msrb.mxu2 %v2865_v23  ;;  %v3205_v63 = vadd.f32 %v633_v60, %v593_v18  ;;  %1290 = vmatpush.msrb.mxu3 %v2834_v9  ;;  %v476_v5 = vadd.f32 %v4015_v4, %v3140_v36  ;;  %v4027_v15 = vld [vmem:[#allocation58_spill] sm:$0xff]  ;;  %v4028_v38 = vld [vmem:[#allocation47_spill] sm:$0xff] }
 0x117   :  { %1231 = vmatpush.msrb.mxu0 %v2830_v7  ;;  %1251 = vmatpush.msrb.mxu1 %v2832_v8 }
 0x118   :  { %v3209_v3 = vadd.f32 %v554_v19, %v514_v47  ;;  %1271 = vmatpush.msrb.mxu2 %v2880_v28  ;;  %1291 = vmatpush.msrb.mxu3 %v2848_v12  ;;  %v482_v47 = vadd.f32 %v4027_v15, %v3140_v36 }
 0x119   :  { %1232 = vmatpush.msrb.mxu0 %v2840_v10  ;;  %1252 = vmatpush.msrb.mxu1 %v2842_v11 }
 0x11a   :  { %4014 = vst [vmem:[#allocation35_spill] sm:$0xff] %v3209_v3  ;;  %1272 = vmatpush.msrb.mxu2 %v2898_v41  ;;  %1292 = vmatpush.msrb.mxu3 %v2858_v22 }
 0x11b   :  { %1233 = vmatpush.msrb.mxu0 %v2854_v20  ;;  %v595_v6 = vpop.f32.mrf.mxu2  ;;  %1253 = vmatpush.msrb.mxu1 %v2856_v21  ;;  %v479_v20 = vadd.f32 %v3077_v57, %v3140_v36  ;;  %v4026_v57 = vld [vmem:[#allocation36_spill] sm:$0xff] }
 0x11c   :  { %v636_v7 = vpop.f32.mrf.mxu3  ;;  %1273 = vmatpush.msrb.mxu2 %v2912_v49  ;;  %v596_v8 = vadd.f32 %v595_v6, %v3167_v61  ;;  %1293 = vmatpush.msrb.mxu3 %v2878_v27 }
 0x11d   :  { %v516_v9 = vpop.f32.mrf.mxu0  ;;  %v557_v10 = vpop.f32.mrf.mxu1  ;;  %1234 = vmatpush.msrb.mxu0 %v2867_v24  ;;  %1254 = vmatpush.msrb.mxu1 %v2869_v25 }
 0x11e   :  { %v517_v11 = vadd.f32 %v516_v9, %v476_v5  ;;  %1274 = vmatpush.msrb.mxu2 %v2935_v59  ;;  %v3228_v12 = vadd.f32 %v636_v7, %v596_v8  ;;  %1294 = vmatpush.msrb.mxu3 %v2888_v37  ;;  %v4030_v7 = vld [vmem:[#allocation53_spill] sm:$0xff]  ;;  %v4031_v8 = vld [vmem:[#allocation62_spill] sm:$0xff] }
 0x11f   :  { %1235 = vmatpush.msrb.mxu0 %v2884_v29  ;;  %1255 = vmatpush.msrb.mxu1 %v2886_v33  ;;  %v4017_v29 = vld [vmem:[#allocation26_spill] sm:$0xff]  ;;  %v4018_v33 = vld [vmem:[#allocation24_spill] sm:$0xff]  ;;  %v485_v9 = vadd.f32 %v4031_v8, %v3140_v36 }
 0x120   :  { %v3232_v13 = vadd.f32 %v557_v10, %v517_v11  ;;  %1275 = vmatpush.msrb.mxu2 %v2948_v56  ;;  %1295 = vmatpush.msrb.mxu3 %v2910_v48  ;;  %v4022_v48 = vld [vmem:[#allocation33_spill] sm:$0xff] }
 0x121   :  { %1236 = vmatpush.msrb.mxu0 %v2900_v42  ;;  %1256 = vmatpush.msrb.mxu1 %v2902_v43  ;;  %v4020_v42 = vld [vmem:[#allocation25_spill] sm:$0xff]  ;;  %v4021_v43 = vld [vmem:[#allocation43_spill] sm:$0xff] }
 0x122   :  { %4016 = vst [vmem:[#allocation45_spill] sm:$0xff] %v3232_v13  ;;  %1276 = vmatpush.msrb.mxu2 %v2971_v1  ;;  %1296 = vmatpush.msrb.mxu3 %v2920_v55  ;;  %v4025_v55 = vld [vmem:[#allocation44_spill] sm:$0xff] }
 0x123   :  { %1237 = vmatpush.msrb.mxu0 %v2916_v50  ;;  %v598_v21 = vpop.f32.mrf.mxu2  ;;  %1257 = vmatpush.msrb.mxu1 %v2918_v54  ;;  %v4023_v50 = vld [vmem:[#allocation31_spill] sm:$0xff]  ;;  %v4024_v54 = vld [vmem:[#allocation32_spill] sm:$0xff] }
 0x124   :  { %v639_v22 = vpop.f32.mrf.mxu3  ;;  %1277 = vmatpush.msrb.mxu2 %v2984_v16  ;;  %v599_v23 = vadd.f32 %v598_v21, %v3167_v61  ;;  %1297 = vmatpush.msrb.mxu3 %v2946_v44 }
 0x125   :  { %v519_v24 = vpop.f32.mrf.mxu0  ;;  %v560_v25 = vpop.f32.mrf.mxu1  ;;  %1238 = vmatpush.msrb.mxu0 %v2937_v39  ;;  %1258 = vmatpush.msrb.mxu1 %v3994_v51 }
 0x126   :  { %v520_v27 = vadd.f32 %v519_v24, %v479_v20  ;;  %1278 = vmatpush.msrb.mxu2 %v2998_v30  ;;  %v3251_v28 = vadd.f32 %v639_v22, %v599_v23  ;;  %1298 = vmatpush.msrb.mxu3 %v4017_v29 }
 0x127   :  { %1239 = vmatpush.msrb.mxu0 %v4018_v33  ;;  %1259 = vmatpush.msrb.mxu1 %v4020_v42 }
 0x128   :  { %v3255_v37 = vadd.f32 %v560_v25, %v520_v27  ;;  %1279 = vmatpush.msrb.mxu2 %v4021_v43  ;;  %1299 = vmatpush.msrb.mxu3 %v4022_v48  ;;  %v4033_v27 = vld [vmem:[#allocation65_spill] sm:$0xff] }
 0x129   :  { %1240 = vmatpush.msrb.mxu0 %v4023_v50  ;;  %1260 = vmatpush.msrb.mxu1 %v4024_v54  ;;  %v488_v15 = vadd.f32 %v4033_v27, %v3140_v36 }
 0x12a   :  { %4019 = vst [vmem:[#allocation41_spill] sm:$0xff] %v3255_v37  ;;  %1280 = vmatpush.msrb.mxu2 %v4025_v55  ;;  %1300 = vmatpush.msrb.mxu3 %v4026_v57 }
 0x12b   :  { %1241 = vmatpush.msrb.mxu0 %v4003_v17  ;;  %v601_v19 = vpop.f32.mrf.mxu2  ;;  %1261 = vmatpush.msrb.mxu1 %v4005_v35 }
 0x12c   :  { %v642_v14 = vpop.f32.mrf.mxu3  ;;  %1281 = vmatpush.msrb.mxu2 %v4028_v38  ;;  %v602_v52 = vadd.f32 %v601_v19, %v3167_v61  ;;  %1301 = vmatpush.msrb.mxu3 %v4006_v62 }
 0x12d   :  { %v522_v60 = vpop.f32.mrf.mxu0  ;;  %v563_v18 = vpop.f32.mrf.mxu1  ;;  %1242 = vmatpush.msrb.mxu0 %v4007_v34  ;;  %1262 = vmatpush.msrb.mxu1 %v4008_v2 }
 0x12e   :  { %v523_v4 = vadd.f32 %v522_v60, %v482_v47  ;;  %1282 = vmatpush.msrb.mxu2 %v3039_v45  ;;  %v3274_v5 = vadd.f32 %v642_v14, %v602_v52  ;;  %1302 = vmatpush.msrb.mxu3 %v3035_v0 }
 0x12f   :  { %1243 = vmatpush.msrb.mxu0 %v3027_v40  ;;  %1263 = vmatpush.msrb.mxu1 %v4011_v53 }
 0x130   :  { %v3278_v6 = vadd.f32 %v563_v18, %v523_v4  ;;  %1283 = vmatpush.msrb.mxu2 %v3060_v46  ;;  %1303 = vmatpush.msrb.mxu3 %v3057_v31 }
 0x131   :  { %1244 = vmatpush.msrb.mxu0 %v3051_v58  ;;  %1264 = vmatpush.msrb.mxu1 %v4012_v26 }
 0x132   :  { %4029 = vst [vmem:[#allocation42_spill] sm:$0xff] %v3278_v6  ;;  %1284 = vmatpush.msrb.mxu2 %v3069_v32  ;;  %1304 = vmatpush.msrb.mxu3 %v4030_v7 }
 0x133   :  { %v604_v10 = vpop.f32.mrf.mxu2 }
 0x134   :  { %v645_v11 = vpop.f32.mrf.mxu3  ;;  %v605_v20 = vadd.f32 %v604_v10, %v3167_v61 }
 0x135   :  { %v525_v21 = vpop.f32.mrf.mxu0  ;;  %v566_v22 = vpop.f32.mrf.mxu1 }
 0x136   :  { %v526_v23 = vadd.f32 %v525_v21, %v485_v9  ;;  %v646_v24 = vadd.f32 %v645_v11, %v605_v20  ;;  %v4035_v21 = vld [vmem:[#allocation34_spill] sm:$0xff] }
 0x138   :  { %v3290_v25 = vadd.f32 %v566_v22, %v526_v23  ;;  %v4036_v23 = vld [vmem:[#allocation17_spill] sm:$0xff] }
 0x139   :  { %v321_v27 = vperm.slane %v4036_v23, 3 }
 0x13a   :  { %4032 = vst [vmem:[#allocation46_spill] sm:$0xff] %v3290_v25 }
 0x13b   :  { %v607_v47 = vpop.f32.mrf.mxu2 }
 0x13c   :  { %v648_v19 = vpop.f32.mrf.mxu3  ;;  %v608_v14 = vadd.f32 %v607_v47, %v3167_v61 }
 0x13d   :  { %v528_v52 = vpop.f32.mrf.mxu0  ;;  %v569_v60 = vpop.f32.mrf.mxu1 }
 0x13e   :  { %v529_v18 = vadd.f32 %v528_v52, %v488_v15  ;;  %v649_v4 = vadd.f32 %v648_v19, %v608_v14 }
 0x140   :  { %v3295_v8 = vadd.f32 %v569_v60, %v529_v18 }
 0x142   :  { %4034 = vst [vmem:[#allocation52_spill] sm:$0xff] %v3295_v8 }
 0x143   :  { %v610_v10 = vpop.f32.mrf.mxu2 }
 0x144   :  { %v651_v6 = vpop.f32.mrf.mxu3  ;;  %v611_v9 = vadd.f32 %v610_v10, %v3167_v61 }
 0x145   :  { %v671_v11 = vpop.f32.mrf.mxu0  ;;  %v712_v20 = vpop.f32.mrf.mxu1 }
 0x146   :  { %v3299_v22 = vadd.f32 %v671_v11, %v4035_v21  ;;  %v652_v36 = vadd.f32 %v651_v6, %v611_v9 }
 0x14b   :  { %v753_v25 = vpop.f32.mrf.mxu2 }
 0x14c   :  { %v3302_v47 = vpop.f32.mrf.mxu3 }
 0x14d   :  { %v674_v37 = vpop.f32.mrf.mxu0  ;;  %v715_v15 = vpop.f32.mrf.mxu1 }
 0x14e   :  { %v3305_v19 = vadd.f32 %v674_v37, %v3205_v63  ;;  %v716_v14 = vadd.f32 %v715_v15, %v321_v27 }
 0x150   :  { %4037 = vst [vmem:[#allocation38_spill] sm:$0xff] %v3305_v19 }
 0x153   :  { %v756_v52 = vpop.f32.mrf.mxu2 }
 0x154   :  { %v797_v60 = vpop.f32.mrf.mxu3  ;;  %v757_v61 = vadd.f32 %v756_v52, %v716_v14 }
 0x155   :  { %v677_v18 = vpop.f32.mrf.mxu0  ;;  %v718_v10 = vpop.f32.mrf.mxu1 }
 0x156   :  { %v3308_v11 = vadd.f32 %v677_v18, %v3228_v12  ;;  %v719_v6 = vadd.f32 %v718_v10, %v321_v27  ;;  %v3310_v9 = vadd.f32 %v797_v60, %v757_v61 }
 0x158   :  { %4038 = vst [vmem:[#allocation49_spill] sm:$0xff] %v3308_v11 }
 0x15b   :  { %v759_v21 = vpop.f32.mrf.mxu2 }
 0x15c   :  { %v800_v23 = vpop.f32.mrf.mxu3  ;;  %v760_v8 = vadd.f32 %v759_v21, %v719_v6 }
 0x15d   :  { %v680_v13 = vpop.f32.mrf.mxu0  ;;  %v721_v3 = vpop.f32.mrf.mxu1 }
 0x15e   :  { %v3313_v63 = vadd.f32 %v680_v13, %v3251_v28  ;;  %v722_v37 = vadd.f32 %v721_v3, %v321_v27  ;;  %v3315_v15 = vadd.f32 %v800_v23, %v760_v8 }
 0x160   :  { %4039 = vst [vmem:[#allocation26_spill] sm:$0xff] %v3313_v63 }
 0x161   :  { %4040 = vst [vmem:[#allocation24_spill] sm:$0xff] %v3315_v15 }
 0x163   :  { %v762_v14 = vpop.f32.mrf.mxu2 }
 0x164   :  { %v803_v52 = vpop.f32.mrf.mxu3  ;;  %v763_v19 = vadd.f32 %v762_v14, %v722_v37 }
 0x165   :  { %v683_v7 = vpop.f32.mrf.mxu0  ;;  %v724_v12 = vpop.f32.mrf.mxu1 }
 0x166   :  { %v3318_v18 = vadd.f32 %v683_v7, %v3274_v5  ;;  %v725_v60 = vadd.f32 %v724_v12, %v321_v27  ;;  %v3320_v61 = vadd.f32 %v803_v52, %v763_v19 }
 0x168   :  { %4041 = vst [vmem:[#allocation25_spill] sm:$0xff] %v3318_v18 }
 0x169   :  { %4042 = vst [vmem:[#allocation43_spill] sm:$0xff] %v3320_v61  ;;  %v3601_v61 = vld [vmem:[#allocation8 + $0x8] sm:$0xff] }
 0x16a   :  { %4082 = vst [vmem:[#allocation77_spill] sm:$0xff] %v3601_v61 }
 0x16b   :  { %v765_v10 = vpop.f32.mrf.mxu2 }
 0x16c   :  { %v806_v6 = vpop.f32.mrf.mxu3  ;;  %v766_v21 = vadd.f32 %v765_v10, %v725_v60 }
 0x16d   :  { %v686_v11 = vpop.f32.mrf.mxu0  ;;  %v727_v13 = vpop.f32.mrf.mxu1 }
 0x16e   :  { %v3322_v28 = vadd.f32 %v686_v11, %v646_v24  ;;  %v728_v3 = vadd.f32 %v727_v13, %v321_v27  ;;  %v3324_v8 = vadd.f32 %v806_v6, %v766_v21 }
 0x170   :  { %4043 = vst [vmem:[#allocation33_spill] sm:$0xff] %v3322_v28 }
 0x171   :  { %4044 = vst [vmem:[#allocation31_spill] sm:$0xff] %v3324_v8  ;;  %v3598_v8 = vld [vmem:[#allocation8] sm:$0xff] }
 0x172   :  { %4081 = vst [vmem:[#allocation76_spill] sm:$0xff] %v3598_v8 }
 0x174   :  { %v768_v23 = vpop.f32.mrf.mxu2  ;;  %v809_v37 = vpop.f32.mrf.mxu3 }
 0x175   :  { %v769_v14 = vadd.f32 %v768_v23, %v728_v3  ;;  %v689_v63 = vpop.f32.mrf.mxu0  ;;  %v730_v15 = vpop.f32.mrf.mxu1  ;;  %v713_v3 = vadd.f32 %v712_v20, %v321_v27 }
 0x176   :  { %v3326_v5 = vadd.f32 %v689_v63, %v649_v4  ;;  %v731_v7 = vadd.f32 %v730_v15, %v321_v27  ;;  %v4049_v63 = vld [vmem:[#allocation20_spill] sm:$0xff] }
 0x177   :  { %v3328_v19 = vadd.f32 %v809_v37, %v769_v14  ;;  %v4050_v37 = vld [vmem:[#allocation23_spill] sm:$0xff] }
 0x178   :  { %4045 = vst [vmem:[#allocation32_spill] sm:$0xff] %v3326_v5  ;;  %v754_v5 = vadd.f32 %v753_v25, %v713_v3 }
 0x179   :  { %4046 = vst [vmem:[#allocation44_spill] sm:$0xff] %v3328_v19 }
 0x17c   :  { %v771_v52 = vpop.f32.mrf.mxu2  ;;  %v812_v12 = vpop.f32.mrf.mxu3 }
 0x17d   :  { %v772_v60 = vadd.f32 %v771_v52, %v731_v7  ;;  %v692_v10 = vpop.f32.mrf.mxu0  ;;  %v733_v18 = vpop.f32.mrf.mxu1 }
 0x17e   :  { %v3330_v24 = vadd.f32 %v692_v10, %v652_v36  ;;  %v734_v11 = vadd.f32 %v733_v18, %v321_v27  ;;  %v795_v36 = vadd.f32 %v3302_v47, %v754_v5 }
 0x17f   :  { %v3332_v6 = vadd.f32 %v812_v12, %v772_v60 }
 0x180   :  { %4047 = vst [vmem:[#allocation36_spill] sm:$0xff] %v3330_v24 }
 0x181   :  { %4048 = vst [vmem:[#allocation58_spill] sm:$0xff] %v3332_v6  ;;  %v3595_v6 = vld [vmem:[#allocation8 + $0x38] sm:$0xff] }
 0x182   :  { %4080 = vst [vmem:[#allocation75_spill] sm:$0xff] %v3595_v6 }
 0x184   :  { %v774_v21 = vpop.f32.mrf.mxu2  ;;  %v815_v13 = vpop.f32.mrf.mxu3 }
 0x185   :  { %v775_v23 = vadd.f32 %v774_v21, %v734_v11  ;;  %v938_v28 = vpop.f32.mrf.mxu0  ;;  %v958_v4 = vpop.f32.mrf.mxu1 }
 0x186   :  { %v1001_v15 = vadd.f32 %v938_v28, %v4049_v63  ;;  %v1002_v14 = vadd.f32 %v958_v4, %v4050_v37 }
 0x187   :  { %v3336_v19 = vadd.f32 %v815_v13, %v775_v23 }
 0x188   :  { %v2233_v7 = vmul.f32 -1.442695, %v1001_v15  ;;  %v2234_v52 = vmul.f32 -1.442695, %v1002_v14 }
 0x189   :  { %4051 = vst [vmem:[#allocation47_spill] sm:$0xff] %v3336_v19 }
 0x18a   :  { %2272 = vpow2.f32 %v2233_v7 }
 0x18b   :  { %2274 = vpow2.f32 %v2234_v52 }
 0x18c   :  { %v998_v18 = vpop.f32.mrf.mxu3  ;;  %v978_v28 = vpop.f32.mrf.mxu2 }
 0x18d   :  { %v1004_v12 = vadd.f32 %v998_v18, %v795_v36  ;;  %v1003_v3 = vadd.f32 %v978_v28, %v3299_v22 }
 0x18f   :  { %v2235_v60 = vmul.f32 -1.442695, %v1004_v12 }
 0x190   :  { %v2273_v20 = vpop.eup %2272 }
 0x191   :  { %v2275_v27 = vpop.eup %2274  ;;  %v1008_v10 = vadd.f32 1.0, %v2273_v20  ;;  %2276 = vpow2.f32 %v2235_v60 }
 0x192   :  { %v1027_v11 = vadd.f32 1.0, %v2275_v27 }
 0x193   :  { %2278 = vrcp.f32 %v1008_v10  ;;  %v1020_v15 = vand.u32 2147483648, %v1008_v10  ;;  %v1018_v7 = vand.u32 2147483647, %v1008_v10  ;;  %vm1014_vm2 = vweird.f32 %v1008_v10 }
 0x194   :  { %2280 = vrcp.f32 %v1027_v11  ;;  %v1039_v37 = vand.u32 2147483648, %v1027_v11  ;;  %v1037_v36 = vand.u32 2147483647, %v1027_v11  ;;  %vm1033_vm3 = vweird.f32 %v1027_v11 }
 0x195   :  { %v1021_v22 = vor.u32 1.1754944e-38, %v1020_v15  ;;  %vm1019_vm5 = vcmp.eq.f32.partialorder %v1018_v7, 8.507059e+37 }
 0x196   :  { %v1040_v27 = vor.u32 1.1754944e-38, %v1039_v37  ;;  %vm1038_vm7 = vcmp.eq.f32.partialorder %v1037_v36, 8.507059e+37  ;;  %v3352_v36 = vld [vmem:[#allocation8 + $0x1f8] sm:$0xff] }
 0x197   :  { %v2277_v25 = vpop.eup %2276 }
 0x198   :  { %v1047_v21 = vadd.f32 1.0, %v2277_v25 }
 0x199   :  { %v2279_v13 = vpop.eup %2278 }
 0x19a   :  { %v2281_v23 = vpop.eup %2280  ;;  %v1010_v4 = vmul.f32 %v2279_v13, %v1008_v10  ;;  %2282 = vrcp.f32 %v1047_v21  ;;  %vm1015_vm0 = vweird.f32 %v2279_v13  ;;  %vm1053_vm9 = vweird.f32 %v1047_v21 }
 0x19b   :  { %v1029_v47 = vmul.f32 %v2281_v23, %v1027_v11  ;;  %2284 = vtanh.f32 %v1003_v3  ;;  %vm1034_vm1 = vweird.f32 %v2281_v23  ;;  %vm1016_vm4 = vmor %vm1014_vm2, %vm1015_vm0  ;;  %v1059_v11 = vand.u32 2147483648, %v1047_v21 }
 0x19c   :  { %v1011_v5 = vsub.f32 1.0, %v1010_v4  ;;  %vm1035_vm6 = vmor %vm1033_vm3, %vm1034_vm1 }
 0x19d   :  { %v1030_v63 = vsub.f32 1.0, %v1029_v47  ;;  %v1060_v37 = vor.u32 1.1754944e-38, %v1059_v11  ;;  %v3399_v11 = vld [vmem:[#allocation8 + $0x140] sm:$0xff] }
 0x19e   :  { %v1012_v14 = vmul.f32 %v2279_v13, %v1011_v5 }
 0x19f   :  { %v1031_v52 = vmul.f32 %v2281_v23, %v1030_v63 }
 0x1a0   :  { %v2283_v18 = vpop.eup %2282  ;;  %v1013_v12 = vadd.f32 %v2279_v13, %v1012_v14 }
 0x1a1   :  { %v1032_v60 = vadd.f32 %v2281_v23, %v1031_v52  ;;  %v1049_v20 = vmul.f32 %v2283_v18, %v1047_v21  ;;  %v2285_v25 = vpop.eup %2284  ;;  %vm1054_vm8 = vweird.f32 %v2283_v18 }
 0x1a2   :  { %v1017_v28 = vsel %vm1016_vm4, %v2279_v13, %v1013_v12  ;;  %v1057_v13 = vand.u32 2147483647, %v1047_v21  ;;  %vm1055_vm10 = vmor %vm1053_vm9, %vm1054_vm8  ;;  %v3349_v21 = vld [vmem:[#allocation8 + $0x1f0] sm:$0xff]  ;;  %v3358_v12 = vld [vmem:[#allocation8 + $0x1c8] sm:$0xff] }
 0x1a3   :  { %v1022_v3 = vsel %vm1019_vm5, %v1021_v22, %v1017_v28  ;;  %v1036_v4 = vsel %vm1035_vm6, %v2281_v23, %v1032_v60  ;;  %v1050_v47 = vsub.f32 1.0, %v1049_v20  ;;  %v3361_v22 = vld [vmem:[#allocation8 + $0x1d0] sm:$0xff]  ;;  %v3364_v60 = vld [vmem:[#allocation8 + $0x1d8] sm:$0xff]  ;;  %v3367_v20 = vld [vmem:[#allocation8 + $0x1a0] sm:$0xff] }
 0x1a4   :  { %v1041_v5 = vsel %vm1038_vm7, %v1040_v27, %v1036_v4  ;;  %v1064_v63 = vmul.f32 %v2285_v25, %v1022_v3  ;;  %vm1058_vm11 = vcmp.eq.f32.partialorder %v1057_v13, 8.507059e+37  ;;  %v3370_v27 = vld [vmem:[#allocation8 + $0x1a8] sm:$0xff]  ;;  %v3373_v28 = vld [vmem:[#allocation8 + $0x1b0] sm:$0xff]  ;;  %v3376_v25 = vld [vmem:[#allocation8 + $0x1b8] sm:$0xff] }
 0x1a5   :  { %v1063_v24 = vmul.f32 0.0, %v1041_v5  ;;  %v1051_v19 = vmul.f32 %v2283_v18, %v1050_v47  ;;  %v3379_v3 = vld [vmem:[#allocation8 + $0x180] sm:$0xff]  ;;  %v3382_v4 = vld [vmem:[#allocation8 + $0x188] sm:$0xff]  ;;  %v3386_v47 = vld [vmem:[#allocation8 + $0x198] sm:$0xff] }
 0x1a6   :  { %v3389_v5 = vld [vmem:[#allocation8 + $0x160] sm:$0xff]  ;;  %v3406_v13 = vld [vmem:[#allocation8 + $0x158] sm:$0xff] }
 0x1a7   :  { %v3340_v14 = vadd.f32 %v1064_v63, %v1063_v24  ;;  %v1052_v10 = vadd.f32 %v2283_v18, %v1051_v19  ;;  %v3343_v24 = vld [vmem:[#allocation8 + $0x1e0] sm:$0xff]  ;;  %v3346_v19 = vld [vmem:[#allocation8 + $0x1e8] sm:$0xff] }
 0x1a8   :  { %v3392_v63 = vld [vmem:[#allocation8 + $0x168] sm:$0xff] }
 0x1a9   :  { %2286 = vtanh.f32 %v3340_v14  ;;  %v1056_v15 = vsel %vm1055_vm10, %v2283_v18, %v1052_v10  ;;  %v3355_v18 = vld [vmem:[#allocation8 + $0x1c0] sm:$0xff]  ;;  %v3396_v10 = vld [vmem:[#allocation8 + $0x178] sm:$0xff] }
 0x1aa   :  { %v1061_v7 = vsel %vm1058_vm11, %v1060_v37, %v1056_v15  ;;  %v3409_v15 = vld [vmem:[#allocation8 + $0x120] sm:$0xff]  ;;  %v3416_v37 = vld [vmem:[#allocation8 + $0x138] sm:$0xff] }
 0x1af   :  { %v2287_v23 = vpop.eup %2286 }
 0x1b0   :  { %v1067_v52 = vmul.f32 %v2287_v23, %v1061_v7  ;;  %v3419_v23 = vld [vmem:[#allocation8 + $0x100] sm:$0xff]  ;;  %v3426_v7 = vld [vmem:[#allocation8 + $0x118] sm:$0xff] }
 0x1b2   :  { %1091 = vmatmul.f32.vlgmr.msra.gmra.mxu0 %v1067_v52  ;;  %1111 = vmatmul.f32.vlgmr.msra.gmra.mxu1 %v1067_v52 }
 0x1b3   :  { %1131 = vmatmul.f32.vlgmr.msra.gmra.mxu2 %v1067_v52  ;;  %1151 = vmatmul.f32.vlgmr.msra.gmra.mxu3 %v1067_v52  ;;  %v3429_v52 = vld [vmem:[#allocation8 + $0xe0] sm:$0xff] }
 0x1b4   :  { %1383 = vmatpush.msra.mxu0 %v3343_v24  ;;  %1403 = vmatpush.msra.mxu1 %v3346_v19 }
 0x1b5   :  { %1423 = vmatpush.msra.mxu2 %v3349_v21  ;;  %1443 = vmatpush.msra.mxu3 %v3352_v36 }
 0x1b6   :  { %1384 = vmatpush.msra.mxu0 %v3355_v18  ;;  %1404 = vmatpush.msra.mxu1 %v3358_v12 }
 0x1b7   :  { %1424 = vmatpush.msra.mxu2 %v3361_v22  ;;  %1444 = vmatpush.msra.mxu3 %v3364_v60 }
 0x1b8   :  { %1385 = vmatpush.msra.mxu0 %v3367_v20  ;;  %1405 = vmatpush.msra.mxu1 %v3370_v27 }
 0x1b9   :  { %1425 = vmatpush.msra.mxu2 %v3373_v28  ;;  %1445 = vmatpush.msra.mxu3 %v3376_v25 }
 0x1ba   :  { %1386 = vmatpush.msra.mxu0 %v3379_v3  ;;  %1406 = vmatpush.msra.mxu1 %v3382_v4 }
 0x1bb   :  { %1426 = vmatpush.msra.mxu2 %v2898_v41  ;;  %1446 = vmatpush.msra.mxu3 %v3386_v47  ;;  %v3402_v41 = vld [vmem:[#allocation8 + $0x148] sm:$0xff] }
 0x1bc   :  { %1387 = vmatpush.msra.mxu0 %v3389_v5  ;;  %1407 = vmatpush.msra.mxu1 %v3392_v63 }
 0x1bd   :  { %1427 = vmatpush.msra.mxu2 %v2912_v49  ;;  %1447 = vmatpush.msra.mxu3 %v3396_v10  ;;  %v3412_v49 = vld [vmem:[#allocation8 + $0x128] sm:$0xff] }
 0x1be   :  { %1388 = vmatpush.msra.mxu0 %v3399_v11  ;;  %1408 = vmatpush.msra.mxu1 %v3402_v41 }
 0x1bf   :  { %1428 = vmatpush.msra.mxu2 %v2935_v59  ;;  %1448 = vmatpush.msra.mxu3 %v3406_v13  ;;  %v3422_v59 = vld [vmem:[#allocation8 + $0x108] sm:$0xff] }
 0x1c0   :  { %1389 = vmatpush.msra.mxu0 %v3409_v15  ;;  %1409 = vmatpush.msra.mxu1 %v3412_v49 }
 0x1c1   :  { %1429 = vmatpush.msra.mxu2 %v2948_v56  ;;  %1449 = vmatpush.msra.mxu3 %v3416_v37  ;;  %v3432_v56 = vld [vmem:[#allocation8 + $0xe8] sm:$0xff] }
 0x1c2   :  { %1390 = vmatpush.msra.mxu0 %v3419_v23  ;;  %1410 = vmatpush.msra.mxu1 %v3422_v59 }
 0x1c3   :  { %1430 = vmatpush.msra.mxu2 %v2971_v1  ;;  %1450 = vmatpush.msra.mxu3 %v3426_v7  ;;  %v4052_v1 = vld [vmem:[#allocation53_spill] sm:$0xff] }
 0x1c4   :  { %1391 = vmatpush.msra.mxu0 %v3429_v52  ;;  %1411 = vmatpush.msra.mxu1 %v3432_v56 }
 0x1c5   :  { %1431 = vmatpush.msra.mxu2 %v2984_v16  ;;  %1451 = vmatpush.msra.mxu3 %v2946_v44 }
 0x1c6   :  { %1392 = vmatpush.msra.mxu0 %v2937_v39  ;;  %1412 = vmatpush.msra.mxu1 %v3994_v51  ;;  %v4054_v39 = vld [vmem:[#allocation21_spill] sm:$0xff] }
 0x1c7   :  { %1432 = vmatpush.msra.mxu2 %v2998_v30  ;;  %1452 = vmatpush.msra.mxu3 %v4017_v29 }
 0x1c8   :  { %1393 = vmatpush.msra.mxu0 %v4018_v33  ;;  %1413 = vmatpush.msra.mxu1 %v4020_v42 }
 0x1c9   :  { %1433 = vmatpush.msra.mxu2 %v4021_v43  ;;  %1453 = vmatpush.msra.mxu3 %v4022_v48 }
 0x1ca   :  { %1394 = vmatpush.msra.mxu0 %v4023_v50  ;;  %1414 = vmatpush.msra.mxu1 %v4024_v54  ;;  %v4058_v54 = vld [vmem:[#allocation38_spill] sm:$0xff] }
 0x1cb   :  { %1434 = vmatpush.msra.mxu2 %v4025_v55  ;;  %1454 = vmatpush.msra.mxu3 %v4026_v57 }
 0x1cc   :  { %1395 = vmatpush.msra.mxu0 %v4003_v17  ;;  %1415 = vmatpush.msra.mxu1 %v4005_v35 }
 0x1cd   :  { %1435 = vmatpush.msra.mxu2 %v4028_v38  ;;  %1455 = vmatpush.msra.mxu3 %v4006_v62  ;;  %v4057_v62 = vld [vmem:[#allocation28_spill] sm:$0xff] }
 0x1ce   :  { %1396 = vmatpush.msra.mxu0 %v4007_v34  ;;  %1416 = vmatpush.msra.mxu1 %v4008_v2  ;;  %v4053_v2 = vld [vmem:[#allocation18_spill] sm:$0xff] }
 0x1cf   :  { %1436 = vmatpush.msra.mxu2 %v3039_v45  ;;  %1456 = vmatpush.msra.mxu3 %v3035_v0  ;;  %v347_v44 = vadd.f32 %v4054_v39, %v4053_v2  ;;  %v4055_v0 = vld [vmem:[#allocation22_spill] sm:$0xff] }
 0x1d0   :  { %1397 = vmatpush.msra.mxu0 %v3027_v40  ;;  %1417 = vmatpush.msra.mxu1 %v4011_v53  ;;  %v4056_v40 = vld [vmem:[#allocation27_spill] sm:$0xff] }
 0x1d1   :  { %1437 = vmatpush.msra.mxu2 %v3060_v46  ;;  %1457 = vmatpush.msra.mxu3 %v3057_v31  ;;  %v388_v16 = vadd.f32 %v4055_v0, %v347_v44 }
 0x1d2   :  { %1398 = vmatpush.msra.mxu0 %v3051_v58  ;;  %1418 = vmatpush.msra.mxu1 %v4012_v26 }
 0x1d3   :  { %1438 = vmatpush.msra.mxu2 %v3069_v32  ;;  %1458 = vmatpush.msra.mxu3 %v4052_v1  ;;  %v429_v17 = vadd.f32 %v4056_v40, %v388_v16 }
 0x22f   :  { %v1092_v30 = vpop.f32.mrf.mxu0  ;;  %v1112_v45 = vpop.f32.mrf.mxu1 }
 0x230   :  { %v1155_v46 = vadd.f32 %v1092_v30, %v429_v17  ;;  %v1156_v31 = vadd.f32 %v1112_v45, %v4057_v62 }
 0x232   :  { %v2236_v51 = vmul.f32 -1.442695, %v1155_v46  ;;  %v2237_v58 = vmul.f32 -1.442695, %v1156_v31 }
 0x234   :  { %2288 = vpow2.f32 %v2236_v51 }
 0x235   :  { %2290 = vpow2.f32 %v2237_v58 }
 0x236   :  { %v1152_v35 = vpop.f32.mrf.mxu3  ;;  %v1132_v42 = vpop.f32.mrf.mxu2 }
 0x237   :  { %v1158_v32 = vadd.f32 %v1152_v35, %v3310_v9  ;;  %v1157_v55 = vadd.f32 %v1132_v42, %v4058_v54 }
 0x239   :  { %v2238_v34 = vmul.f32 -1.442695, %v1158_v32 }
 0x23a   :  { %v2289_v53 = vpop.eup %2288 }
 0x23b   :  { %v2291_v26 = vpop.eup %2290  ;;  %v1162_v29 = vadd.f32 1.0, %v2289_v53  ;;  %2292 = vpow2.f32 %v2238_v34 }
 0x23c   :  { %v1181_v33 = vadd.f32 1.0, %v2291_v26 }
 0x23d   :  { %2294 = vrcp.f32 %v1162_v29  ;;  %v1174_v44 = vand.u32 2147483648, %v1162_v29  ;;  %v1172_v40 = vand.u32 2147483647, %v1162_v29  ;;  %vm1168_vm14 = vweird.f32 %v1162_v29 }
 0x23e   :  { %2296 = vrcp.f32 %v1181_v33  ;;  %v1193_v0 = vand.u32 2147483648, %v1181_v33  ;;  %v1191_v30 = vand.u32 2147483647, %v1181_v33  ;;  %vm1187_vm15 = vweird.f32 %v1181_v33 }
 0x23f   :  { %v1175_v62 = vor.u32 1.1754944e-38, %v1174_v44  ;;  %vm1173_vm2 = vcmp.eq.f32.partialorder %v1172_v40, 8.507059e+37  ;;  %v3514_v40 = vld [vmem:[#allocation8 + $0x110] sm:$0xff] }
 0x240   :  { %v1194_v58 = vor.u32 1.1754944e-38, %v1193_v0  ;;  %vm1192_vm3 = vcmp.eq.f32.partialorder %v1191_v30, 8.507059e+37  ;;  %v3502_v0 = vld [vmem:[#allocation8 + $0x150] sm:$0xff]  ;;  %v3523_v30 = vld [vmem:[#allocation8 + $0xf8] sm:$0xff] }
 0x241   :  { %v2293_v43 = vpop.eup %2292 }
 0x242   :  { %v1201_v48 = vadd.f32 1.0, %v2293_v43 }
 0x243   :  { %v2295_v50 = vpop.eup %2294 }
 0x244   :  { %v2297_v57 = vpop.eup %2296  ;;  %v1164_v38 = vmul.f32 %v2295_v50, %v1162_v29  ;;  %2298 = vrcp.f32 %v1201_v48  ;;  %vm1169_vm12 = vweird.f32 %v2295_v50  ;;  %vm1207_vm5 = vweird.f32 %v1201_v48 }
 0x245   :  { %v1183_v1 = vmul.f32 %v2297_v57, %v1181_v33  ;;  %2300 = vtanh.f32 %v1157_v55  ;;  %vm1188_vm13 = vweird.f32 %v2297_v57  ;;  %vm1170_vm0 = vmor %vm1168_vm14, %vm1169_vm12 }
 0x246   :  { %v1165_v39 = vsub.f32 1.0, %v1164_v38  ;;  %vm1189_vm1 = vmor %vm1187_vm15, %vm1188_vm13  ;;  %v1213_v38 = vand.u32 2147483648, %v1201_v48 }
 0x247   :  { %v1184_v9 = vsub.f32 1.0, %v1183_v1 }
 0x248   :  { %v1166_v16 = vmul.f32 %v2295_v50, %v1165_v39  ;;  %v1214_v39 = vor.u32 1.1754944e-38, %v1213_v38  ;;  %v3574_v38 = vld [vmem:[#allocation8 + $0x40] sm:$0xff] }
 0x249   :  { %v1185_v17 = vmul.f32 %v2297_v57, %v1184_v9  ;;  %4073 = vst [vmem:[#allocation68_spill] sm:$0xff] %v3574_v38 }
 0x24a   :  { %v2299_v45 = vpop.eup %2298  ;;  %v1167_v46 = vadd.f32 %v2295_v50, %v1166_v16  ;;  %v3508_v16 = vld [vmem:[#allocation8 + $0x130] sm:$0xff] }
 0x24b   :  { %v1186_v31 = vadd.f32 %v2297_v57, %v1185_v17  ;;  %v1203_v51 = vmul.f32 %v2299_v45, %v1201_v48  ;;  %v2301_v32 = vpop.eup %2300  ;;  %vm1208_vm4 = vweird.f32 %v2299_v45  ;;  %v3520_v17 = vld [vmem:[#allocation8 + $0xf0] sm:$0xff] }
 0x24c   :  { %v1171_v35 = vsel %vm1170_vm0, %v2295_v50, %v1167_v46  ;;  %v1211_v50 = vand.u32 2147483647, %v1201_v48  ;;  %vm1209_vm6 = vmor %vm1207_vm5, %vm1208_vm4  ;;  %v3496_v48 = vld [vmem:[#allocation8 + $0x170] sm:$0xff]  ;;  %v3529_v46 = vld [vmem:[#allocation8 + $0xc8] sm:$0xff] }
 0x24d   :  { %v1176_v34 = vsel %vm1173_vm2, %v1175_v62, %v1171_v35  ;;  %v1190_v53 = vsel %vm1189_vm1, %v2297_v57, %v1186_v31  ;;  %v1204_v26 = vsub.f32 1.0, %v1203_v51  ;;  %v3532_v62 = vld [vmem:[#allocation8 + $0xd0] sm:$0xff]  ;;  %v3535_v31 = vld [vmem:[#allocation8 + $0xd8] sm:$0xff]  ;;  %v3538_v51 = vld [vmem:[#allocation8 + $0xa0] sm:$0xff] }
 0x24e   :  { %v1195_v42 = vsel %vm1192_vm3, %v1194_v58, %v1190_v53  ;;  %v1218_v43 = vmul.f32 %v2301_v32, %v1176_v34  ;;  %vm1212_vm7 = vcmp.eq.f32.partialorder %v1211_v50, 8.507059e+37  ;;  %4059 = vst [vmem:[#allocation62_spill] sm:$0xff] %v3532_v62  ;;  %v3541_v58 = vld [vmem:[#allocation8 + $0xa8] sm:$0xff]  ;;  %v3544_v35 = vld [vmem:[#allocation8 + $0xb0] sm:$0xff]  ;;  %v3547_v32 = vld [vmem:[#allocation8 + $0xb8] sm:$0xff] }
 0x24f   :  { %v1217_v54 = vmul.f32 %v1195_v42, %v3340_v14  ;;  %v1205_v55 = vmul.f32 %v2299_v45, %v1204_v26  ;;  %v3490_v14 = vld [vmem:[#allocation8 + $0x190] sm:$0xff]  ;;  %4060 = vst [vmem:[#allocation65_spill] sm:$0xff] %v3535_v31  ;;  %v3550_v34 = vld [vmem:[#allocation8 + $0x80] sm:$0xff]  ;;  %v3553_v53 = vld [vmem:[#allocation8 + $0x88] sm:$0xff] }
 0x250   :  { %4061 = vst [vmem:[#allocation34_spill] sm:$0xff] %v3538_v51  ;;  %v3556_v26 = vld [vmem:[#allocation8 + $0x90] sm:$0xff]  ;;  %v3559_v42 = vld [vmem:[#allocation8 + $0x98] sm:$0xff]  ;;  %v3577_v50 = vld [vmem:[#allocation8 + $0x48] sm:$0xff] }
 0x251   :  { %v3473_v29 = vadd.f32 %v1218_v43, %v1217_v54  ;;  %v1206_v33 = vadd.f32 %v2299_v45, %v1205_v55  ;;  %4062 = vst [vmem:[#allocation17_spill] sm:$0xff] %v3541_v58  ;;  %v3562_v43 = vld [vmem:[#allocation8 + $0x60] sm:$0xff]  ;;  %v3565_v54 = vld [vmem:[#allocation8 + $0x68] sm:$0xff]  ;;  %v3568_v55 = vld [vmem:[#allocation8 + $0x70] sm:$0xff] }
 0x252   :  { %4063 = vst [vmem:[#allocation20_spill] sm:$0xff] %v3544_v35 }
 0x253   :  { %2302 = vtanh.f32 %v3473_v29  ;;  %v1210_v1 = vsel %vm1209_vm6, %v2299_v45, %v1206_v33  ;;  %v3526_v45 = vld [vmem:[#allocation8 + $0xc0] sm:$0xff]  ;;  %4064 = vst [vmem:[#allocation23_spill] sm:$0xff] %v3547_v32  ;;  %v3571_v33 = vld [vmem:[#allocation8 + $0x78] sm:$0xff] }
 0x254   :  { %v1215_v9 = vsel %vm1212_vm7, %v1214_v39, %v1210_v1  ;;  %4065 = vst [vmem:[#allocation53_spill] sm:$0xff] %v3550_v34  ;;  %v3580_v1 = vld [vmem:[#allocation8 + $0x50] sm:$0xff]  ;;  %v3583_v39 = vld [vmem:[#allocation8 + $0x58] sm:$0xff] }
 0x255   :  { %4066 = vst [vmem:[#allocation21_spill] sm:$0xff] %v3553_v53 }
 0x256   :  { %4067 = vst [vmem:[#allocation22_spill] sm:$0xff] %v3556_v26 }
 0x257   :  { %4068 = vst [vmem:[#allocation27_spill] sm:$0xff] %v3559_v42 }
 0x258   :  { %4069 = vst [vmem:[#allocation28_spill] sm:$0xff] %v3562_v43 }
 0x259   :  { %v2303_v57 = vpop.eup %2302  ;;  %4070 = vst [vmem:[#allocation38_spill] sm:$0xff] %v3565_v54 }
 0x25a   :  { %v1221_v44 = vmul.f32 %v2303_v57, %v1215_v9  ;;  %4071 = vst [vmem:[#allocation66_spill] sm:$0xff] %v3568_v55  ;;  %v3586_v57 = vld [vmem:[#allocation8 + $0x20] sm:$0xff]  ;;  %v3589_v9 = vld [vmem:[#allocation8 + $0x28] sm:$0xff] }
 0x25b   :  { %4072 = vst [vmem:[#allocation67_spill] sm:$0xff] %v3571_v33 }
 0x25c   :  { %1245 = vmatmul.f32.vlgmr.msrb.gmra.mxu0 %v1221_v44  ;;  %1265 = vmatmul.f32.vlgmr.msrb.gmra.mxu1 %v1221_v44  ;;  %4074 = vst [vmem:[#allocation69_spill] sm:$0xff] %v3577_v50 }
 0x25d   :  { %1285 = vmatmul.f32.vlgmr.msrb.gmra.mxu2 %v1221_v44  ;;  %1305 = vmatmul.f32.vlgmr.msrb.gmra.mxu3 %v1221_v44  ;;  %4075 = vst [vmem:[#allocation70_spill] sm:$0xff] %v3580_v1  ;;  %v3592_v44 = vld [vmem:[#allocation8 + $0x30] sm:$0xff] }
 0x25e   :  { %1537 = vmatpush.msrb.mxu0 %v3343_v24  ;;  %1557 = vmatpush.msrb.mxu1 %v3346_v19  ;;  %4076 = vst [vmem:[#allocation71_spill] sm:$0xff] %v3583_v39 }
 0x25f   :  { %1577 = vmatpush.msrb.mxu2 %v3349_v21  ;;  %1597 = vmatpush.msrb.mxu3 %v3352_v36  ;;  %4077 = vst [vmem:[#allocation72_spill] sm:$0xff] %v3586_v57 }
 0x260   :  { %1538 = vmatpush.msrb.mxu0 %v3355_v18  ;;  %1558 = vmatpush.msrb.mxu1 %v3358_v12  ;;  %4078 = vst [vmem:[#allocation73_spill] sm:$0xff] %v3589_v9 }
 0x261   :  { %1578 = vmatpush.msrb.mxu2 %v3361_v22  ;;  %1598 = vmatpush.msrb.mxu3 %v3364_v60  ;;  %4079 = vst [vmem:[#allocation74_spill] sm:$0xff] %v3592_v44 }
 0x262   :  { %1539 = vmatpush.msrb.mxu0 %v3367_v20  ;;  %1559 = vmatpush.msrb.mxu1 %v3370_v27 }
 0x263   :  { %1579 = vmatpush.msrb.mxu2 %v3373_v28  ;;  %1599 = vmatpush.msrb.mxu3 %v3376_v25 }
 0x264   :  { %1540 = vmatpush.msrb.mxu0 %v3379_v3  ;;  %1560 = vmatpush.msrb.mxu1 %v3382_v4 }
 0x265   :  { %1580 = vmatpush.msrb.mxu2 %v3490_v14  ;;  %1600 = vmatpush.msrb.mxu3 %v3386_v47 }
 0x266   :  { %1541 = vmatpush.msrb.mxu0 %v3389_v5  ;;  %1561 = vmatpush.msrb.mxu1 %v3392_v63 }
 0x267   :  { %1581 = vmatpush.msrb.mxu2 %v3496_v48  ;;  %1601 = vmatpush.msrb.mxu3 %v3396_v10 }
 0x268   :  { %1542 = vmatpush.msrb.mxu0 %v3399_v11  ;;  %1562 = vmatpush.msrb.mxu1 %v3402_v41 }
 0x269   :  { %1582 = vmatpush.msrb.mxu2 %v3502_v0  ;;  %1602 = vmatpush.msrb.mxu3 %v3406_v13 }
 0x26a   :  { %1543 = vmatpush.msrb.mxu0 %v3409_v15  ;;  %1563 = vmatpush.msrb.mxu1 %v3412_v49 }
 0x26b   :  { %1583 = vmatpush.msrb.mxu2 %v3508_v16  ;;  %1603 = vmatpush.msrb.mxu3 %v3416_v37 }
 0x26c   :  { %1544 = vmatpush.msrb.mxu0 %v3419_v23  ;;  %1564 = vmatpush.msrb.mxu1 %v3422_v59 }
 0x26d   :  { %1584 = vmatpush.msrb.mxu2 %v3514_v40  ;;  %1604 = vmatpush.msrb.mxu3 %v3426_v7 }
 0x26e   :  { %1545 = vmatpush.msrb.mxu0 %v3429_v52  ;;  %1565 = vmatpush.msrb.mxu1 %v3432_v56 }
 0x26f   :  { %1585 = vmatpush.msrb.mxu2 %v3520_v17  ;;  %1605 = vmatpush.msrb.mxu3 %v3523_v30 }
 0x270   :  { %1546 = vmatpush.msrb.mxu0 %v3526_v45  ;;  %1566 = vmatpush.msrb.mxu1 %v3529_v46 }
 0x271   :  { %1586 = vmatpush.msrb.mxu2 %v3532_v62  ;;  %1606 = vmatpush.msrb.mxu3 %v3535_v31 }
 0x272   :  { %1547 = vmatpush.msrb.mxu0 %v3538_v51  ;;  %1567 = vmatpush.msrb.mxu1 %v3541_v58 }
 0x273   :  { %1587 = vmatpush.msrb.mxu2 %v3544_v35  ;;  %1607 = vmatpush.msrb.mxu3 %v3547_v32 }
 0x274   :  { %1548 = vmatpush.msrb.mxu0 %v3550_v34  ;;  %1568 = vmatpush.msrb.mxu1 %v3553_v53 }
 0x275   :  { %1588 = vmatpush.msrb.mxu2 %v3556_v26  ;;  %1608 = vmatpush.msrb.mxu3 %v3559_v42  ;;  %v4089_v26 = vld [vmem:[#allocation24_spill] sm:$0xff] }
 0x276   :  { %1549 = vmatpush.msrb.mxu0 %v3562_v43  ;;  %1569 = vmatpush.msrb.mxu1 %v3565_v54  ;;  %v4088_v54 = vld [vmem:[#allocation35_spill] sm:$0xff] }
 0x277   :  { %1589 = vmatpush.msrb.mxu2 %v3568_v55  ;;  %1609 = vmatpush.msrb.mxu3 %v3571_v33 }
 0x278   :  { %1550 = vmatpush.msrb.mxu0 %v3574_v38  ;;  %1570 = vmatpush.msrb.mxu1 %v3577_v50  ;;  %v4087_v50 = vld [vmem:[#allocation37_spill] sm:$0xff] }
 0x279   :  { %1590 = vmatpush.msrb.mxu2 %v3580_v1  ;;  %1610 = vmatpush.msrb.mxu3 %v3583_v39 }
 0x27a   :  { %1551 = vmatpush.msrb.mxu0 %v3586_v57  ;;  %1571 = vmatpush.msrb.mxu1 %v3589_v9  ;;  %v3604_v57 = vld [vmem:[#allocation8 + $0x10] sm:$0xff]  ;;  %v3607_v9 = vld [vmem:[#allocation8 + $0x18] sm:$0xff] }
 0x27b   :  { %1591 = vmatpush.msrb.mxu2 %v3592_v44  ;;  %1611 = vmatpush.msrb.mxu3 %v3595_v6  ;;  %4083 = vst [vmem:[#allocation78_spill] sm:$0xff] %v3604_v57  ;;  %v4085_v44 = vld [vmem:[#allocation29_spill] sm:$0xff]  ;;  %v4086_v6 = vld [vmem:[#allocation30_spill] sm:$0xff] }
 0x27c   :  { %1552 = vmatpush.msrb.mxu0 %v3598_v8  ;;  %1572 = vmatpush.msrb.mxu1 %v3601_v61  ;;  %4084 = vst [vmem:[#allocation79_spill] sm:$0xff] %v3607_v9  ;;  %v350_v39 = vadd.f32 %v4085_v44, %v4053_v2 }
 0x27d   :  { %1592 = vmatpush.msrb.mxu2 %v3604_v57  ;;  %1612 = vmatpush.msrb.mxu3 %v3607_v9 }
 0x27e   :  { %v391_v1 = vadd.f32 %v4086_v6, %v350_v39 }
 0x280   :  { %v432_v38 = vadd.f32 %v4087_v50, %v391_v1 }
 0x2d9   :  { %v1246_v8 = vpop.f32.mrf.mxu0  ;;  %v1266_v33 = vpop.f32.mrf.mxu1 }
 0x2da   :  { %v1309_v55 = vadd.f32 %v1246_v8, %v432_v38  ;;  %v1310_v61 = vadd.f32 %v1266_v33, %v4088_v54  ;;  %v4090_v54 = vld [vmem:[#allocation49_spill] sm:$0xff] }
 0x2dc   :  { %v2239_v43 = vmul.f32 -1.442695, %v1309_v55  ;;  %v2240_v42 = vmul.f32 -1.442695, %v1310_v61 }
 0x2de   :  { %2304 = vpow2.f32 %v2239_v43 }
 0x2df   :  { %2306 = vpow2.f32 %v2240_v42 }
 0x2e0   :  { %v1306_v57 = vpop.f32.mrf.mxu3  ;;  %v1286_v50 = vpop.f32.mrf.mxu2 }
 0x2e1   :  { %v1312_v53 = vadd.f32 %v1306_v57, %v4089_v26  ;;  %v1311_v55 = vadd.f32 %v1286_v50, %v4090_v54 }
 0x2e3   :  { %v2241_v9 = vmul.f32 -1.442695, %v1312_v53 }
 0x2e4   :  { %v2305_v34 = vpop.eup %2304 }
 0x2e5   :  { %v2307_v32 = vpop.eup %2306  ;;  %v1316_v44 = vadd.f32 1.0, %v2305_v34  ;;  %2308 = vpow2.f32 %v2241_v9 }
 0x2e6   :  { %v1335_v6 = vadd.f32 1.0, %v2307_v32 }
 0x2e7   :  { %2310 = vrcp.f32 %v1316_v44  ;;  %v1328_v53 = vand.u32 2147483648, %v1316_v44  ;;  %v1326_v32 = vand.u32 2147483647, %v1316_v44  ;;  %vm1322_vm10 = vweird.f32 %v1316_v44 }
 0x2e8   :  { %2312 = vrcp.f32 %v1335_v6  ;;  %v1347_v39 = vand.u32 2147483648, %v1335_v6  ;;  %v1345_v9 = vand.u32 2147483647, %v1335_v6  ;;  %vm1341_vm11 = vweird.f32 %v1335_v6 }
 0x2e9   :  { %v1329_v50 = vor.u32 1.1754944e-38, %v1328_v53  ;;  %vm1327_vm14 = vcmp.eq.f32.partialorder %v1326_v32, 8.507059e+37 }
 0x2ea   :  { %vm1346_vm15 = vcmp.eq.f32.partialorder %v1345_v9, 8.507059e+37  ;;  %v4098_v9 = vld [vmem:[#allocation21_spill] sm:$0xff] }
 0x2eb   :  { %v2309_v1 = vpop.eup %2308 }
 0x2ec   :  { %v1355_v8 = vadd.f32 1.0, %v2309_v1 }
 0x2ed   :  { %v2311_v38 = vpop.eup %2310 }
 0x2ee   :  { %v2313_v61 = vpop.eup %2312  ;;  %v1318_v43 = vmul.f32 %v2311_v38, %v1316_v44  ;;  %2314 = vrcp.f32 %v1355_v8  ;;  %vm1323_vm8 = vweird.f32 %v2311_v38  ;;  %v1367_v53 = vand.u32 2147483648, %v1355_v8 }
 0x2ef   :  { %v1337_v42 = vmul.f32 %v2313_v61, %v1335_v6  ;;  %2316 = vtanh.f32 %v1311_v55  ;;  %vm1342_vm9 = vweird.f32 %v2313_v61  ;;  %vm1324_vm12 = vmor %vm1322_vm10, %vm1323_vm8  ;;  %vm1361_vm1 = vweird.f32 %v1355_v8 }
 0x2f0   :  { %v1319_v33 = vsub.f32 1.0, %v1318_v43  ;;  %vm1343_vm13 = vmor %vm1341_vm11, %vm1342_vm9  ;;  %v1348_v43 = vor.u32 1.1754944e-38, %v1347_v39  ;;  %v1368_v32 = vor.u32 1.1754944e-38, %v1367_v53  ;;  %v4109_v53 = vld [vmem:[#allocation72_spill] sm:$0xff] }
 0x2f1   :  { %v1338_v26 = vsub.f32 1.0, %v1337_v42 }
 0x2f2   :  { %v1320_v34 = vmul.f32 %v2311_v38, %v1319_v33 }
 0x2f3   :  { %v1339_v57 = vmul.f32 %v2313_v61, %v1338_v26 }
 0x2f4   :  { %v2315_v2 = vpop.eup %2314  ;;  %v1321_v1 = vadd.f32 %v2311_v38, %v1320_v34 }
 0x2f5   :  { %v1340_v54 = vadd.f32 %v2313_v61, %v1339_v57  ;;  %v1357_v35 = vmul.f32 %v2315_v2, %v1355_v8  ;;  %v2317_v55 = vpop.eup %2316  ;;  %vm1362_vm0 = vweird.f32 %v2315_v2 }
 0x2f6   :  { %v1325_v42 = vsel %vm1324_vm12, %v2311_v38, %v1321_v1  ;;  %v1365_v38 = vand.u32 2147483647, %v1355_v8  ;;  %vm1363_vm2 = vmor %vm1361_vm1, %vm1362_vm0  ;;  %v4097_v8 = vld [vmem:[#allocation53_spill] sm:$0xff]  ;;  %v4099_v1 = vld [vmem:[#allocation22_spill] sm:$0xff] }
 0x2f7   :  { %v1330_v58 = vsel %vm1327_vm14, %v1329_v50, %v1325_v42  ;;  %v1344_v33 = vsel %vm1343_vm13, %v2313_v61, %v1340_v54  ;;  %v1358_v51 = vsub.f32 1.0, %v1357_v35  ;;  %v4100_v50 = vld [vmem:[#allocation27_spill] sm:$0xff]  ;;  %v4101_v54 = vld [vmem:[#allocation28_spill] sm:$0xff]  ;;  %v4103_v42 = vld [vmem:[#allocation66_spill] sm:$0xff] }
 0x2f8   :  { %v1349_v26 = vsel %vm1346_vm15, %v1348_v43, %v1344_v33  ;;  %v1372_v31 = vmul.f32 %v2317_v55, %v1330_v58  ;;  %vm1366_vm3 = vcmp.eq.f32.partialorder %v1365_v38, 8.507059e+37  ;;  %v4096_v58 = vld [vmem:[#allocation23_spill] sm:$0xff]  ;;  %v4102_v43 = vld [vmem:[#allocation38_spill] sm:$0xff]  ;;  %v4105_v33 = vld [vmem:[#allocation68_spill] sm:$0xff] }
 0x2f9   :  { %v1371_v62 = vmul.f32 %v1349_v26, %v3473_v29  ;;  %v1359_v34 = vmul.f32 %v2315_v2, %v1358_v51  ;;  %v4092_v29 = vld [vmem:[#allocation65_spill] sm:$0xff]  ;;  %v4095_v51 = vld [vmem:[#allocation20_spill] sm:$0xff]  ;;  %v4104_v55 = vld [vmem:[#allocation67_spill] sm:$0xff] }
 0x2fa   :  { %v4106_v26 = vld [vmem:[#allocation69_spill] sm:$0xff] }
 0x2fb   :  { %v3618_v44 = vadd.f32 %v1372_v31, %v1371_v62  ;;  %v1360_v6 = vadd.f32 %v2315_v2, %v1359_v34  ;;  %v4093_v62 = vld [vmem:[#allocation34_spill] sm:$0xff]  ;;  %v4094_v31 = vld [vmem:[#allocation17_spill] sm:$0xff] }
 0x2fc   :  { %v4107_v34 = vld [vmem:[#allocation70_spill] sm:$0xff]  ;;  %v4110_v38 = vld [vmem:[#allocation73_spill] sm:$0xff] }
 0x2fd   :  { %2318 = vtanh.f32 %v3618_v44  ;;  %v1364_v39 = vsel %vm1363_vm2, %v2315_v2, %v1360_v6  ;;  %v4091_v2 = vld [vmem:[#allocation62_spill] sm:$0xff]  ;;  %v4108_v6 = vld [vmem:[#allocation71_spill] sm:$0xff] }
 0x2fe   :  { %v1369_v35 = vsel %vm1366_vm3, %v1368_v32, %v1364_v39  ;;  %v4111_v39 = vld [vmem:[#allocation74_spill] sm:$0xff]  ;;  %v4112_v32 = vld [vmem:[#allocation75_spill] sm:$0xff] }
 0x303   :  { %v2319_v61 = vpop.eup %2318 }
 0x304   :  { %v1375_v57 = vmul.f32 %v2319_v61, %v1369_v35  ;;  %v4113_v61 = vld [vmem:[#allocation76_spill] sm:$0xff]  ;;  %v4114_v35 = vld [vmem:[#allocation77_spill] sm:$0xff] }
 0x306   :  { %1399 = vmatmul.f32.vlgmr.msra.gmra.mxu0 %v1375_v57  ;;  %1419 = vmatmul.f32.vlgmr.msra.gmra.mxu1 %v1375_v57 }
 0x307   :  { %1439 = vmatmul.f32.vlgmr.msra.gmra.mxu2 %v1375_v57  ;;  %1459 = vmatmul.f32.vlgmr.msra.gmra.mxu3 %v1375_v57  ;;  %v4115_v57 = vld [vmem:[#allocation78_spill] sm:$0xff] }
 0x308   :  { %1691 = vmatpush.msra.mxu0 %v3343_v24  ;;  %1711 = vmatpush.msra.mxu1 %v3346_v19 }
 0x309   :  { %1731 = vmatpush.msra.mxu2 %v3349_v21  ;;  %1751 = vmatpush.msra.mxu3 %v3352_v36 }
 0x30a   :  { %1692 = vmatpush.msra.mxu0 %v3355_v18  ;;  %1712 = vmatpush.msra.mxu1 %v3358_v12 }
 0x30b   :  { %1732 = vmatpush.msra.mxu2 %v3361_v22  ;;  %1752 = vmatpush.msra.mxu3 %v3364_v60 }
 0x30c   :  { %1693 = vmatpush.msra.mxu0 %v3367_v20  ;;  %1713 = vmatpush.msra.mxu1 %v3370_v27 }
 0x30d   :  { %1733 = vmatpush.msra.mxu2 %v3373_v28  ;;  %1753 = vmatpush.msra.mxu3 %v3376_v25 }
 0x30e   :  { %1694 = vmatpush.msra.mxu0 %v3379_v3  ;;  %1714 = vmatpush.msra.mxu1 %v3382_v4 }
 0x30f   :  { %1734 = vmatpush.msra.mxu2 %v3490_v14  ;;  %1754 = vmatpush.msra.mxu3 %v3386_v47 }
 0x310   :  { %1695 = vmatpush.msra.mxu0 %v3389_v5  ;;  %1715 = vmatpush.msra.mxu1 %v3392_v63 }
 0x311   :  { %1735 = vmatpush.msra.mxu2 %v3496_v48  ;;  %1755 = vmatpush.msra.mxu3 %v3396_v10 }
 0x312   :  { %1696 = vmatpush.msra.mxu0 %v3399_v11  ;;  %1716 = vmatpush.msra.mxu1 %v3402_v41 }
 0x313   :  { %1736 = vmatpush.msra.mxu2 %v3502_v0  ;;  %1756 = vmatpush.msra.mxu3 %v3406_v13 }
 0x314   :  { %1697 = vmatpush.msra.mxu0 %v3409_v15  ;;  %1717 = vmatpush.msra.mxu1 %v3412_v49 }
 0x315   :  { %1737 = vmatpush.msra.mxu2 %v3508_v16  ;;  %1757 = vmatpush.msra.mxu3 %v3416_v37 }
 0x316   :  { %1698 = vmatpush.msra.mxu0 %v3419_v23  ;;  %1718 = vmatpush.msra.mxu1 %v3422_v59 }
 0x317   :  { %1738 = vmatpush.msra.mxu2 %v3514_v40  ;;  %1758 = vmatpush.msra.mxu3 %v3426_v7 }
 0x318   :  { %1699 = vmatpush.msra.mxu0 %v3429_v52  ;;  %1719 = vmatpush.msra.mxu1 %v3432_v56 }
 0x319   :  { %1739 = vmatpush.msra.mxu2 %v3520_v17  ;;  %1759 = vmatpush.msra.mxu3 %v3523_v30 }
 0x31a   :  { %1700 = vmatpush.msra.mxu0 %v3526_v45  ;;  %1720 = vmatpush.msra.mxu1 %v3529_v46 }
 0x31b   :  { %1740 = vmatpush.msra.mxu2 %v4091_v2  ;;  %1760 = vmatpush.msra.mxu3 %v4092_v29 }
 0x31c   :  { %1701 = vmatpush.msra.mxu0 %v4093_v62  ;;  %1721 = vmatpush.msra.mxu1 %v4094_v31 }
 0x31d   :  { %1741 = vmatpush.msra.mxu2 %v4095_v51  ;;  %1761 = vmatpush.msra.mxu3 %v4096_v58 }
 0x31e   :  { %1702 = vmatpush.msra.mxu0 %v4097_v8  ;;  %1722 = vmatpush.msra.mxu1 %v4098_v9 }
 0x31f   :  { %1742 = vmatpush.msra.mxu2 %v4099_v1  ;;  %1762 = vmatpush.msra.mxu3 %v4100_v50  ;;  %v4121_v50 = vld [vmem:[#allocation45_spill] sm:$0xff] }
 0x320   :  { %1703 = vmatpush.msra.mxu0 %v4101_v54  ;;  %1723 = vmatpush.msra.mxu1 %v4102_v43 }
 0x321   :  { %1743 = vmatpush.msra.mxu2 %v4103_v42  ;;  %1763 = vmatpush.msra.mxu3 %v4104_v55 }
 0x322   :  { %1704 = vmatpush.msra.mxu0 %v4105_v33  ;;  %1724 = vmatpush.msra.mxu1 %v4106_v26  ;;  %v4116_v33 = vld [vmem:[#allocation79_spill] sm:$0xff]  ;;  %v4117_v26 = vld [vmem:[#allocation18_spill] sm:$0xff] }
 0x323   :  { %1744 = vmatpush.msra.mxu2 %v4107_v34  ;;  %1764 = vmatpush.msra.mxu3 %v4108_v6  ;;  %v4118_v34 = vld [vmem:[#allocation39_spill] sm:$0xff]  ;;  %v4119_v6 = vld [vmem:[#allocation40_spill] sm:$0xff] }
 0x324   :  { %1705 = vmatpush.msra.mxu0 %v4109_v53  ;;  %1725 = vmatpush.msra.mxu1 %v4110_v38  ;;  %v353_v55 = vadd.f32 %v4118_v34, %v4117_v26  ;;  %v4120_v53 = vld [vmem:[#allocation48_spill] sm:$0xff] }
 0x325   :  { %1745 = vmatpush.msra.mxu2 %v4111_v39  ;;  %1765 = vmatpush.msra.mxu3 %v4112_v32 }
 0x326   :  { %1706 = vmatpush.msra.mxu0 %v4113_v61  ;;  %1726 = vmatpush.msra.mxu1 %v4114_v35  ;;  %v394_v42 = vadd.f32 %v4119_v6, %v353_v55 }
 0x327   :  { %1746 = vmatpush.msra.mxu2 %v4115_v57  ;;  %1766 = vmatpush.msra.mxu3 %v4116_v33  ;;  %v4122_v57 = vld [vmem:[#allocation43_spill] sm:$0xff] }
 0x328   :  { %v435_v43 = vadd.f32 %v4120_v53, %v394_v42 }
 0x383   :  { %v1400_v38 = vpop.f32.mrf.mxu0  ;;  %v1420_v54 = vpop.f32.mrf.mxu1 }
 0x384   :  { %v1463_v39 = vadd.f32 %v1400_v38, %v435_v43  ;;  %v1464_v32 = vadd.f32 %v1420_v54, %v4121_v50  ;;  %v4123_v50 = vld [vmem:[#allocation26_spill] sm:$0xff] }
 0x386   :  { %v2242_v1 = vmul.f32 -1.442695, %v1463_v39  ;;  %v2243_v61 = vmul.f32 -1.442695, %v1464_v32 }
 0x388   :  { %2320 = vpow2.f32 %v2242_v1 }
 0x389   :  { %2322 = vpow2.f32 %v2243_v61 }
 0x38a   :  { %v1460_v35 = vpop.f32.mrf.mxu3  ;;  %v1440_v42 = vpop.f32.mrf.mxu2 }
 0x38b   :  { %v1466_v9 = vadd.f32 %v1460_v35, %v4122_v57  ;;  %v1465_v54 = vadd.f32 %v1440_v42, %v4123_v50 }
 0x38d   :  { %v2244_v33 = vmul.f32 -1.442695, %v1466_v9 }
 0x38e   :  { %v2321_v8 = vpop.eup %2320 }
 0x38f   :  { %v2323_v58 = vpop.eup %2322  ;;  %v1470_v34 = vadd.f32 1.0, %v2321_v8  ;;  %2324 = vpow2.f32 %v2244_v33 }
 0x390   :  { %v1489_v55 = vadd.f32 1.0, %v2323_v58 }
 0x391   :  { %2326 = vrcp.f32 %v1470_v34  ;;  %v1482_v9 = vand.u32 2147483648, %v1470_v34  ;;  %v1480_v58 = vand.u32 2147483647, %v1470_v34  ;;  %vm1476_vm6 = vweird.f32 %v1470_v34 }
 0x392   :  { %2328 = vrcp.f32 %v1489_v55  ;;  %v1501_v35 = vand.u32 2147483648, %v1489_v55  ;;  %v1499_v57 = vand.u32 2147483647, %v1489_v55  ;;  %vm1495_vm7 = vweird.f32 %v1489_v55 }
 0x393   :  { %v1483_v42 = vor.u32 1.1754944e-38, %v1482_v9  ;;  %vm1481_vm10 = vcmp.eq.f32.partialorder %v1480_v58, 8.507059e+37 }
 0x394   :  { %vm1500_vm11 = vcmp.eq.f32.partialorder %v1499_v57, 8.507059e+37  ;;  %v4154_v57 = vld [vmem:[#allocation41_spill] sm:$0xff] }
 0x395   :  { %v2325_v6 = vpop.eup %2324 }
 0x396   :  { %v1509_v43 = vadd.f32 1.0, %v2325_v6 }
 0x397   :  { %v2327_v53 = vpop.eup %2326 }
 0x398   :  { %v2329_v38 = vpop.eup %2328  ;;  %v1472_v1 = vmul.f32 %v2327_v53, %v1470_v34  ;;  %2330 = vrcp.f32 %v1509_v43  ;;  %vm1477_vm4 = vweird.f32 %v2327_v53  ;;  %v1521_v9 = vand.u32 2147483648, %v1509_v43 }
 0x399   :  { %v1491_v39 = vmul.f32 %v2329_v38, %v1489_v55  ;;  %2332 = vtanh.f32 %v1465_v54  ;;  %vm1496_vm5 = vweird.f32 %v2329_v38  ;;  %vm1478_vm8 = vmor %vm1476_vm6, %vm1477_vm4  ;;  %vm1515_vm13 = vweird.f32 %v1509_v43 }
 0x39a   :  { %v1473_v32 = vsub.f32 1.0, %v1472_v1  ;;  %vm1497_vm9 = vmor %vm1495_vm7, %vm1496_vm5  ;;  %v1502_v1 = vor.u32 1.1754944e-38, %v1501_v35  ;;  %v1522_v58 = vor.u32 1.1754944e-38, %v1521_v9 }
 0x39b   :  { %v1492_v61 = vsub.f32 1.0, %v1491_v39 }
 0x39c   :  { %v1474_v8 = vmul.f32 %v2327_v53, %v1473_v32 }
 0x39d   :  { %v1493_v33 = vmul.f32 %v2329_v38, %v1492_v61 }
 0x39e   :  { %v2331_v26 = vpop.eup %2330  ;;  %v1475_v6 = vadd.f32 %v2327_v53, %v1474_v8 }
 0x39f   :  { %v1494_v50 = vadd.f32 %v2329_v38, %v1493_v33  ;;  %v1511_v51 = vmul.f32 %v2331_v26, %v1509_v43  ;;  %v2333_v54 = vpop.eup %2332  ;;  %vm1516_vm12 = vweird.f32 %v2331_v26 }
 0x3a0   :  { %v1479_v39 = vsel %vm1478_vm8, %v2327_v53, %v1475_v6  ;;  %v1519_v53 = vand.u32 2147483647, %v1509_v43  ;;  %vm1517_vm14 = vmor %vm1515_vm13, %vm1516_vm12 }
 0x3a1   :  { %v1484_v31 = vsel %vm1481_vm10, %v1483_v42, %v1479_v39  ;;  %v1498_v32 = vsel %vm1497_vm9, %v2329_v38, %v1494_v50  ;;  %v1512_v62 = vsub.f32 1.0, %v1511_v51  ;;  %v4155_v39 = vld [vmem:[#allocation31_spill] sm:$0xff] }
 0x3a2   :  { %v1503_v61 = vsel %vm1500_vm11, %v1502_v1, %v1498_v32  ;;  %v1526_v29 = vmul.f32 %v2333_v54, %v1484_v31  ;;  %vm1520_vm15 = vcmp.eq.f32.partialorder %v1519_v53, 8.507059e+37 }
 0x3a3   :  { %v1525_v2 = vmul.f32 %v1503_v61, %v3618_v44  ;;  %v1513_v8 = vmul.f32 %v2331_v26, %v1512_v62  ;;  %v4152_v44 = vld [vmem:[#allocation51_spill] sm:$0xff] }
 0x3a5   :  { %v3693_v34 = vadd.f32 %v1526_v29, %v1525_v2  ;;  %v1514_v55 = vadd.f32 %v2331_v26, %v1513_v8  ;;  %v4153_v29 = vld [vmem:[#allocation54_spill] sm:$0xff] }
 0x3a7   :  { %2334 = vtanh.f32 %v3693_v34  ;;  %v1518_v35 = vsel %vm1517_vm14, %v2331_v26, %v1514_v55 }
 0x3a8   :  { %v1523_v51 = vsel %vm1520_vm15, %v1522_v58, %v1518_v35 }
 0x3ad   :  { %v2335_v38 = vpop.eup %2334 }
 0x3ae   :  { %v1529_v33 = vmul.f32 %v2335_v38, %v1523_v51  ;;  %v4156_v51 = vld [vmem:[#allocation25_spill] sm:$0xff] }
 0x3b0   :  { %1553 = vmatmul.f32.vlgmr.msrb.gmra.mxu0 %v1529_v33  ;;  %1573 = vmatmul.f32.vlgmr.msrb.gmra.mxu1 %v1529_v33 }
 0x3b1   :  { %1593 = vmatmul.f32.vlgmr.msrb.gmra.mxu2 %v1529_v33  ;;  %1613 = vmatmul.f32.vlgmr.msrb.gmra.mxu3 %v1529_v33 }
 0x3b2   :  { %1845 = vmatpush.msrb.mxu0 %v3343_v24  ;;  %1865 = vmatpush.msrb.mxu1 %v3346_v19  ;;  %v4124_v24 = vld [vmem:[#allocation62_spill] sm:$0xff]  ;;  %v4125_v19 = vld [vmem:[#allocation65_spill] sm:$0xff] }
 0x3b3   :  { %1885 = vmatpush.msrb.mxu2 %v3349_v21  ;;  %1905 = vmatpush.msrb.mxu3 %v3352_v36  ;;  %v4126_v21 = vld [vmem:[#allocation34_spill] sm:$0xff]  ;;  %v4127_v36 = vld [vmem:[#allocation17_spill] sm:$0xff] }
 0x3b4   :  { %1846 = vmatpush.msrb.mxu0 %v3355_v18  ;;  %1866 = vmatpush.msrb.mxu1 %v3358_v12  ;;  %v4128_v18 = vld [vmem:[#allocation20_spill] sm:$0xff]  ;;  %v4129_v12 = vld [vmem:[#allocation23_spill] sm:$0xff] }
 0x3b5   :  { %1886 = vmatpush.msrb.mxu2 %v3361_v22  ;;  %1906 = vmatpush.msrb.mxu3 %v3364_v60  ;;  %v4130_v22 = vld [vmem:[#allocation53_spill] sm:$0xff] }
 0x3b6   :  { %1847 = vmatpush.msrb.mxu0 %v3367_v20  ;;  %1867 = vmatpush.msrb.mxu1 %v3370_v27  ;;  %v4131_v60 = vld [vmem:[#allocation21_spill] sm:$0xff]  ;;  %v4132_v20 = vld [vmem:[#allocation22_spill] sm:$0xff]  ;;  %v4133_v27 = vld [vmem:[#allocation27_spill] sm:$0xff] }
 0x3b7   :  { %1887 = vmatpush.msrb.mxu2 %v3373_v28  ;;  %1907 = vmatpush.msrb.mxu3 %v3376_v25  ;;  %v4134_v28 = vld [vmem:[#allocation28_spill] sm:$0xff]  ;;  %v4135_v25 = vld [vmem:[#allocation38_spill] sm:$0xff] }
 0x3b8   :  { %1848 = vmatpush.msrb.mxu0 %v3379_v3  ;;  %1868 = vmatpush.msrb.mxu1 %v3382_v4  ;;  %v4136_v3 = vld [vmem:[#allocation66_spill] sm:$0xff]  ;;  %v4137_v4 = vld [vmem:[#allocation67_spill] sm:$0xff] }
 0x3b9   :  { %1888 = vmatpush.msrb.mxu2 %v3490_v14  ;;  %1908 = vmatpush.msrb.mxu3 %v3386_v47  ;;  %v4138_v47 = vld [vmem:[#allocation68_spill] sm:$0xff] }
 0x3ba   :  { %1849 = vmatpush.msrb.mxu0 %v3389_v5  ;;  %1869 = vmatpush.msrb.mxu1 %v3392_v63  ;;  %v4139_v5 = vld [vmem:[#allocation69_spill] sm:$0xff]  ;;  %v4140_v63 = vld [vmem:[#allocation70_spill] sm:$0xff] }
 0x3bb   :  { %1889 = vmatpush.msrb.mxu2 %v3496_v48  ;;  %1909 = vmatpush.msrb.mxu3 %v3396_v10  ;;  %v4141_v10 = vld [vmem:[#allocation71_spill] sm:$0xff] }
 0x3bc   :  { %1850 = vmatpush.msrb.mxu0 %v3399_v11  ;;  %1870 = vmatpush.msrb.mxu1 %v3402_v41  ;;  %v4142_v11 = vld [vmem:[#allocation72_spill] sm:$0xff]  ;;  %v4143_v41 = vld [vmem:[#allocation73_spill] sm:$0xff] }
 0x3bd   :  { %1890 = vmatpush.msrb.mxu2 %v3502_v0  ;;  %1910 = vmatpush.msrb.mxu3 %v3406_v13  ;;  %v4144_v13 = vld [vmem:[#allocation74_spill] sm:$0xff] }
 0x3be   :  { %1851 = vmatpush.msrb.mxu0 %v3409_v15  ;;  %1871 = vmatpush.msrb.mxu1 %v3412_v49  ;;  %v4145_v15 = vld [vmem:[#allocation75_spill] sm:$0xff]  ;;  %v4146_v49 = vld [vmem:[#allocation76_spill] sm:$0xff] }
 0x3bf   :  { %1891 = vmatpush.msrb.mxu2 %v3508_v16  ;;  %1911 = vmatpush.msrb.mxu3 %v3416_v37  ;;  %v4147_v37 = vld [vmem:[#allocation77_spill] sm:$0xff] }
 0x3c0   :  { %1852 = vmatpush.msrb.mxu0 %v3419_v23  ;;  %1872 = vmatpush.msrb.mxu1 %v3422_v59  ;;  %v4148_v23 = vld [vmem:[#allocation78_spill] sm:$0xff]  ;;  %v4149_v59 = vld [vmem:[#allocation79_spill] sm:$0xff] }
 0x3c1   :  { %1892 = vmatpush.msrb.mxu2 %v3514_v40  ;;  %1912 = vmatpush.msrb.mxu3 %v3426_v7  ;;  %v4150_v7 = vld [vmem:[#allocation18_spill] sm:$0xff] }
 0x3c2   :  { %1853 = vmatpush.msrb.mxu0 %v3429_v52  ;;  %1873 = vmatpush.msrb.mxu1 %v3432_v56  ;;  %v4151_v52 = vld [vmem:[#allocation50_spill] sm:$0xff] }
 0x3c3   :  { %1893 = vmatpush.msrb.mxu2 %v3520_v17  ;;  %1913 = vmatpush.msrb.mxu3 %v3523_v30  ;;  %v356_v56 = vadd.f32 %v4151_v52, %v4150_v7 }
 0x3c4   :  { %1854 = vmatpush.msrb.mxu0 %v3526_v45  ;;  %1874 = vmatpush.msrb.mxu1 %v3529_v46 }
 0x3c5   :  { %1894 = vmatpush.msrb.mxu2 %v4124_v24  ;;  %1914 = vmatpush.msrb.mxu3 %v4125_v19  ;;  %v397_v2 = vadd.f32 %v4152_v44, %v356_v56 }
 0x3c6   :  { %1855 = vmatpush.msrb.mxu0 %v4126_v21  ;;  %1875 = vmatpush.msrb.mxu1 %v4127_v36 }
 0x3c7   :  { %1895 = vmatpush.msrb.mxu2 %v4128_v18  ;;  %1915 = vmatpush.msrb.mxu3 %v4129_v12  ;;  %v438_v62 = vadd.f32 %v4153_v29, %v397_v2 }
 0x3c8   :  { %1856 = vmatpush.msrb.mxu0 %v4130_v22  ;;  %1876 = vmatpush.msrb.mxu1 %v4131_v60 }
 0x3c9   :  { %1896 = vmatpush.msrb.mxu2 %v4132_v20  ;;  %1916 = vmatpush.msrb.mxu3 %v4133_v27 }
 0x3ca   :  { %1857 = vmatpush.msrb.mxu0 %v4134_v28  ;;  %1877 = vmatpush.msrb.mxu1 %v4135_v25 }
 0x3cb   :  { %1897 = vmatpush.msrb.mxu2 %v4136_v3  ;;  %1917 = vmatpush.msrb.mxu3 %v4137_v4 }
 0x3cc   :  { %1858 = vmatpush.msrb.mxu0 %v4138_v47  ;;  %1878 = vmatpush.msrb.mxu1 %v4139_v5 }
 0x3cd   :  { %1898 = vmatpush.msrb.mxu2 %v4140_v63  ;;  %1918 = vmatpush.msrb.mxu3 %v4141_v10 }
 0x3ce   :  { %1859 = vmatpush.msrb.mxu0 %v4142_v11  ;;  %1879 = vmatpush.msrb.mxu1 %v4143_v41 }
 0x3cf   :  { %1899 = vmatpush.msrb.mxu2 %v4144_v13  ;;  %1919 = vmatpush.msrb.mxu3 %v4145_v15 }
 0x3d0   :  { %1860 = vmatpush.msrb.mxu0 %v4146_v49  ;;  %1880 = vmatpush.msrb.mxu1 %v4147_v37 }
 0x3d1   :  { %1900 = vmatpush.msrb.mxu2 %v4148_v23  ;;  %1920 = vmatpush.msrb.mxu3 %v4149_v59 }
 0x42d   :  { %v1554_v31 = vpop.f32.mrf.mxu0  ;;  %v1574_v26 = vpop.f32.mrf.mxu1 }
 0x42e   :  { %v1617_v43 = vadd.f32 %v1554_v31, %v438_v62  ;;  %v1618_v6 = vadd.f32 %v1574_v26, %v4154_v57 }
 0x430   :  { %v2245_v42 = vmul.f32 -1.442695, %v1617_v43  ;;  %v2246_v50 = vmul.f32 -1.442695, %v1618_v6 }
 0x432   :  { %2336 = vpow2.f32 %v2245_v42 }
 0x433   :  { %2338 = vpow2.f32 %v2246_v50 }
 0x434   :  { %v1614_v1 = vpop.f32.mrf.mxu3  ;;  %v1594_v53 = vpop.f32.mrf.mxu2 }
 0x435   :  { %v1620_v54 = vadd.f32 %v1614_v1, %v4155_v39  ;;  %v1619_v33 = vadd.f32 %v1594_v53, %v4156_v51 }
 0x437   :  { %v2247_v32 = vmul.f32 -1.442695, %v1620_v54 }
 0x438   :  { %v2337_v61 = vpop.eup %2336 }
 0x439   :  { %v2339_v8 = vpop.eup %2338  ;;  %v1624_v55 = vadd.f32 1.0, %v2337_v61  ;;  %2340 = vpow2.f32 %v2247_v32 }
 0x43a   :  { %v1643_v9 = vadd.f32 1.0, %v2339_v8 }
 0x43b   :  { %2342 = vrcp.f32 %v1624_v55  ;;  %v1636_v62 = vand.u32 2147483648, %v1624_v55  ;;  %v1634_v43 = vand.u32 2147483647, %v1624_v55  ;;  %vm1630_vm2 = vweird.f32 %v1624_v55 }
 0x43c   :  { %2344 = vrcp.f32 %v1643_v9  ;;  %v1655_v31 = vand.u32 2147483648, %v1643_v9  ;;  %v1653_v6 = vand.u32 2147483647, %v1643_v9  ;;  %vm1649_vm3 = vweird.f32 %v1643_v9 }
 0x43d   :  { %v1637_v1 = vor.u32 1.1754944e-38, %v1636_v62  ;;  %vm1635_vm6 = vcmp.eq.f32.partialorder %v1634_v43, 8.507059e+37 }
 0x43e   :  { %v1656_v32 = vor.u32 1.1754944e-38, %v1655_v31  ;;  %vm1654_vm7 = vcmp.eq.f32.partialorder %v1653_v6, 8.507059e+37  ;;  %v2470_v6 = vld [vmem:[#allocation8 + $0x1f0] sm:$0xff] }
 0x43f   :  { %v2341_v35 = vpop.eup %2340 }
 0x440   :  { %v1663_v58 = vadd.f32 1.0, %v2341_v35 }
 0x441   :  { %v2343_v38 = vpop.eup %2342 }
 0x442   :  { %v2345_v52 = vpop.eup %2344  ;;  %v1626_v56 = vmul.f32 %v2343_v38, %v1624_v55  ;;  %2346 = vrcp.f32 %v1663_v58  ;;  %vm1631_vm0 = vweird.f32 %v2343_v38  ;;  %vm1669_vm9 = vweird.f32 %v1663_v58 }
 0x443   :  { %v1645_v44 = vmul.f32 %v2345_v52, %v1643_v9  ;;  %2348 = vtanh.f32 %v1619_v33  ;;  %vm1650_vm1 = vweird.f32 %v2345_v52  ;;  %vm1632_vm4 = vmor %vm1630_vm2, %vm1631_vm0 }
 0x444   :  { %v1627_v2 = vsub.f32 1.0, %v1626_v56  ;;  %vm1651_vm5 = vmor %vm1649_vm3, %vm1650_vm1 }
 0x445   :  { %v1646_v29 = vsub.f32 1.0, %v1645_v44 }
 0x446   :  { %v1628_v26 = vmul.f32 %v2343_v38, %v1627_v2 }
 0x447   :  { %v1647_v57 = vmul.f32 %v2345_v52, %v1646_v29  ;;  %v1675_v29 = vand.u32 2147483648, %v1663_v58 }
 0x448   :  { %v2347_v42 = vpop.eup %2346  ;;  %v1629_v50 = vadd.f32 %v2343_v38, %v1628_v26 }
 0x449   :  { %v1648_v39 = vadd.f32 %v2345_v52, %v1647_v57  ;;  %v1665_v54 = vmul.f32 %v2347_v42, %v1663_v58  ;;  %v2349_v8 = vpop.eup %2348  ;;  %vm1670_vm8 = vweird.f32 %v2347_v42  ;;  %v1676_v31 = vor.u32 1.1754944e-38, %v1675_v29  ;;  %v2469_v57 = vld [vmem:[#allocation8 + $0x1e8] sm:$0xff]  ;;  %v2488_v29 = vld [vmem:[#allocation8 + $0x158] sm:$0xff] }
 0x44a   :  { %v1633_v61 = vsel %vm1632_vm4, %v2343_v38, %v1629_v50  ;;  %v1673_v38 = vand.u32 2147483647, %v1663_v58  ;;  %vm1671_vm10 = vmor %vm1669_vm9, %vm1670_vm8  ;;  %v2471_v50 = vld [vmem:[#allocation8 + $0x1f8] sm:$0xff]  ;;  %v2472_v58 = vld [vmem:[#allocation8 + $0x1c0] sm:$0xff] }
 0x44b   :  { %v1638_v53 = vsel %vm1635_vm6, %v1637_v1, %v1633_v61  ;;  %v1652_v35 = vsel %vm1651_vm5, %v2345_v52, %v1648_v39  ;;  %v1666_v51 = vsub.f32 1.0, %v1665_v54  ;;  %v2474_v1 = vld [vmem:[#allocation8 + $0x1d0] sm:$0xff]  ;;  %v2475_v39 = vld [vmem:[#allocation8 + $0x1d8] sm:$0xff]  ;;  %v2476_v54 = vld [vmem:[#allocation8 + $0x1a0] sm:$0xff] }
 0x44c   :  { %v1657_v33 = vsel %vm1654_vm7, %v1656_v32, %v1652_v35  ;;  %v1680_v56 = vmul.f32 %v2349_v8, %v1638_v53  ;;  %vm1674_vm11 = vcmp.eq.f32.partialorder %v1673_v38, 8.507059e+37  ;;  %v2477_v32 = vld [vmem:[#allocation8 + $0x1a8] sm:$0xff]  ;;  %v2478_v61 = vld [vmem:[#allocation8 + $0x1b0] sm:$0xff]  ;;  %v2479_v8 = vld [vmem:[#allocation8 + $0x1b8] sm:$0xff] }
 0x44d   :  { %v1679_v44 = vmul.f32 %v1657_v33, %v3693_v34  ;;  %v1667_v2 = vmul.f32 %v2347_v42, %v1666_v51  ;;  %v2468_v34 = vld [vmem:[#allocation8 + $0x1e0] sm:$0xff]  ;;  %v2481_v35 = vld [vmem:[#allocation8 + $0x188] sm:$0xff]  ;;  %v2482_v51 = vld [vmem:[#allocation8 + $0x198] sm:$0xff] }
 0x44e   :  { %v2480_v53 = vld [vmem:[#allocation8 + $0x180] sm:$0xff] }
 0x44f   :  { %v3768_v55 = vadd.f32 %v1680_v56, %v1679_v44  ;;  %v1668_v9 = vadd.f32 %v2347_v42, %v1667_v2  ;;  %v2483_v33 = vld [vmem:[#allocation8 + $0x160] sm:$0xff]  ;;  %v2484_v56 = vld [vmem:[#allocation8 + $0x168] sm:$0xff]  ;;  %v2485_v44 = vld [vmem:[#allocation8 + $0x178] sm:$0xff] }
 0x450   :  { %v2486_v2 = vld [vmem:[#allocation8 + $0x140] sm:$0xff] }
 0x451   :  { %2350 = vtanh.f32 %v3768_v55  ;;  %v1672_v62 = vsel %vm1671_vm10, %v2347_v42, %v1668_v9  ;;  %v2473_v42 = vld [vmem:[#allocation8 + $0x1c8] sm:$0xff]  ;;  %v2489_v38 = vld [vmem:[#allocation8 + $0x120] sm:$0xff] }
 0x452   :  { %v1677_v26 = vsel %vm1674_vm11, %v1676_v31, %v1672_v62  ;;  %v2487_v9 = vld [vmem:[#allocation8 + $0x148] sm:$0xff]  ;;  %v2491_v62 = vld [vmem:[#allocation8 + $0x138] sm:$0xff]  ;;  %v2492_v31 = vld [vmem:[#allocation8 + $0x100] sm:$0xff] }
 0x457   :  { %v2351_v52 = vpop.eup %2350 }
 0x458   :  { %v1683_v43 = vmul.f32 %v2351_v52, %v1677_v26  ;;  %v2494_v52 = vld [vmem:[#allocation8 + $0x118] sm:$0xff]  ;;  %v2495_v26 = vld [vmem:[#allocation8 + $0xe0] sm:$0xff] }
 0x45a   :  { %1707 = vmatmul.f32.vlgmr.msra.gmra.mxu0 %v1683_v43  ;;  %1727 = vmatmul.f32.vlgmr.msra.gmra.mxu1 %v1683_v43 }
 0x45b   :  { %1747 = vmatmul.f32.vlgmr.msra.gmra.mxu2 %v1683_v43  ;;  %1767 = vmatmul.f32.vlgmr.msra.gmra.mxu3 %v1683_v43 }
 0x45c   :  { %1999 = vmatpush.msra.mxu0 %v2468_v34  ;;  %2019 = vmatpush.msra.mxu1 %v2469_v57 }
 0x45d   :  { %2039 = vmatpush.msra.mxu2 %v2470_v6  ;;  %2059 = vmatpush.msra.mxu3 %v2471_v50 }
 0x45e   :  { %2000 = vmatpush.msra.mxu0 %v2472_v58  ;;  %2020 = vmatpush.msra.mxu1 %v2473_v42 }
 0x45f   :  { %2040 = vmatpush.msra.mxu2 %v2474_v1  ;;  %2060 = vmatpush.msra.mxu3 %v2475_v39 }
 0x460   :  { %2001 = vmatpush.msra.mxu0 %v2476_v54  ;;  %2021 = vmatpush.msra.mxu1 %v2477_v32 }
 0x461   :  { %2041 = vmatpush.msra.mxu2 %v2478_v61  ;;  %2061 = vmatpush.msra.mxu3 %v2479_v8 }
 0x462   :  { %2002 = vmatpush.msra.mxu0 %v2480_v53  ;;  %2022 = vmatpush.msra.mxu1 %v2481_v35 }
 0x463   :  { %2042 = vmatpush.msra.mxu2 %v3490_v14  ;;  %2062 = vmatpush.msra.mxu3 %v2482_v51  ;;  %v2490_v14 = vld [vmem:[#allocation8 + $0x128] sm:$0xff] }
 0x464   :  { %2003 = vmatpush.msra.mxu0 %v2483_v33  ;;  %2023 = vmatpush.msra.mxu1 %v2484_v56 }
 0x465   :  { %2043 = vmatpush.msra.mxu2 %v3496_v48  ;;  %2063 = vmatpush.msra.mxu3 %v2485_v44  ;;  %v2493_v48 = vld [vmem:[#allocation8 + $0x108] sm:$0xff] }
 0x466   :  { %2004 = vmatpush.msra.mxu0 %v2486_v2  ;;  %2024 = vmatpush.msra.mxu1 %v2487_v9 }
 0x467   :  { %2044 = vmatpush.msra.mxu2 %v3502_v0  ;;  %2064 = vmatpush.msra.mxu3 %v2488_v29  ;;  %v2496_v0 = vld [vmem:[#allocation8 + $0xe8] sm:$0xff] }
 0x468   :  { %2005 = vmatpush.msra.mxu0 %v2489_v38  ;;  %2025 = vmatpush.msra.mxu1 %v2490_v14 }
 0x469   :  { %2045 = vmatpush.msra.mxu2 %v3508_v16  ;;  %2065 = vmatpush.msra.mxu3 %v2491_v62  ;;  %v4157_v16 = vld [vmem:[#allocation55_spill] sm:$0xff] }
 0x46a   :  { %2006 = vmatpush.msra.mxu0 %v2492_v31  ;;  %2026 = vmatpush.msra.mxu1 %v2493_v48 }
 0x46b   :  { %2046 = vmatpush.msra.mxu2 %v3514_v40  ;;  %2066 = vmatpush.msra.mxu3 %v2494_v52  ;;  %v359_v40 = vadd.f32 %v4157_v16, %v4150_v7 }
 0x46c   :  { %2007 = vmatpush.msra.mxu0 %v2495_v26  ;;  %2027 = vmatpush.msra.mxu1 %v2496_v0 }
 0x46d   :  { %2047 = vmatpush.msra.mxu2 %v3520_v17  ;;  %2067 = vmatpush.msra.mxu3 %v3523_v30  ;;  %v4158_v17 = vld [vmem:[#allocation56_spill] sm:$0xff] }
 0x46e   :  { %2008 = vmatpush.msra.mxu0 %v3526_v45  ;;  %2028 = vmatpush.msra.mxu1 %v3529_v46  ;;  %v400_v30 = vadd.f32 %v4158_v17, %v359_v40  ;;  %v4159_v45 = vld [vmem:[#allocation57_spill] sm:$0xff]  ;;  %v4164_v40 = vld [vmem:[#allocation60_spill] sm:$0xff] }
 0x46f   :  { %2048 = vmatpush.msra.mxu2 %v4124_v24  ;;  %2068 = vmatpush.msra.mxu3 %v4125_v19 }
 0x470   :  { %2009 = vmatpush.msra.mxu0 %v4126_v21  ;;  %2029 = vmatpush.msra.mxu1 %v4127_v36  ;;  %v441_v46 = vadd.f32 %v4159_v45, %v400_v30  ;;  %v4160_v36 = vld [vmem:[#allocation42_spill] sm:$0xff]  ;;  %v4165_v30 = vld [vmem:[#allocation61_spill] sm:$0xff] }
 0x471   :  { %2049 = vmatpush.msra.mxu2 %v4128_v18  ;;  %2069 = vmatpush.msra.mxu3 %v4129_v12 }
 0x472   :  { %2010 = vmatpush.msra.mxu0 %v4130_v22  ;;  %2030 = vmatpush.msra.mxu1 %v4131_v60 }
 0x473   :  { %2050 = vmatpush.msra.mxu2 %v4132_v20  ;;  %2070 = vmatpush.msra.mxu3 %v4133_v27  ;;  %v4161_v20 = vld [vmem:[#allocation44_spill] sm:$0xff] }
 0x474   :  { %2011 = vmatpush.msra.mxu0 %v4134_v28  ;;  %2031 = vmatpush.msra.mxu1 %v4135_v25 }
 0x475   :  { %2051 = vmatpush.msra.mxu2 %v4136_v3  ;;  %2071 = vmatpush.msra.mxu3 %v4137_v4 }
 0x476   :  { %2012 = vmatpush.msra.mxu0 %v4138_v47  ;;  %2032 = vmatpush.msra.mxu1 %v4139_v5 }
 0x477   :  { %2052 = vmatpush.msra.mxu2 %v4140_v63  ;;  %2072 = vmatpush.msra.mxu3 %v4141_v10 }
 0x478   :  { %2013 = vmatpush.msra.mxu0 %v4142_v11  ;;  %2033 = vmatpush.msra.mxu1 %v4143_v41  ;;  %v4162_v41 = vld [vmem:[#allocation33_spill] sm:$0xff] }
 0x479   :  { %2053 = vmatpush.msra.mxu2 %v4144_v13  ;;  %2073 = vmatpush.msra.mxu3 %v4145_v15 }
 0x47a   :  { %2014 = vmatpush.msra.mxu0 %v4146_v49  ;;  %2034 = vmatpush.msra.mxu1 %v4147_v37 }
 0x47b   :  { %2054 = vmatpush.msra.mxu2 %v4148_v23  ;;  %2074 = vmatpush.msra.mxu3 %v4149_v59 }
 0x4d7   :  { %v1708_v24 = vpop.f32.mrf.mxu0  ;;  %v1728_v19 = vpop.f32.mrf.mxu1 }
 0x4d8   :  { %v1771_v21 = vadd.f32 %v1708_v24, %v441_v46  ;;  %v1772_v18 = vadd.f32 %v1728_v19, %v4160_v36 }
 0x4da   :  { %v2248_v12 = vmul.f32 -1.442695, %v1771_v21  ;;  %v2249_v22 = vmul.f32 -1.442695, %v1772_v18  ;;  %v4166_v21 = vld [vmem:[#allocation46_spill] sm:$0xff] }
 0x4dc   :  { %2352 = vpow2.f32 %v2248_v12 }
 0x4dd   :  { %2354 = vpow2.f32 %v2249_v22 }
 0x4de   :  { %v1768_v60 = vpop.f32.mrf.mxu3  ;;  %v1748_v5 = vpop.f32.mrf.mxu2 }
 0x4df   :  { %v1774_v27 = vadd.f32 %v1768_v60, %v4161_v20  ;;  %v1773_v13 = vadd.f32 %v1748_v5, %v4162_v41  ;;  %v4167_v60 = vld [vmem:[#allocation58_spill] sm:$0xff] }
 0x4e1   :  { %v2250_v28 = vmul.f32 -1.442695, %v1774_v27 }
 0x4e2   :  { %v2353_v25 = vpop.eup %2352 }
 0x4e3   :  { %v2355_v3 = vpop.eup %2354  ;;  %v1778_v4 = vadd.f32 1.0, %v2353_v25  ;;  %2356 = vpow2.f32 %v2250_v28 }
 0x4e4   :  { %v1797_v47 = vadd.f32 1.0, %v2355_v3 }
 0x4e5   :  { %2358 = vrcp.f32 %v1778_v4  ;;  %v1790_v43 = vand.u32 2147483648, %v1778_v4  ;;  %v1788_v6 = vand.u32 2147483647, %v1778_v4  ;;  %vm1784_vm14 = vweird.f32 %v1778_v4 }
 0x4e6   :  { %2360 = vrcp.f32 %v1797_v47  ;;  %v1809_v34 = vand.u32 2147483648, %v1797_v47  ;;  %v1807_v58 = vand.u32 2147483647, %v1797_v47  ;;  %vm1803_vm15 = vweird.f32 %v1797_v47 }
 0x4e7   :  { %v1791_v39 = vor.u32 1.1754944e-38, %v1790_v43  ;;  %vm1789_vm2 = vcmp.eq.f32.partialorder %v1788_v6, 8.507059e+37 }
 0x4e8   :  { %v1810_v61 = vor.u32 1.1754944e-38, %v1809_v34  ;;  %vm1808_vm3 = vcmp.eq.f32.partialorder %v1807_v58, 8.507059e+37 }
 0x4e9   :  { %v2357_v63 = vpop.eup %2356 }
 0x4ea   :  { %v1817_v10 = vadd.f32 1.0, %v2357_v63 }
 0x4eb   :  { %v2359_v11 = vpop.eup %2358 }
 0x4ec   :  { %v2361_v15 = vpop.eup %2360  ;;  %v1780_v49 = vmul.f32 %v2359_v11, %v1778_v4  ;;  %2362 = vrcp.f32 %v1817_v10  ;;  %vm1785_vm12 = vweird.f32 %v2359_v11  ;;  %v1829_v14 = vand.u32 2147483648, %v1817_v10 }
 0x4ed   :  { %v1799_v37 = vmul.f32 %v2361_v15, %v1797_v47  ;;  %2364 = vtanh.f32 %v1773_v13  ;;  %vm1804_vm13 = vweird.f32 %v2361_v15  ;;  %vm1786_vm0 = vmor %vm1784_vm14, %vm1785_vm12  ;;  %vm1823_vm5 = vweird.f32 %v1817_v10 }
 0x4ee   :  { %v1781_v23 = vsub.f32 1.0, %v1780_v49  ;;  %vm1805_vm1 = vmor %vm1803_vm15, %vm1804_vm13  ;;  %v1827_v62 = vand.u32 2147483647, %v1817_v10  ;;  %v1830_v48 = vor.u32 1.1754944e-38, %v1829_v14 }
 0x4ef   :  { %v1800_v59 = vsub.f32 1.0, %v1799_v37 }
 0x4f0   :  { %v1782_v57 = vmul.f32 %v2359_v11, %v1781_v23  ;;  %vm1828_vm7 = vcmp.eq.f32.partialorder %v1827_v62, 8.507059e+37 }
 0x4f1   :  { %v1801_v50 = vmul.f32 %v2361_v15, %v1800_v59 }
 0x4f2   :  { %v2363_v42 = vpop.eup %2362  ;;  %v1783_v1 = vadd.f32 %v2359_v11, %v1782_v57 }
 0x4f3   :  { %v1802_v54 = vadd.f32 %v2361_v15, %v1801_v50  ;;  %v1819_v32 = vmul.f32 %v2363_v42, %v1817_v10  ;;  %v2365_v53 = vpop.eup %2364  ;;  %vm1824_vm4 = vweird.f32 %v2363_v42 }
 0x4f4   :  { %v1787_v8 = vsel %vm1786_vm0, %v2359_v11, %v1783_v1  ;;  %vm1825_vm6 = vmor %vm1823_vm5, %vm1824_vm4  ;;  %v4168_v11 = vld [vmem:[#allocation32_spill] sm:$0xff] }
 0x4f5   :  { %v1792_v35 = vsel %vm1789_vm2, %v1791_v39, %v1787_v8  ;;  %v1806_v51 = vsel %vm1805_vm1, %v2361_v15, %v1802_v54  ;;  %v1820_v33 = vsub.f32 1.0, %v1819_v32 }
 0x4f6   :  { %v1811_v56 = vsel %vm1808_vm3, %v1810_v61, %v1806_v51  ;;  %v1834_v44 = vmul.f32 %v2365_v53, %v1792_v35 }
 0x4f7   :  { %v1833_v2 = vmul.f32 %v1811_v56, %v3768_v55  ;;  %v1821_v9 = vmul.f32 %v2363_v42, %v1820_v33  ;;  %v4163_v55 = vld [vmem:[#allocation59_spill] sm:$0xff] }
 0x4f8   :  { %v362_v16 = vadd.f32 %v4163_v55, %v4150_v7  ;;  %v2161_v55 = vld [vmem:[#allocation11 + $0x70] sm:$0xff] }
 0x4f9   :  { %v3814_v29 = vadd.f32 %v1834_v44, %v1833_v2  ;;  %v1822_v38 = vadd.f32 %v2363_v42, %v1821_v9 }
 0x4fa   :  { %v403_v17 = vadd.f32 %v4164_v40, %v362_v16  ;;  %v2160_v16 = vld [vmem:[#allocation11 + $0x68] sm:$0xff]  ;;  %v2159_v40 = vld [vmem:[#allocation11 + $0x60] sm:$0xff] }
 0x4fb   :  { %2366 = vtanh.f32 %v3814_v29  ;;  %v1826_v31 = vsel %vm1825_vm6, %v2363_v42, %v1822_v38 }
 0x4fc   :  { %v1831_v26 = vsel %vm1828_vm7, %v1830_v48, %v1826_v31  ;;  %v444_v45 = vadd.f32 %v4165_v30, %v403_v17  ;;  %v2158_v17 = vld [vmem:[#allocation11 + $0x58] sm:$0xff] }
 0x4fd   :  { %v4169_v30 = vld [vmem:[#allocation63_spill] sm:$0xff] }
 0x501   :  { %v2367_v52 = vpop.eup %2366 }
 0x502   :  { %v1837_v0 = vmul.f32 %v2367_v52, %v1831_v26 }
 0x504   :  { %1861 = vmatmul.f32.vlgmr.msrb.gmra.mxu0 %v1837_v0  ;;  %1881 = vmatmul.f32.vlgmr.msrb.gmra.mxu1 %v1837_v0 }
 0x505   :  { %1901 = vmatmul.f32.vlgmr.msrb.gmra.mxu2 %v1837_v0  ;;  %1921 = vmatmul.f32.vlgmr.msrb.gmra.mxu3 %v1837_v0 }
 0x581   :  { %v1862_v46 = vpop.f32.mrf.mxu0  ;;  %v1882_v24 = vpop.f32.mrf.mxu1 }
 0x582   :  { %v1925_v19 = vadd.f32 %v1862_v46, %v444_v45  ;;  %v1926_v36 = vadd.f32 %v1882_v24, %v4166_v21  ;;  %v365_v45 = vadd.f32 %v4169_v30, %v4150_v7  ;;  %v2157_v46 = vld [vmem:[#allocation11 + $0x50] sm:$0xff]  ;;  %v2156_v24 = vld [vmem:[#allocation11 + $0x48] sm:$0xff] }
 0x584   :  { %v2251_v18 = vmul.f32 -1.442695, %v1925_v19  ;;  %v2252_v12 = vmul.f32 -1.442695, %v1926_v36  ;;  %v4170_v19 = vld [vmem:[#allocation64_spill] sm:$0xff] }
 0x585   :  { %v406_v21 = vadd.f32 %v4170_v19, %v365_v45  ;;  %v2155_v36 = vld [vmem:[#allocation11 + $0x40] sm:$0xff] }
 0x586   :  { %2368 = vpow2.f32 %v2251_v18  ;;  %v4171_v18 = vld [vmem:[#allocation19_spill] sm:$0xff] }
 0x587   :  { %2370 = vpow2.f32 %v2252_v12  ;;  %v447_v12 = vadd.f32 %v4171_v18, %v406_v21 }
 0x588   :  { %v1922_v22 = vpop.f32.mrf.mxu3  ;;  %v1902_v47 = vpop.f32.mrf.mxu2 }
 0x589   :  { %v1928_v20 = vadd.f32 %v1922_v22, %v4167_v60  ;;  %v1927_v41 = vadd.f32 %v1902_v47, %v4168_v11  ;;  %v2152_v47 = vld [vmem:[#allocation11 + $0x28] sm:$0xff]  ;;  %v4173_v11 = vld [vmem:[#allocation47_spill] sm:$0xff] }
 0x58b   :  { %v2253_v27 = vmul.f32 -1.442695, %v1928_v20  ;;  %v2154_v20 = vld [vmem:[#allocation11 + $0x38] sm:$0xff] }
 0x58c   :  { %v2369_v28 = vpop.eup %2368 }
 0x58d   :  { %v2371_v25 = vpop.eup %2370  ;;  %v1932_v3 = vadd.f32 1.0, %v2369_v28  ;;  %2372 = vpow2.f32 %v2253_v27  ;;  %v4172_v28 = vld [vmem:[#allocation52_spill] sm:$0xff] }
 0x58e   :  { %v1951_v4 = vadd.f32 1.0, %v2371_v25 }
 0x58f   :  { %2374 = vrcp.f32 %v1932_v3  ;;  %v1944_v59 = vand.u32 2147483648, %v1932_v3  ;;  %v1942_v57 = vand.u32 2147483647, %v1932_v3  ;;  %vm1938_vm10 = vweird.f32 %v1932_v3 }
 0x590   :  { %2376 = vrcp.f32 %v1951_v4  ;;  %v1963_v43 = vand.u32 2147483648, %v1951_v4  ;;  %v1961_v50 = vand.u32 2147483647, %v1951_v4  ;;  %vm1957_vm11 = vweird.f32 %v1951_v4 }
 0x591   :  { %v1945_v1 = vor.u32 1.1754944e-38, %v1944_v59  ;;  %vm1943_vm14 = vcmp.eq.f32.partialorder %v1942_v57, 8.507059e+37 }
 0x592   :  { %v1964_v32 = vor.u32 1.1754944e-38, %v1963_v43  ;;  %vm1962_vm15 = vcmp.eq.f32.partialorder %v1961_v50, 8.507059e+37  ;;  %v2147_v43 = vld [vmem:[#allocation11] sm:$0xff] }
 0x593   :  { %v2373_v5 = vpop.eup %2372 }
 0x594   :  { %v1971_v63 = vadd.f32 1.0, %v2373_v5  ;;  %v2151_v5 = vld [vmem:[#allocation11 + $0x20] sm:$0xff] }
 0x595   :  { %v2375_v10 = vpop.eup %2374 }
 0x596   :  { %v2377_v13 = vpop.eup %2376  ;;  %v1934_v15 = vmul.f32 %v2375_v10, %v1932_v3  ;;  %2378 = vrcp.f32 %v1971_v63  ;;  %vm1939_vm8 = vweird.f32 %v2375_v10  ;;  %v1983_v14 = vand.u32 2147483648, %v1971_v63  ;;  %v2153_v3 = vld [vmem:[#allocation11 + $0x30] sm:$0xff] }
 0x597   :  { %v1953_v49 = vmul.f32 %v2377_v13, %v1951_v4  ;;  %2380 = vtanh.f32 %v1927_v41  ;;  %vm1958_vm9 = vweird.f32 %v2377_v13  ;;  %vm1940_vm12 = vmor %vm1938_vm10, %vm1939_vm8  ;;  %vm1977_vm1 = vweird.f32 %v1971_v63 }
 0x598   :  { %v1935_v37 = vsub.f32 1.0, %v1934_v15  ;;  %vm1959_vm13 = vmor %vm1957_vm11, %vm1958_vm9  ;;  %v1981_v62 = vand.u32 2147483647, %v1971_v63  ;;  %v1984_v48 = vor.u32 1.1754944e-38, %v1983_v14 }
 0x599   :  { %v1954_v23 = vsub.f32 1.0, %v1953_v49  ;;  %v2148_v49 = vld [vmem:[#allocation11 + $0x8] sm:$0xff] }
 0x59a   :  { %v1936_v34 = vmul.f32 %v2375_v10, %v1935_v37  ;;  %vm1982_vm3 = vcmp.eq.f32.partialorder %v1981_v62, 8.507059e+37 }
 0x59b   :  { %v1955_v6 = vmul.f32 %v2377_v13, %v1954_v23 }
 0x59c   :  { %v2379_v58 = vpop.eup %2378  ;;  %v1937_v42 = vadd.f32 %v2375_v10, %v1936_v34 }
 0x59d   :  { %v1956_v39 = vadd.f32 %v2377_v13, %v1955_v6  ;;  %v1973_v54 = vmul.f32 %v2379_v58, %v1971_v63  ;;  %v2381_v8 = vpop.eup %2380  ;;  %vm1978_vm0 = vweird.f32 %v2379_v58  ;;  %v2150_v63 = vld [vmem:[#allocation11 + $0x18] sm:$0xff] }
 0x59e   :  { %v1941_v61 = vsel %vm1940_vm12, %v2375_v10, %v1937_v42  ;;  %vm1979_vm2 = vmor %vm1977_vm1, %vm1978_vm0  ;;  %v4174_v42 = vld [vmem:[#allocation36_spill] sm:$0xff] }
 0x59f   :  { %v1946_v53 = vsel %vm1943_vm14, %v1945_v1, %v1941_v61  ;;  %v1960_v35 = vsel %vm1959_vm13, %v2377_v13, %v1956_v39  ;;  %v1974_v51 = vsub.f32 1.0, %v1973_v54  ;;  %v2149_v13 = vld [vmem:[#allocation11 + $0x10] sm:$0xff] }
 0x5a0   :  { %v1965_v33 = vsel %vm1962_vm15, %v1964_v32, %v1960_v35  ;;  %v1988_v56 = vmul.f32 %v2381_v8, %v1946_v53 }
 0x5a1   :  { %v1987_v44 = vmul.f32 %v1965_v33, %v3814_v29  ;;  %v1975_v2 = vmul.f32 %v2379_v58, %v1974_v51  ;;  %v2162_v29 = vld [vmem:[#allocation11 + $0x78] sm:$0xff] }
 0x5a2   :  { %2167 = vmatpush.msrb.mxu0 %v2162_v29 }
 0x5a3   :  { %v3825_v9 = vadd.f32 %v1988_v56, %v1987_v44  ;;  %v1976_v38 = vadd.f32 %v2379_v58, %v1975_v2 }
 0x5a4   :  { %2168 = vmatpush.msrb.mxu0 %v2161_v55 }
 0x5a5   :  { %2382 = vtanh.f32 %v3825_v9  ;;  %v1980_v31 = vsel %vm1979_vm2, %v2379_v58, %v1976_v38 }
 0x5a6   :  { %v1985_v26 = vsel %vm1982_vm3, %v1984_v48, %v1980_v31  ;;  %2169 = vmatpush.msrb.mxu0 %v2160_v16 }
 0x5a8   :  { %2170 = vmatpush.msrb.mxu0 %v2159_v40 }
 0x5aa   :  { %2171 = vmatpush.msrb.mxu0 %v2158_v17 }
 0x5ab   :  { %v2383_v52 = vpop.eup %2382 }
 0x5ac   :  { %v1991_v0 = vmul.f32 %v2383_v52, %v1985_v26  ;;  %2172 = vmatpush.msrb.mxu0 %v2157_v46 }
 0x5ae   :  { %2015 = vmatmul.f32.vlgmr.msra.gmra.mxu0 %v1991_v0  ;;  %2035 = vmatmul.f32.vlgmr.msra.gmra.mxu1 %v1991_v0 }
 0x5af   :  { %2055 = vmatmul.f32.vlgmr.msra.gmra.mxu2 %v1991_v0  ;;  %2075 = vmatmul.f32.vlgmr.msra.gmra.mxu3 %v1991_v0 }
 0x5b0   :  { %2173 = vmatpush.msrb.mxu0 %v2156_v24 }
 0x5b2   :  { %2174 = vmatpush.msrb.mxu0 %v2155_v36 }
 0x5b4   :  { %2175 = vmatpush.msrb.mxu0 %v2154_v20 }
 0x5b6   :  { %2176 = vmatpush.msrb.mxu0 %v2153_v3 }
 0x5b8   :  { %2177 = vmatpush.msrb.mxu0 %v2152_v47 }
 0x5ba   :  { %2178 = vmatpush.msrb.mxu0 %v2151_v5 }
 0x5bc   :  { %2179 = vmatpush.msrb.mxu0 %v2150_v63 }
 0x5be   :  { %2180 = vmatpush.msrb.mxu0 %v2149_v13 }
 0x5c0   :  { %2181 = vmatpush.msrb.mxu0 %v2148_v49 }
 0x5c2   :  { %2182 = vmatpush.msrb.mxu0 %v2147_v43 }
 0x62b   :  { %v2016_v22 = vpop.f32.mrf.mxu0  ;;  %v2036_v60 = vpop.f32.mrf.mxu1 }
 0x62c   :  { %v2079_v27 = vadd.f32 %v2016_v22, %v447_v12  ;;  %v2080_v25 = vadd.f32 %v2036_v60, %v4172_v28 }
 0x62e   :  { %v2254_v7 = vmul.f32 -1.442695, %v2079_v27  ;;  %v2255_v4 = vmul.f32 -1.442695, %v2080_v25 }
 0x630   :  { %2384 = vpow2.f32 %v2254_v7 }
 0x631   :  { %2386 = vpow2.f32 %v2255_v4 }
 0x632   :  { %v2076_v10 = vpop.f32.mrf.mxu3  ;;  %v2056_v57 = vpop.f32.mrf.mxu2 }
 0x633   :  { %v2082_v41 = vadd.f32 %v2076_v10, %v4173_v11  ;;  %v2081_v1 = vadd.f32 %v2056_v57, %v4174_v42 }
 0x635   :  { %v2256_v15 = vmul.f32 -1.442695, %v2082_v41 }
 0x636   :  { %v2385_v37 = vpop.eup %2384 }
 0x637   :  { %v2387_v23 = vpop.eup %2386  ;;  %v2086_v59 = vadd.f32 1.0, %v2385_v37  ;;  %2388 = vpow2.f32 %v2256_v15 }
 0x638   :  { %v2105_v34 = vadd.f32 1.0, %v2387_v23 }
 0x639   :  { %2390 = vrcp.f32 %v2086_v59  ;;  %v2098_v53 = vand.u32 2147483648, %v2086_v59  ;;  %v2096_v33 = vand.u32 2147483647, %v2086_v59  ;;  %vm2092_vm6 = vweird.f32 %v2086_v59 }
 0x63a   :  { %2392 = vrcp.f32 %v2105_v34  ;;  %v2117_v35 = vand.u32 2147483648, %v2105_v34  ;;  %v2115_v44 = vand.u32 2147483647, %v2105_v34  ;;  %vm2111_vm7 = vweird.f32 %v2105_v34 }
 0x63b   :  { %v2099_v14 = vor.u32 1.1754944e-38, %v2098_v53  ;;  %vm2097_vm10 = vcmp.eq.f32.partialorder %v2096_v33, 8.507059e+37 }
 0x63c   :  { %v2118_v48 = vor.u32 1.1754944e-38, %v2117_v35  ;;  %vm2116_vm11 = vcmp.eq.f32.partialorder %v2115_v44, 8.507059e+37 }
 0x63d   :  { %v2389_v6 = vpop.eup %2388 }
 0x63e   :  { %v2125_v50 = vadd.f32 1.0, %v2389_v6 }
 0x63f   :  { %v2391_v58 = vpop.eup %2390 }
 0x640   :  { %v2393_v39 = vpop.eup %2392  ;;  %v2088_v54 = vmul.f32 %v2391_v58, %v2086_v59  ;;  %2394 = vrcp.f32 %v2125_v50  ;;  %vm2093_vm4 = vweird.f32 %v2391_v58  ;;  %v2137_v24 = vand.u32 2147483648, %v2125_v50 }
 0x641   :  { %v2107_v32 = vmul.f32 %v2393_v39, %v2105_v34  ;;  %2396 = vtanh.f32 %v2081_v1  ;;  %vm2112_vm5 = vweird.f32 %v2393_v39  ;;  %vm2094_vm8 = vmor %vm2092_vm6, %vm2093_vm4  ;;  %vm2131_vm13 = vweird.f32 %v2125_v50 }
 0x642   :  { %v2089_v61 = vsub.f32 1.0, %v2088_v54  ;;  %vm2113_vm9 = vmor %vm2111_vm7, %vm2112_vm5  ;;  %v2135_v19 = vand.u32 2147483647, %v2125_v50  ;;  %v2138_v36 = vor.u32 1.1754944e-38, %v2137_v24 }
 0x643   :  { %v2108_v8 = vsub.f32 1.0, %v2107_v32 }
 0x644   :  { %v2090_v51 = vmul.f32 %v2391_v58, %v2089_v61  ;;  %vm2136_vm15 = vcmp.eq.f32.partialorder %v2135_v19, 8.507059e+37 }
 0x645   :  { %v2109_v56 = vmul.f32 %v2393_v39, %v2108_v8 }
 0x646   :  { %v2395_v2 = vpop.eup %2394  ;;  %v2091_v38 = vadd.f32 %v2391_v58, %v2090_v51 }
 0x647   :  { %v2110_v62 = vadd.f32 %v2393_v39, %v2109_v56  ;;  %v2127_v31 = vmul.f32 %v2395_v2, %v2125_v50  ;;  %v2397_v26 = vpop.eup %2396  ;;  %vm2132_vm12 = vweird.f32 %v2395_v2 }
 0x648   :  { %v2095_v52 = vsel %vm2094_vm8, %v2391_v58, %v2091_v38  ;;  %vm2133_vm14 = vmor %vm2131_vm13, %vm2132_vm12 }
 0x649   :  { %v2100_v0 = vsel %vm2097_vm10, %v2099_v14, %v2095_v52  ;;  %v2114_v29 = vsel %vm2113_vm9, %v2393_v39, %v2110_v62  ;;  %v2128_v55 = vsub.f32 1.0, %v2127_v31 }
 0x64a   :  { %v2119_v16 = vsel %vm2116_vm11, %v2118_v48, %v2114_v29  ;;  %v2142_v40 = vmul.f32 %v2397_v26, %v2100_v0 }
 0x64b   :  { %v2141_v17 = vmul.f32 %v2119_v16, %v3825_v9  ;;  %v2129_v30 = vmul.f32 %v2395_v2, %v2128_v55  ;;  %v2271_v9 = vld [vmem:[%s3847_s5] ss:$0 sm:$0xff]  ;;  %s2214_s5 = sshll.u32 %s3848_s6, 4  ;;  %s2215_s5 = int_to_ptr.hbm [resolvable:$true] %s2214_s5 }
 0x64d   :  { %v2143_v45 = vadd.f32 %v2142_v40, %v2141_v17  ;;  %v2130_v46 = vadd.f32 %v2395_v2, %v2129_v30 }
 0x64f   :  { %2398 = vtanh.f32 %v2143_v45  ;;  %v2134_v21 = vsel %vm2133_vm14, %v2395_v2, %v2130_v46 }
 0x650   :  { %v2139_v12 = vsel %vm2136_vm15, %v2138_v36, %v2134_v21 }
 0x655   :  { %v2399_v18 = vpop.eup %2398 }
 0x656   :  { %v2145_v22 = vmul.f32 %v2399_v18, %v2139_v12 }
 0x658   :  { %v2146_v60 = vmax.f32 %v2145_v22, 0.0 }
 0x65a   :  { %2183 = vmatmul.f32.vlgmr.msrb.gmra.mxu0 %v2146_v60 }
 0x6d7   :  { %v2184_v20 = vpop.f32.mrf.mxu0 }
 0x6d8   :  { %v2185_v27 = vadd.f32 %v2271_v9, %v2184_v20 }
 0x6da   :  { %v2257_v28 = vmul.f32 -1.442695, %v2185_v27 }
 0x6dc   :  { %2400 = vpow2.f32 %v2257_v28 }
 0x6e2   :  { %v2401_v25 = vpop.eup %2400 }
 0x6e3   :  { %v2190_v3 = vadd.f32 1.0, %v2401_v25 }
 0x6e5   :  { %2402 = vrcp.f32 %v2190_v3  ;;  %v2202_v5 = vand.u32 2147483648, %v2190_v3  ;;  %v2200_v10 = vand.u32 2147483647, %v2190_v3  ;;  %vm2196_vm1 = vweird.f32 %v2190_v3 }
 0x6e7   :  { %v2203_v41 = vor.u32 1.1754944e-38, %v2202_v5  ;;  %vm2201_vm3 = vcmp.eq.f32.partialorder %v2200_v10, 8.507059e+37 }
 0x6eb   :  { %v2403_v7 = vpop.eup %2402 }
 0x6ec   :  { %v2192_v4 = vmul.f32 %v2403_v7, %v2190_v3  ;;  %vm2197_vm0 = vweird.f32 %v2403_v7 }
 0x6ed   :  { %vm2198_vm2 = vmor %vm2196_vm1, %vm2197_vm0 }
 0x6ee   :  { %v2193_v47 = vsub.f32 1.0, %v2192_v4 }
 0x6f0   :  { %v2194_v63 = vmul.f32 %v2403_v7, %v2193_v47 }
 0x6f2   :  { %v2195_v11 = vadd.f32 %v2403_v7, %v2194_v63 }
 0x6f4   :  { %v2199_v13 = vsel %vm2198_vm2, %v2403_v7, %v2195_v11 }
 0x6f5   :  { %v2204_v15 = vsel %vm2201_vm3, %v2203_v41, %v2199_v13 }
 0x6f6   :  { %2206 = vst [vmem:[#allocation12] sm:$0xff] %v2204_v15 }
 0x6f7   :  { %2217 = dma.vmem_to_hbm [thread:$0]  %s2213_s26, 128, %s2215_s5, [#allocation5]  }
 0x6f8   :  { %2647 = dma.done.wait [#allocation5], 128  }
 0x6f9   :  { %2648 = vsyncadd [#allocation5], 4294967168 }
 0x6fa   :  { %2222 = vsyncpa [#allocation4], 1 }
 0x6fb   :  { %2223 = vsyncpa [#allocation7], 1 }
 0x6fc   :  { %2224 = vsyncpa [#allocation10], 1 }
 0x6fd   :  { %2225 = vsyncpa [#allocation5], 1 }

</bundles_post_ra>
